<compile_context>
chip_gen: v6e
topology: v6e:2x2x1
jax: 0.10.0
libtpu: 0.0.40
codegen_flags: <defaults>
</compile_context>

<pallas_src>
import jax
import jax.numpy as jnp
from jax.experimental import pallas as pl
from jax.experimental.pallas import tpu as pltpu

EPS = 1e-8


def _round_up(x, m):
    return ((x + m - 1) // m) * m


# ----------------------------------------------------------------------------
# Fused kernel: bottleneck + Conv1DBlock(grid axis) + residual + mean pool
# ----------------------------------------------------------------------------
def make_kernel(NB, K, T, P, W, LEFT, Wp, Cin, C, H):
    inv_bn = 1.0 / (Cin * T)
    inv_hid = 1.0 / (H * T)
    inv_t = 1.0 / T

    def prelu(v, a):
        return jnp.where(v >= 0, v, a * v)

    def kernel(offs_ref, a1_ref, a2_ref,
               x_ref, s_ref, st_ref, mrow_ref,
               bn_g_ref, bn_be_ref, bn_w_ref, bn_b_ref,
               w_in_ref, b_in_ref, g1_ref, be1_ref,
               w_dw_ref, b_dw_ref, g2_ref, be2_ref,
               w_res_ref, b_res_ref,
               o_ref,
               out_acc, hpad):
        j = pl.program_id(1)

        S = s_ref[...]          # [W, P] indicator of sample p's real rows
        ST = st_ref[...]        # [P, W]
        mrow = mrow_ref[...]    # [W, 1] 1 on real rows, 0 on inter-sample gaps

        def seg_globln(h, gamma, beta, inv_n):
            # Segmented (per packed sample) GlobLN, single-pass stats:
            # both reductions go through back-to-back MXU matmuls.
            sums = jnp.dot(ST, h, preferred_element_type=jnp.float32)     # [P, Ch]
            sq = jnp.dot(ST, h * h, preferred_element_type=jnp.float32)   # [P, Ch]
            m = jnp.sum(sums, axis=1, keepdims=True) * inv_n              # [P, 1]
            ex2 = jnp.sum(sq, axis=1, keepdims=True) * inv_n              # [P, 1]
            inv = jax.lax.rsqrt(ex2 - m * m + EPS)                        # [P, 1]
            m_f = jnp.dot(S, m, preferred_element_type=jnp.float32)       # [W, 1]
            i_f = jnp.dot(S, inv, preferred_element_type=jnp.float32)     # [W, 1]
            return gamma * ((h - m_f) * i_f) + beta

        @pl.when(j == 0)
        def _():
            # Halo rows of hpad are never written by the block body; zero them
            # once per batch group (gated on the *arbitrary* axis => correct
            # regardless of how the parallel batch axis is sharded over cores).
            if LEFT > 0:
                hpad[:LEFT, :] = jnp.zeros((LEFT, H), jnp.float32)
            if Wp > LEFT + W:
                hpad[LEFT + W:, :] = jnp.zeros((Wp - LEFT - W, H), jnp.float32)
            # TCN bottleneck: GlobLN(in_chan) + 1x1 conv, stored into the carry.
            xin = x_ref[0]                                                # [W, Cin]
            nx = seg_globln(xin, bn_g_ref[...], bn_be_ref[...], inv_bn)
            out_acc[...] = (jnp.dot(nx, bn_w_ref[...],
                                    preferred_element_type=jnp.float32)
                            + bn_b_ref[...])                              # [W, C]

        out = out_acc[...]                                                # [W, C]

        # ---------------- Conv1DBlock j ----------------
        h = jnp.dot(out, w_in_ref[0],
                    preferred_element_type=jnp.float32) + b_in_ref[0]     # [W, H]
        h = prelu(h, a1_ref[j])
        h = seg_globln(h, g1_ref[0], be1_ref[0], inv_hid)

        # Depthwise dilated conv ('same', zero padded).  Gap rows are zeroed via
        # mrow so dilated taps never read a neighbouring sample's data.
        hpad[LEFT:LEFT + W, :] = h * mrow
        wdw = w_dw_ref[0]                                                 # [K, H]
        acc = jnp.zeros((W, H), jnp.float32)
        for k in range(K):                                                # K static
            off = offs_ref[j * K + k]          # = LEFT - pad_j + k*dil_j (SMEM)
            acc = acc + wdw[k:k + 1, :] * hpad[pl.ds(off, W), :]
        h = acc + b_dw_ref[0]

        h = prelu(h, a2_ref[j])
        h = seg_globln(h, g2_ref[0], be2_ref[0], inv_hid)
        res = jnp.dot(h, w_res_ref[0],
                      preferred_element_type=jnp.float32) + b_res_ref[0]  # [W, C]
        out_acc[...] = out + res                                          # fused residual

        @pl.when(j == pl.num_programs(1) - 1)
        def _():
            # Per-sample temporal mean pooling (gap rows excluded by ST).
            o_ref[0] = jnp.dot(ST, out_acc[...],
                               preferred_element_type=jnp.float32) * inv_t  # [P, C]

    return kernel


def cl_model_forward(x, params, *, n_blocks, n_repeats, kernel_size,
                     samples_per_step=None):
    B, Cin, T = x.shape
    C = params["bn_w"].shape[0]                 # out_chan
    H = params["blocks"][0]["w_in"].shape[0]    # hid_chan
    NB = n_blocks * n_repeats
    K = kernel_size

    # Static dilation / padding schedule (matches TCN.__init__); assumes odd K.
    dils, pads = [], []
    for _ in range(n_repeats):
        for bexp in range(n_blocks):
            d = 2 ** bexp
            dils.append(d)
            pads.append((K - 1) * d // 2)
    halo = max(max(pads), max((K - 1) * d - p for d, p in zip(dils, pads)))

    GAP = halo                     # zero rows between packed samples
    Ts = T + GAP                   # per-sample slot width (time axis)

    # Choose how many samples to pack per grid step (divisor of B).
    if samples_per_step is None:
        target = max(1, -(-128 // Ts))
        P = 1
        for d in range(1, min(B, target) + 1):
            if B % d == 0:
                P = d
    else:
        P = int(samples_per_step)
    assert B % P == 0, "samples_per_step must divide batch"
    Gg = B // P
    W = P * Ts
    LEFT = _round_up(halo, 8)
    Wp = _round_up(LEFT + W + halo, 8)

    # ---- pack input: [B, Cin, T] -> [Gg, W, Cin] (time on rows, zero gaps) ----
    xg = x.reshape(Gg, P, Cin, T).transpose(0, 1, 3, 2)       # [Gg, P, T, Cin]
    xg = jnp.pad(xg, ((0, 0), (0, 0), (0, GAP), (0, 0)))
    x_packed = xg.reshape(Gg, W, Cin).astype(jnp.float32)

    # Segment matrices for per-sample stats / pooling.
    col = jnp.arange(W)
    real = (col % Ts) < T
    seg = col // Ts
    S = (real[:, None] & (seg[:, None] == jnp.arange(P)[None, :])).astype(jnp.float32)
    ST = S.T
    mrow = real.astype(jnp.float32)[:, None]                  # [W, 1]

    # Per-block scalar schedule (SMEM): tap offsets into hpad, PReLU alphas.
    offs = jnp.asarray([LEFT - pads[b] + k * dils[b]
                        for b in range(NB) for k in range(K)], dtype=jnp.int32)
    a1 = jnp.stack([params["blocks"][b]["a1"][0] for b in range(NB)]).astype(jnp.float32)
    a2 = jnp.stack([params["blocks"][b]["a2"][0] for b in range(NB)]).astype(jnp.float32)

    # Stacked per-block weights, transposed for the [time, channel] layout.
    stack = lambda name: jnp.stack([b[name] for b in params["blocks"]])
    w_in_t = jnp.transpose(stack("w_in"), (0, 2, 1))          # [NB, C, H]
    b_in = stack("b_in").reshape(NB, 1, H)
    g1 = stack("gamma1").reshape(NB, 1, H)
    be1 = stack("beta1").reshape(NB, 1, H)
    w_dw_t = jnp.transpose(stack("w_dw"), (0, 2, 1))          # [NB, K, H]
    b_dw = stack("b_dw").reshape(NB, 1, H)
    g2 = stack("gamma2").reshape(NB, 1, H)
    be2 = stack("beta2").reshape(NB, 1, H)
    w_res_t = jnp.transpose(stack("w_res"), (0, 2, 1))        # [NB, H, C]
    b_res = stack("b_res").reshape(NB, 1, C)

    bn_g = params["bn_gamma"].reshape(1, Cin)
    bn_be = params["bn_beta"].reshape(1, Cin)
    bn_w_t = params["bn_w"].T                                 # [Cin, C]
    bn_b = params["bn_b"].reshape(1, C)

    kern = make_kernel(NB, K, T, P, W, LEFT, Wp, Cin, C, H)

    smem = pl.BlockSpec(memory_space=pltpu.MemorySpace.SMEM)
    const = lambda shape: pl.BlockSpec(shape, lambda i, j, _n=len(shape): (0,) * _n)
    perblk = lambda shape: pl.BlockSpec((1,) + shape, lambda i, j: (j, 0, 0))

    in_specs = [
        smem, smem, smem,                                     # offs, a1, a2
        pl.BlockSpec((1, W, Cin), lambda i, j: (i, 0, 0)),    # packed input
        const((W, P)), const((P, W)), const((W, 1)),          # S, S^T, row mask
        const((1, Cin)), const((1, Cin)),                     # bottleneck LN gamma/beta
        const((Cin, C)), const((1, C)),                       # bottleneck 1x1 conv
        perblk((C, H)), perblk((1, H)),                       # w_in^T, b_in   (streamed)
        perblk((1, H)), perblk((1, H)),                       # gamma1, beta1
        perblk((K, H)), perblk((1, H)),                       # w_dw^T, b_dw
        perblk((1, H)), perblk((1, H)),                       # gamma2, beta2
        perblk((H, C)), perblk((1, C)),                       # w_res^T, b_res
    ]
    out_spec = pl.BlockSpec((1, P, C), lambda i, j: (i, 0, 0))

    # VMEM budget derived from the actual buffers (x2 for double buffering).
    f4 = 4
    blk_bytes = f4 * (W * Cin + W * P + P * W + W + 2 * Cin + Cin * C + C
                      + C * H + 6 * H + K * H + H * C + C + P * C)
    scratch_bytes = f4 * (W * C + Wp * H)
    vmem_limit = int(min(48 * 2 ** 20,
                         max(16 * 2 ** 20, 2 * blk_bytes + scratch_bytes + (2 << 20))))

    ln_flops = lambda ch: 4 * P * W * ch + 4 * W
    blk_flops = 4 * W * C * H + 2 * K * W * H + 2 * ln_flops(H) + 8 * W * H
    flops = Gg * (2 * W * Cin * C + ln_flops(Cin) + NB * blk_flops + 2 * P * W * C)
    weight_bytes = f4 * (NB * (C * H + 6 * H + K * H + H * C + C)
                         + 2 * Cin + Cin * C + C)
    bytes_accessed = int(f4 * x_packed.size + Gg * weight_bytes
                         + f4 * (2 * W * P + W) + f4 * B * C)

    pooled = pl.pallas_call(
        kern,
        out_shape=jax.ShapeDtypeStruct((Gg, P, C), jnp.float32),
        grid=(Gg, NB),
        in_specs=in_specs,
        out_specs=out_spec,
        scratch_shapes=[pltpu.VMEM((W, C), jnp.float32),      # residual carry
                        pltpu.VMEM((Wp, H), jnp.float32)],    # padded dw-conv buffer
        compiler_params=pltpu.CompilerParams(
            dimension_semantics=("parallel", "arbitrary"),
            vmem_limit_bytes=vmem_limit),
        cost_estimate=pl.CostEstimate(
            flops=int(flops),
            transcendentals=int(Gg * P * (2 * NB + 1)),
            bytes_accessed=bytes_accessed),
    )(
        offs, a1, a2,
        x_packed, S, ST, mrow,
        bn_g, bn_be, bn_w_t, bn_b,
        w_in_t, b_in, g1, be1,
        w_dw_t, b_dw, g2, be2,
        w_res_t, b_res,
    )

    # Classifier head: single lane-dense [B, C] x [C, nc] matmul outside kernel.
    feats = pooled.reshape(B, C)
    return feats @ params["head_w"].T + params["head_b"][None, :]


# ----------------------------------------------------------------------------
# Parameter init (deterministic, synthetic)
# ----------------------------------------------------------------------------
def _uniform(key, shape, scale=0.1):
    return jax.random.uniform(key, shape, jnp.float32, -scale, scale)


def init_params(key, *, nb_classes, in_chan, n_blocks, n_repeats,
                out_chan, hid_chan, kernel_size):
    n_total = n_blocks * n_repeats
    keys = jax.random.split(key, 4 + 6 * n_total)
    ki = iter(range(len(keys)))

    params = {
        "bn_gamma": jnp.ones((in_chan,), jnp.float32),
        "bn_beta": jnp.zeros((in_chan,), jnp.float32),
        "bn_w": _uniform(keys[next(ki)], (out_chan, in_chan)),
        "bn_b": _uniform(keys[next(ki)], (out_chan,)),
        "blocks": [],
        "head_w": _uniform(keys[next(ki)], (nb_classes, out_chan)),
        "head_b": _uniform(keys[next(ki)], (nb_classes,)),
    }
    for _ in range(n_total):
        blk = {
            "w_in": _uniform(keys[next(ki)], (hid_chan, out_chan)),
            "b_in": _uniform(keys[next(ki)], (hid_chan,)),
            "a1": jnp.full((1,), 0.25, jnp.float32),     # PReLU default init
            "gamma1": jnp.ones((hid_chan,), jnp.float32),
            "beta1": jnp.zeros((hid_chan,), jnp.float32),
            "w_dw": _uniform(keys[next(ki)], (hid_chan, kernel_size)),
            "b_dw": _uniform(keys[next(ki)], (hid_chan,)),
            "a2": jnp.full((1,), 0.25, jnp.float32),
            "gamma2": jnp.ones((hid_chan,), jnp.float32),
            "beta2": jnp.zeros((hid_chan,), jnp.float32),
            "w_res": _uniform(keys[next(ki)], (out_chan, hid_chan)),
            "b_res": _uniform(keys[next(ki)], (out_chan,)),
        }
        params["blocks"].append(blk)
    return params


# ----------------------------------------------------------------------------
# Pure-JAX reference (mirrors the PyTorch module) for a correctness check
# ----------------------------------------------------------------------------
def reference_forward(x, params, *, n_blocks, n_repeats, kernel_size):
    def globln(h, gamma, beta):
        mean = h.mean(axis=(1, 2), keepdims=True)
        var = ((h - mean) ** 2).mean(axis=(1, 2), keepdims=True)
        return (gamma[None, :, None] * ((h - mean) * jax.lax.rsqrt(var + EPS))
                + beta[None, :, None])

    def prelu(h, a):
        return jnp.where(h >= 0, h, a * h)

    out = globln(x, params["bn_gamma"], params["bn_beta"])
    out = jnp.einsum("oc,bct->bot", params["bn_w"], out) + params["bn_b"][None, :, None]
    idx = 0
    T = x.shape[-1]
    for _ in range(n_repeats):
        for bexp in range(n_blocks):
            d = 2 ** bexp
            P = (kernel_size - 1) * d // 2
            p = params["blocks"][idx]; idx += 1
            h = jnp.einsum("hc,bct->bht", p["w_in"], out) + p["b_in"][None, :, None]
            h = prelu(h, p["a1"][0])
            h = globln(h, p["gamma1"], p["beta1"])
            hp = jnp.pad(h, ((0, 0), (0, 0), (P, P)))
            acc = jnp.zeros_like(h)
            for k in range(kernel_size):
                acc = acc + p["w_dw"][None, :, k:k + 1] * hp[:, :, k * d:k * d + T]
            h = acc + p["b_dw"][None, :, None]
            h = prelu(h, p["a2"][0])
            h = globln(h, p["gamma2"], p["beta2"])
            res = jnp.einsum("ch,bht->bct", p["w_res"], h) + p["b_res"][None, :, None]
            out = out + res
    feat = out.mean(-1)
    return feat @ params["head_w"].T + params["head_b"][None, :]


# ----------------------------------------------------------------------------
if __name__ == "__main__":
    nb_classes = 10
    in_chan = 8
    n_blocks = 2
    n_repeats = 1
    out_chan = 16
    hid_chan = 32
    kernel_size = 3
    B, T = 8, 32

    key = jax.random.PRNGKey(0)
    pkey, xkey = jax.random.split(key)

    params = init_params(pkey, nb_classes=nb_classes, in_chan=in_chan,
                         n_blocks=n_blocks, n_repeats=n_repeats,
                         out_chan=out_chan, hid_chan=hid_chan,
                         kernel_size=kernel_size)

    x = jax.random.normal(xkey, (B, in_chan, T), jnp.float32)

    logits = cl_model_forward(x, params, n_blocks=n_blocks,
                              n_repeats=n_repeats, kernel_size=kernel_size)
    logits = jax.block_until_ready(logits)

    assert logits.shape == (B, nb_classes)
    assert logits.dtype == jnp.float32

    ref = reference_forward(x, params, n_blocks=n_blocks,
                            n_repeats=n_repeats, kernel_size=kernel_size)
    assert jnp.allclose(logits, ref, atol=2e-3, rtol=2e-3), (
        float(jnp.max(jnp.abs(logits - ref))))

    print("KERNEL_OK")
</pallas_src>

<mosaic_0001>
module attributes {stable_mosaic.version = 11 : i64} {
  func.func @kernel(%arg0: i32, %arg1: i32, %arg2: memref<6xi32, #tpu.memory_space<smem>>, %arg3: memref<2xf32, #tpu.memory_space<smem>>, %arg4: memref<2xf32, #tpu.memory_space<smem>>, %arg5: memref<1x136x8xf32, #tpu.memory_space<vmem>>, %arg6: memref<136x4xf32, #tpu.memory_space<vmem>>, %arg7: memref<4x136xf32, #tpu.memory_space<vmem>>, %arg8: memref<136x1xf32, #tpu.memory_space<vmem>>, %arg9: memref<1x8xf32, #tpu.memory_space<vmem>>, %arg10: memref<1x8xf32, #tpu.memory_space<vmem>>, %arg11: memref<8x16xf32, #tpu.memory_space<vmem>>, %arg12: memref<1x16xf32, #tpu.memory_space<vmem>>, %arg13: memref<1x16x32xf32, #tpu.memory_space<vmem>>, %arg14: memref<1x1x32xf32, #tpu.memory_space<vmem>>, %arg15: memref<1x1x32xf32, #tpu.memory_space<vmem>>, %arg16: memref<1x1x32xf32, #tpu.memory_space<vmem>>, %arg17: memref<1x3x32xf32, #tpu.memory_space<vmem>>, %arg18: memref<1x1x32xf32, #tpu.memory_space<vmem>>, %arg19: memref<1x1x32xf32, #tpu.memory_space<vmem>>, %arg20: memref<1x1x32xf32, #tpu.memory_space<vmem>>, %arg21: memref<1x32x16xf32, #tpu.memory_space<vmem>>, %arg22: memref<1x1x16xf32, #tpu.memory_space<vmem>>, %arg23: memref<1x4x16xf32, #tpu.memory_space<vmem>>, %arg24: memref<136x16xf32, #tpu.memory_space<vmem>>, %arg25: memref<152x32xf32, #tpu.memory_space<vmem>>) attributes {dimension_semantics = [#tpu.dimension_semantics<parallel>, #tpu.dimension_semantics<arbitrary>], iteration_bounds = array<i64: 2, 2>, scalar_prefetch = 0 : i64, scratch_operands = 2 : i64, tpu.core_type = #tpu.core_type<tc>, window_params = [{transform_indices = @transform_0, window_bounds = array<i64: 6>}, {transform_indices = @transform_1, window_bounds = array<i64: 2>}, {transform_indices = @transform_2, window_bounds = array<i64: 2>}, {transform_indices = @transform_3, window_bounds = array<i64: 1, 136, 8>}, {pipeline_mode = #tpu.pipeline_mode<synchronous>, transform_indices = @transform_4, window_bounds = array<i64: 136, 4>}, {pipeline_mode = #tpu.pipeline_mode<synchronous>, transform_indices = @transform_5, window_bounds = array<i64: 4, 136>}, {pipeline_mode = #tpu.pipeline_mode<synchronous>, transform_indices = @transform_6, window_bounds = array<i64: 136, 1>}, {pipeline_mode = #tpu.pipeline_mode<synchronous>, transform_indices = @transform_7, window_bounds = array<i64: 1, 8>}, {pipeline_mode = #tpu.pipeline_mode<synchronous>, transform_indices = @transform_8, window_bounds = array<i64: 1, 8>}, {pipeline_mode = #tpu.pipeline_mode<synchronous>, transform_indices = @transform_9, window_bounds = array<i64: 8, 16>}, {pipeline_mode = #tpu.pipeline_mode<synchronous>, transform_indices = @transform_10, window_bounds = array<i64: 1, 16>}, {transform_indices = @transform_11, window_bounds = array<i64: 1, 16, 32>}, {transform_indices = @transform_12, window_bounds = array<i64: 1, 1, 32>}, {transform_indices = @transform_13, window_bounds = array<i64: 1, 1, 32>}, {transform_indices = @transform_14, window_bounds = array<i64: 1, 1, 32>}, {transform_indices = @transform_15, window_bounds = array<i64: 1, 3, 32>}, {transform_indices = @transform_16, window_bounds = array<i64: 1, 1, 32>}, {transform_indices = @transform_17, window_bounds = array<i64: 1, 1, 32>}, {transform_indices = @transform_18, window_bounds = array<i64: 1, 1, 32>}, {transform_indices = @transform_19, window_bounds = array<i64: 1, 32, 16>}, {transform_indices = @transform_20, window_bounds = array<i64: 1, 1, 16>}, {transform_indices = @transform_21, window_bounds = array<i64: 1, 4, 16>}]} {
    %c0 = arith.constant 0 : index
    %c0_0 = arith.constant 0 : index
    %0 = vector.load %arg6[%c0, %c0_0] : memref<136x4xf32, #tpu.memory_space<vmem>>, vector<136x4xf32>
    %c0_1 = arith.constant 0 : index
    %c0_2 = arith.constant 0 : index
    %1 = vector.load %arg7[%c0_1, %c0_2] : memref<4x136xf32, #tpu.memory_space<vmem>>, vector<4x136xf32>
    %c0_3 = arith.constant 0 : index
    %c0_4 = arith.constant 0 : index
    %2 = vector.load %arg8[%c0_3, %c0_4] : memref<136x1xf32, #tpu.memory_space<vmem>>, vector<136x1xf32>
    %c0_i32 = arith.constant 0 : i32
    %3 = arith.cmpi eq, %arg1, %c0_i32 : i32
    %4 = arith.extui %3 : i1 to i32
    %c0_i32_5 = arith.constant 0 : i32
    %5 = arith.cmpi ne, %4, %c0_i32_5 : i32
    scf.if %5 {
      %cst_71 = arith.constant 0.000000e+00 : f32
      %140 = vector.broadcast %cst_71 : f32 to vector<8x32xf32>
      %c0_72 = arith.constant 0 : index
      %c0_73 = arith.constant 0 : index
      %141 = vector.load %arg25[%c0_72, %c0_73] : memref<152x32xf32, #tpu.memory_space<vmem>>, vector<8x32xf32>
      tpu.vector_store %arg25[%c0_72, %c0_73], %140 {strides = array<i32>} : memref<152x32xf32, #tpu.memory_space<vmem>>, vector<8x32xf32>,
      %cst_74 = arith.constant 0.000000e+00 : f32
      %142 = vector.broadcast %cst_74 : f32 to vector<8x32xf32>
      %c144 = arith.constant 144 : index
      %c0_75 = arith.constant 0 : index
      %143 = vector.load %arg25[%c144, %c0_75] : memref<152x32xf32, #tpu.memory_space<vmem>>, vector<8x32xf32>
      tpu.vector_store %arg25[%c144, %c0_75], %142 {strides = array<i32>} : memref<152x32xf32, #tpu.memory_space<vmem>>, vector<8x32xf32>,
      %c0_76 = arith.constant 0 : index
      %c0_77 = arith.constant 0 : index
      %c0_78 = arith.constant 0 : index
      %144 = vector.load %arg5[%c0_76, %c0_77, %c0_78] : memref<1x136x8xf32, #tpu.memory_space<vmem>>, vector<1x136x8xf32>
      %145 = vector.shape_cast %144 : vector<1x136x8xf32> to vector<136x8xf32>
      %c0_79 = arith.constant 0 : index
      %c0_80 = arith.constant 0 : index
      %146 = vector.load %arg9[%c0_79, %c0_80] : memref<1x8xf32, #tpu.memory_space<vmem>>, vector<1x8xf32>
      %c0_81 = arith.constant 0 : index
      %c0_82 = arith.constant 0 : index
      %147 = vector.load %arg10[%c0_81, %c0_82] : memref<1x8xf32, #tpu.memory_space<vmem>>, vector<1x8xf32>
      %cst_83 = arith.constant dense<0.000000e+00> : vector<4x8xf32>
      %148 = tpu.matmul %1, %145, %cst_83 {dimension_numbers = #tpu.dot_dimension_numbers<[1], [0], [0], [1], [0, 0, 1, 1], [], []>} : vector<4x136xf32>, vector<136x8xf32>, vector<4x8xf32> -> vector<4x8xf32>
      %149 = arith.mulf %145, %145 : vector<136x8xf32>
      %cst_84 = arith.constant dense<0.000000e+00> : vector<4x8xf32>
      %150 = tpu.matmul %1, %149, %cst_84 {dimension_numbers = #tpu.dot_dimension_numbers<[1], [0], [0], [1], [0, 0, 1, 1], [], []>} : vector<4x136xf32>, vector<136x8xf32>, vector<4x8xf32> -> vector<4x8xf32>
      %cst_85 = arith.constant dense<0.000000e+00> : vector<4xf32>
      %151 = vector.multi_reduction <add>, %148, %cst_85 [1] : vector<4x8xf32> to vector<4xf32>
      %152 = vector.shape_cast %151 : vector<4xf32> to vector<4x1xf32>
      %cst_86 = arith.constant 3.906250e-03 : f32
      %153 = vector.broadcast %cst_86 : f32 to vector<4x1xf32>
      %154 = arith.mulf %152, %153 : vector<4x1xf32>
      %cst_87 = arith.constant dense<0.000000e+00> : vector<4xf32>
      %155 = vector.multi_reduction <add>, %150, %cst_87 [1] : vector<4x8xf32> to vector<4xf32>
      %156 = vector.shape_cast %155 : vector<4xf32> to vector<4x1xf32>
      %cst_88 = arith.constant 3.906250e-03 : f32
      %157 = vector.broadcast %cst_88 : f32 to vector<4x1xf32>
      %158 = arith.mulf %156, %157 : vector<4x1xf32>
      %159 = arith.mulf %154, %154 : vector<4x1xf32>
      %160 = arith.subf %158, %159 : vector<4x1xf32>
      %cst_89 = arith.constant 9.99999993E-9 : f32
      %161 = vector.broadcast %cst_89 : f32 to vector<4x1xf32>
      %162 = arith.addf %160, %161 : vector<4x1xf32>
      %163 = math.rsqrt %162 : vector<4x1xf32>
      %cst_90 = arith.constant dense<0.000000e+00> : vector<136x1xf32>
      %164 = tpu.matmul %0, %154, %cst_90 {dimension_numbers = #tpu.dot_dimension_numbers<[1], [0], [0], [1], [0, 0, 1, 1], [], []>} : vector<136x4xf32>, vector<4x1xf32>, vector<136x1xf32> -> vector<136x1xf32>
      %cst_91 = arith.constant dense<0.000000e+00> : vector<136x1xf32>
      %165 = tpu.matmul %0, %163, %cst_91 {dimension_numbers = #tpu.dot_dimension_numbers<[1], [0], [0], [1], [0, 0, 1, 1], [], []>} : vector<136x4xf32>, vector<4x1xf32>, vector<136x1xf32> -> vector<136x1xf32>
      %166 = vector.broadcast %164 : vector<136x1xf32> to vector<136x8xf32>
      %167 = arith.subf %145, %166 : vector<136x8xf32>
      %168 = vector.broadcast %165 : vector<136x1xf32> to vector<136x8xf32>
      %169 = arith.mulf %167, %168 : vector<136x8xf32>
      %170 = vector.broadcast %146 : vector<1x8xf32> to vector<136x8xf32>
      %171 = arith.mulf %170, %169 : vector<136x8xf32>
      %172 = vector.broadcast %147 : vector<1x8xf32> to vector<136x8xf32>
      %173 = arith.addf %171, %172 : vector<136x8xf32>
      %c0_92 = arith.constant 0 : index
      %c0_93 = arith.constant 0 : index
      %174 = vector.load %arg11[%c0_92, %c0_93] : memref<8x16xf32, #tpu.memory_space<vmem>>, vector<8x16xf32>
      %cst_94 = arith.constant dense<0.000000e+00> : vector<136x16xf32>
      %175 = tpu.matmul %173, %174, %cst_94 {dimension_numbers = #tpu.dot_dimension_numbers<[1], [0], [0], [1], [0, 0, 1, 1], [], []>} : vector<136x8xf32>, vector<8x16xf32>, vector<136x16xf32> -> vector<136x16xf32>
      %c0_95 = arith.constant 0 : index
      %c0_96 = arith.constant 0 : index
      %176 = vector.load %arg12[%c0_95, %c0_96] : memref<1x16xf32, #tpu.memory_space<vmem>>, vector<1x16xf32>
      %177 = vector.broadcast %176 : vector<1x16xf32> to vector<136x16xf32>
      %178 = arith.addf %175, %177 : vector<136x16xf32>
      %c0_97 = arith.constant 0 : index
      %c0_98 = arith.constant 0 : index
      %179 = vector.load %arg24[%c0_97, %c0_98] : memref<136x16xf32, #tpu.memory_space<vmem>>, vector<136x16xf32>
      tpu.vector_store %arg24[%c0_97, %c0_98], %178 {strides = array<i32>} : memref<136x16xf32, #tpu.memory_space<vmem>>, vector<136x16xf32>,
    } else {
    }
    %c0_6 = arith.constant 0 : index
    %c0_7 = arith.constant 0 : index
    %6 = vector.load %arg24[%c0_6, %c0_7] : memref<136x16xf32, #tpu.memory_space<vmem>>, vector<136x16xf32>
    %c0_8 = arith.constant 0 : index
    %c0_9 = arith.constant 0 : index
    %c0_10 = arith.constant 0 : index
    %7 = vector.load %arg13[%c0_8, %c0_9, %c0_10] : memref<1x16x32xf32, #tpu.memory_space<vmem>>, vector<1x16x32xf32>
    %8 = vector.shape_cast %7 : vector<1x16x32xf32> to vector<16x32xf32>
    %cst = arith.constant dense<0.000000e+00> : vector<136x32xf32>
    %9 = tpu.matmul %6, %8, %cst {dimension_numbers = #tpu.dot_dimension_numbers<[1], [0], [0], [1], [0, 0, 1, 1], [], []>} : vector<136x16xf32>, vector<16x32xf32>, vector<136x32xf32> -> vector<136x32xf32>
    %c0_11 = arith.constant 0 : index
    %c0_12 = arith.constant 0 : index
    %c0_13 = arith.constant 0 : index
    %10 = vector.load %arg14[%c0_11, %c0_12, %c0_13] : memref<1x1x32xf32, #tpu.memory_space<vmem>>, vector<1x1x32xf32>
    %11 = vector.shape_cast %10 : vector<1x1x32xf32> to vector<1x32xf32>
    %12 = vector.broadcast %11 : vector<1x32xf32> to vector<136x32xf32>
    %13 = arith.addf %9, %12 : vector<136x32xf32>
    %14 = arith.index_cast %arg1 : i32 to index
    %15 = memref.load %arg3[%14] : memref<2xf32, #tpu.memory_space<smem>>
    %cst_14 = arith.constant 0.000000e+00 : f32
    %16 = vector.broadcast %cst_14 : f32 to vector<136x32xf32>
    %17 = arith.cmpf oge, %13, %16 : vector<136x32xf32>
    %18 = vector.broadcast %15 : f32 to vector<136x32xf32>
    %19 = arith.mulf %18, %13 : vector<136x32xf32>
    %20 = arith.select %17, %13, %19 : vector<136x32xi1>, vector<136x32xf32>
    %c0_15 = arith.constant 0 : index
    %c0_16 = arith.constant 0 : index
    %c0_17 = arith.constant 0 : index
    %21 = vector.load %arg15[%c0_15, %c0_16, %c0_17] : memref<1x1x32xf32, #tpu.memory_space<vmem>>, vector<1x1x32xf32>
    %22 = vector.shape_cast %21 : vector<1x1x32xf32> to vector<1x32xf32>
    %c0_18 = arith.constant 0 : index
    %c0_19 = arith.constant 0 : index
    %c0_20 = arith.constant 0 : index
    %23 = vector.load %arg16[%c0_18, %c0_19, %c0_20] : memref<1x1x32xf32, #tpu.memory_space<vmem>>, vector<1x1x32xf32>
    %24 = vector.shape_cast %23 : vector<1x1x32xf32> to vector<1x32xf32>
    %cst_21 = arith.constant dense<0.000000e+00> : vector<4x32xf32>
    %25 = tpu.matmul %1, %20, %cst_21 {dimension_numbers = #tpu.dot_dimension_numbers<[1], [0], [0], [1], [0, 0, 1, 1], [], []>} : vector<4x136xf32>, vector<136x32xf32>, vector<4x32xf32> -> vector<4x32xf32>
    %26 = arith.mulf %20, %20 : vector<136x32xf32>
    %cst_22 = arith.constant dense<0.000000e+00> : vector<4x32xf32>
    %27 = tpu.matmul %1, %26, %cst_22 {dimension_numbers = #tpu.dot_dimension_numbers<[1], [0], [0], [1], [0, 0, 1, 1], [], []>} : vector<4x136xf32>, vector<136x32xf32>, vector<4x32xf32> -> vector<4x32xf32>
    %cst_23 = arith.constant dense<0.000000e+00> : vector<4xf32>
    %28 = vector.multi_reduction <add>, %25, %cst_23 [1] : vector<4x32xf32> to vector<4xf32>
    %29 = vector.shape_cast %28 : vector<4xf32> to vector<4x1xf32>
    %cst_24 = arith.constant 9.765625E-4 : f32
    %30 = vector.broadcast %cst_24 : f32 to vector<4x1xf32>
    %31 = arith.mulf %29, %30 : vector<4x1xf32>
    %cst_25 = arith.constant dense<0.000000e+00> : vector<4xf32>
    %32 = vector.multi_reduction <add>, %27, %cst_25 [1] : vector<4x32xf32> to vector<4xf32>
    %33 = vector.shape_cast %32 : vector<4xf32> to vector<4x1xf32>
    %cst_26 = arith.constant 9.765625E-4 : f32
    %34 = vector.broadcast %cst_26 : f32 to vector<4x1xf32>
    %35 = arith.mulf %33, %34 : vector<4x1xf32>
    %36 = arith.mulf %31, %31 : vector<4x1xf32>
    %37 = arith.subf %35, %36 : vector<4x1xf32>
    %cst_27 = arith.constant 9.99999993E-9 : f32
    %38 = vector.broadcast %cst_27 : f32 to vector<4x1xf32>
    %39 = arith.addf %37, %38 : vector<4x1xf32>
    %40 = math.rsqrt %39 : vector<4x1xf32>
    %cst_28 = arith.constant dense<0.000000e+00> : vector<136x1xf32>
    %41 = tpu.matmul %0, %31, %cst_28 {dimension_numbers = #tpu.dot_dimension_numbers<[1], [0], [0], [1], [0, 0, 1, 1], [], []>} : vector<136x4xf32>, vector<4x1xf32>, vector<136x1xf32> -> vector<136x1xf32>
    %cst_29 = arith.constant dense<0.000000e+00> : vector<136x1xf32>
    %42 = tpu.matmul %0, %40, %cst_29 {dimension_numbers = #tpu.dot_dimension_numbers<[1], [0], [0], [1], [0, 0, 1, 1], [], []>} : vector<136x4xf32>, vector<4x1xf32>, vector<136x1xf32> -> vector<136x1xf32>
    %43 = vector.broadcast %41 : vector<136x1xf32> to vector<136x32xf32>
    %44 = arith.subf %20, %43 : vector<136x32xf32>
    %45 = vector.broadcast %42 : vector<136x1xf32> to vector<136x32xf32>
    %46 = arith.mulf %44, %45 : vector<136x32xf32>
    %47 = vector.broadcast %22 : vector<1x32xf32> to vector<136x32xf32>
    %48 = arith.mulf %47, %46 : vector<136x32xf32>
    %49 = vector.broadcast %24 : vector<1x32xf32> to vector<136x32xf32>
    %50 = arith.addf %48, %49 : vector<136x32xf32>
    %51 = vector.broadcast %2 : vector<136x1xf32> to vector<136x32xf32>
    %52 = arith.mulf %50, %51 : vector<136x32xf32>
    %c8 = arith.constant 8 : index
    %c0_30 = arith.constant 0 : index
    %53 = vector.load %arg25[%c8, %c0_30] : memref<152x32xf32, #tpu.memory_space<vmem>>, vector<136x32xf32>
    tpu.vector_store %arg25[%c8, %c0_30], %52 {strides = array<i32>} : memref<152x32xf32, #tpu.memory_space<vmem>>, vector<136x32xf32>,
    %c0_31 = arith.constant 0 : index
    %c0_32 = arith.constant 0 : index
    %c0_33 = arith.constant 0 : index
    %54 = vector.load %arg17[%c0_31, %c0_32, %c0_33] : memref<1x3x32xf32, #tpu.memory_space<vmem>>, vector<1x3x32xf32>
    %55 = vector.shape_cast %54 : vector<1x3x32xf32> to vector<3x32xf32>
    %cst_34 = arith.constant 0.000000e+00 : f32
    %56 = vector.broadcast %cst_34 : f32 to vector<136x32xf32>
    %c3_i32 = arith.constant 3 : i32
    %57 = arith.muli %arg1, %c3_i32 : i32
    %c0_i32_35 = arith.constant 0 : i32
    %58 = arith.addi %57, %c0_i32_35 : i32
    %59 = arith.index_cast %58 : i32 to index
    %60 = memref.load %arg2[%59] : memref<6xi32, #tpu.memory_space<smem>>
    %61 = vector.extract_strided_slice %55 {offsets = [0, 0], sizes = [1, 32], strides = [1, 1]} : vector<3x32xf32> to vector<1x32xf32>
    %62 = arith.index_cast %60 : i32 to index
    %c0_36 = arith.constant 0 : index
    %63 = vector.load %arg25[%62, %c0_36] : memref<152x32xf32, #tpu.memory_space<vmem>>, vector<136x32xf32>
    %64 = vector.broadcast %61 : vector<1x32xf32> to vector<136x32xf32>
    %65 = arith.mulf %64, %63 : vector<136x32xf32>
    %66 = arith.addf %56, %65 : vector<136x32xf32>
    %c3_i32_37 = arith.constant 3 : i32
    %67 = arith.muli %arg1, %c3_i32_37 : i32
    %c1_i32 = arith.constant 1 : i32
    %68 = arith.addi %67, %c1_i32 : i32
    %69 = arith.index_cast %68 : i32 to index
    %70 = memref.load %arg2[%69] : memref<6xi32, #tpu.memory_space<smem>>
    %71 = vector.extract_strided_slice %55 {offsets = [1, 0], sizes = [1, 32], strides = [1, 1]} : vector<3x32xf32> to vector<1x32xf32>
    %72 = arith.index_cast %70 : i32 to index
    %c0_38 = arith.constant 0 : index
    %73 = vector.load %arg25[%72, %c0_38] : memref<152x32xf32, #tpu.memory_space<vmem>>, vector<136x32xf32>
    %74 = vector.broadcast %71 : vector<1x32xf32> to vector<136x32xf32>
    %75 = arith.mulf %74, %73 : vector<136x32xf32>
    %76 = arith.addf %66, %75 : vector<136x32xf32>
    %c3_i32_39 = arith.constant 3 : i32
    %77 = arith.muli %arg1, %c3_i32_39 : i32
    %c2_i32 = arith.constant 2 : i32
    %78 = arith.addi %77, %c2_i32 : i32
    %79 = arith.index_cast %78 : i32 to index
    %80 = memref.load %arg2[%79] : memref<6xi32, #tpu.memory_space<smem>>
    %81 = vector.extract_strided_slice %55 {offsets = [2, 0], sizes = [1, 32], strides = [1, 1]} : vector<3x32xf32> to vector<1x32xf32>
    %82 = arith.index_cast %80 : i32 to index
    %c0_40 = arith.constant 0 : index
    %83 = vector.load %arg25[%82, %c0_40] : memref<152x32xf32, #tpu.memory_space<vmem>>, vector<136x32xf32>
    %84 = vector.broadcast %81 : vector<1x32xf32> to vector<136x32xf32>
    %85 = arith.mulf %84, %83 : vector<136x32xf32>
    %86 = arith.addf %76, %85 : vector<136x32xf32>
    %c0_41 = arith.constant 0 : index
    %c0_42 = arith.constant 0 : index
    %c0_43 = arith.constant 0 : index
    %87 = vector.load %arg18[%c0_41, %c0_42, %c0_43] : memref<1x1x32xf32, #tpu.memory_space<vmem>>, vector<1x1x32xf32>
    %88 = vector.shape_cast %87 : vector<1x1x32xf32> to vector<1x32xf32>
    %89 = vector.broadcast %88 : vector<1x32xf32> to vector<136x32xf32>
    %90 = arith.addf %86, %89 : vector<136x32xf32>
    %91 = arith.index_cast %arg1 : i32 to index
    %92 = memref.load %arg4[%91] : memref<2xf32, #tpu.memory_space<smem>>
    %cst_44 = arith.constant 0.000000e+00 : f32
    %93 = vector.broadcast %cst_44 : f32 to vector<136x32xf32>
    %94 = arith.cmpf oge, %90, %93 : vector<136x32xf32>
    %95 = vector.broadcast %92 : f32 to vector<136x32xf32>
    %96 = arith.mulf %95, %90 : vector<136x32xf32>
    %97 = arith.select %94, %90, %96 : vector<136x32xi1>, vector<136x32xf32>
    %c0_45 = arith.constant 0 : index
    %c0_46 = arith.constant 0 : index
    %c0_47 = arith.constant 0 : index
    %98 = vector.load %arg19[%c0_45, %c0_46, %c0_47] : memref<1x1x32xf32, #tpu.memory_space<vmem>>, vector<1x1x32xf32>
    %99 = vector.shape_cast %98 : vector<1x1x32xf32> to vector<1x32xf32>
    %c0_48 = arith.constant 0 : index
    %c0_49 = arith.constant 0 : index
    %c0_50 = arith.constant 0 : index
    %100 = vector.load %arg20[%c0_48, %c0_49, %c0_50] : memref<1x1x32xf32, #tpu.memory_space<vmem>>, vector<1x1x32xf32>
    %101 = vector.shape_cast %100 : vector<1x1x32xf32> to vector<1x32xf32>
    %cst_51 = arith.constant dense<0.000000e+00> : vector<4x32xf32>
    %102 = tpu.matmul %1, %97, %cst_51 {dimension_numbers = #tpu.dot_dimension_numbers<[1], [0], [0], [1], [0, 0, 1, 1], [], []>} : vector<4x136xf32>, vector<136x32xf32>, vector<4x32xf32> -> vector<4x32xf32>
    %103 = arith.mulf %97, %97 : vector<136x32xf32>
    %cst_52 = arith.constant dense<0.000000e+00> : vector<4x32xf32>
    %104 = tpu.matmul %1, %103, %cst_52 {dimension_numbers = #tpu.dot_dimension_numbers<[1], [0], [0], [1], [0, 0, 1, 1], [], []>} : vector<4x136xf32>, vector<136x32xf32>, vector<4x32xf32> -> vector<4x32xf32>
    %cst_53 = arith.constant dense<0.000000e+00> : vector<4xf32>
    %105 = vector.multi_reduction <add>, %102, %cst_53 [1] : vector<4x32xf32> to vector<4xf32>
    %106 = vector.shape_cast %105 : vector<4xf32> to vector<4x1xf32>
    %cst_54 = arith.constant 9.765625E-4 : f32
    %107 = vector.broadcast %cst_54 : f32 to vector<4x1xf32>
    %108 = arith.mulf %106, %107 : vector<4x1xf32>
    %cst_55 = arith.constant dense<0.000000e+00> : vector<4xf32>
    %109 = vector.multi_reduction <add>, %104, %cst_55 [1] : vector<4x32xf32> to vector<4xf32>
    %110 = vector.shape_cast %109 : vector<4xf32> to vector<4x1xf32>
    %cst_56 = arith.constant 9.765625E-4 : f32
    %111 = vector.broadcast %cst_56 : f32 to vector<4x1xf32>
    %112 = arith.mulf %110, %111 : vector<4x1xf32>
    %113 = arith.mulf %108, %108 : vector<4x1xf32>
    %114 = arith.subf %112, %113 : vector<4x1xf32>
    %cst_57 = arith.constant 9.99999993E-9 : f32
    %115 = vector.broadcast %cst_57 : f32 to vector<4x1xf32>
    %116 = arith.addf %114, %115 : vector<4x1xf32>
    %117 = math.rsqrt %116 : vector<4x1xf32>
    %cst_58 = arith.constant dense<0.000000e+00> : vector<136x1xf32>
    %118 = tpu.matmul %0, %108, %cst_58 {dimension_numbers = #tpu.dot_dimension_numbers<[1], [0], [0], [1], [0, 0, 1, 1], [], []>} : vector<136x4xf32>, vector<4x1xf32>, vector<136x1xf32> -> vector<136x1xf32>
    %cst_59 = arith.constant dense<0.000000e+00> : vector<136x1xf32>
    %119 = tpu.matmul %0, %117, %cst_59 {dimension_numbers = #tpu.dot_dimension_numbers<[1], [0], [0], [1], [0, 0, 1, 1], [], []>} : vector<136x4xf32>, vector<4x1xf32>, vector<136x1xf32> -> vector<136x1xf32>
    %120 = vector.broadcast %118 : vector<136x1xf32> to vector<136x32xf32>
    %121 = arith.subf %97, %120 : vector<136x32xf32>
    %122 = vector.broadcast %119 : vector<136x1xf32> to vector<136x32xf32>
    %123 = arith.mulf %121, %122 : vector<136x32xf32>
    %124 = vector.broadcast %99 : vector<1x32xf32> to vector<136x32xf32>
    %125 = arith.mulf %124, %123 : vector<136x32xf32>
    %126 = vector.broadcast %101 : vector<1x32xf32> to vector<136x32xf32>
    %127 = arith.addf %125, %126 : vector<136x32xf32>
    %c0_60 = arith.constant 0 : index
    %c0_61 = arith.constant 0 : index
    %c0_62 = arith.constant 0 : index
    %128 = vector.load %arg21[%c0_60, %c0_61, %c0_62] : memref<1x32x16xf32, #tpu.memory_space<vmem>>, vector<1x32x16xf32>
    %129 = vector.shape_cast %128 : vector<1x32x16xf32> to vector<32x16xf32>
    %cst_63 = arith.constant dense<0.000000e+00> : vector<136x16xf32>
    %130 = tpu.matmul %127, %129, %cst_63 {dimension_numbers = #tpu.dot_dimension_numbers<[1], [0], [0], [1], [0, 0, 1, 1], [], []>} : vector<136x32xf32>, vector<32x16xf32>, vector<136x16xf32> -> vector<136x16xf32>
    %c0_64 = arith.constant 0 : index
    %c0_65 = arith.constant 0 : index
    %c0_66 = arith.constant 0 : index
    %131 = vector.load %arg22[%c0_64, %c0_65, %c0_66] : memref<1x1x16xf32, #tpu.memory_space<vmem>>, vector<1x1x16xf32>
    %132 = vector.shape_cast %131 : vector<1x1x16xf32> to vector<1x16xf32>
    %133 = vector.broadcast %132 : vector<1x16xf32> to vector<136x16xf32>
    %134 = arith.addf %130, %133 : vector<136x16xf32>
    %135 = arith.addf %6, %134 : vector<136x16xf32>
    %c0_67 = arith.constant 0 : index
    %c0_68 = arith.constant 0 : index
    %136 = vector.load %arg24[%c0_67, %c0_68] : memref<136x16xf32, #tpu.memory_space<vmem>>, vector<136x16xf32>
    tpu.vector_store %arg24[%c0_67, %c0_68], %135 {strides = array<i32>} : memref<136x16xf32, #tpu.memory_space<vmem>>, vector<136x16xf32>,
    %c1_i32_69 = arith.constant 1 : i32
    %137 = arith.cmpi eq, %arg1, %c1_i32_69 : i32
    %138 = arith.extui %137 : i1 to i32
    %c0_i32_70 = arith.constant 0 : i32
    %139 = arith.cmpi ne, %138, %c0_i32_70 : i32
    scf.if %139 {
      %c0_71 = arith.constant 0 : index
      %c0_72 = arith.constant 0 : index
      %140 = vector.load %arg24[%c0_71, %c0_72] : memref<136x16xf32, #tpu.memory_space<vmem>>, vector<136x16xf32>
      %cst_73 = arith.constant dense<0.000000e+00> : vector<4x16xf32>
      %141 = tpu.matmul %1, %140, %cst_73 {dimension_numbers = #tpu.dot_dimension_numbers<[1], [0], [0], [1], [0, 0, 1, 1], [], []>} : vector<4x136xf32>, vector<136x16xf32>, vector<4x16xf32> -> vector<4x16xf32>
      %cst_74 = arith.constant 3.125000e-02 : f32
      %142 = vector.broadcast %cst_74 : f32 to vector<4x16xf32>
      %143 = arith.mulf %141, %142 : vector<4x16xf32>
      %c0_75 = arith.constant 0 : index
      %c0_76 = arith.constant 0 : index
      %c0_77 = arith.constant 0 : index
      %144 = vector.load %arg23[%c0_75, %c0_76, %c0_77] : memref<1x4x16xf32, #tpu.memory_space<vmem>>, vector<1x4x16xf32>
      %145 = vector.shape_cast %144 : vector<1x4x16xf32> to vector<4x16xf32>
      %146 = vector.shape_cast %143 : vector<4x16xf32> to vector<1x4x16xf32>
      tpu.vector_store %arg23[%c0_75, %c0_76, %c0_77], %146 {strides = array<i32>} : memref<1x4x16xf32, #tpu.memory_space<vmem>>, vector<1x4x16xf32>,
    } else {
    }
    return
  }
  func.func @transform_0(%arg0: i32, %arg1: i32) -> i32 {
    %c0_i32 = arith.constant 0 : i32
    %c0_i32_0 = arith.constant 0 : i32
    return %c0_i32 : i32
  }
  func.func @transform_1(%arg0: i32, %arg1: i32) -> i32 {
    %c0_i32 = arith.constant 0 : i32
    %c0_i32_0 = arith.constant 0 : i32
    return %c0_i32 : i32
  }
  func.func @transform_2(%arg0: i32, %arg1: i32) -> i32 {
    %c0_i32 = arith.constant 0 : i32
    %c0_i32_0 = arith.constant 0 : i32
    return %c0_i32 : i32
  }
  func.func @transform_3(%arg0: i32, %arg1: i32) -> (i32, i32, i32) {
    %c0_i32 = arith.constant 0 : i32
    %c0_i32_0 = arith.constant 0 : i32
    %c0_i32_1 = arith.constant 0 : i32
    return %arg0, %c0_i32, %c0_i32_0 : i32, i32, i32
  }
  func.func @transform_4(%arg0: i32, %arg1: i32) -> (i32, i32) {
    %c0_i32 = arith.constant 0 : i32
    %c0_i32_0 = arith.constant 0 : i32
    %c0_i32_1 = arith.constant 0 : i32
    return %c0_i32, %c0_i32_0 : i32, i32
  }
  func.func @transform_5(%arg0: i32, %arg1: i32) -> (i32, i32) {
    %c0_i32 = arith.constant 0 : i32
    %c0_i32_0 = arith.constant 0 : i32
    %c0_i32_1 = arith.constant 0 : i32
    return %c0_i32, %c0_i32_0 : i32, i32
  }
  func.func @transform_6(%arg0: i32, %arg1: i32) -> (i32, i32) {
    %c0_i32 = arith.constant 0 : i32
    %c0_i32_0 = arith.constant 0 : i32
    %c0_i32_1 = arith.constant 0 : i32
    return %c0_i32, %c0_i32_0 : i32, i32
  }
  func.func @transform_7(%arg0: i32, %arg1: i32) -> (i32, i32) {
    %c0_i32 = arith.constant 0 : i32
    %c0_i32_0 = arith.constant 0 : i32
    %c0_i32_1 = arith.constant 0 : i32
    return %c0_i32, %c0_i32_0 : i32, i32
  }
  func.func @transform_8(%arg0: i32, %arg1: i32) -> (i32, i32) {
    %c0_i32 = arith.constant 0 : i32
    %c0_i32_0 = arith.constant 0 : i32
    %c0_i32_1 = arith.constant 0 : i32
    return %c0_i32, %c0_i32_0 : i32, i32
  }
  func.func @transform_9(%arg0: i32, %arg1: i32) -> (i32, i32) {
    %c0_i32 = arith.constant 0 : i32
    %c0_i32_0 = arith.constant 0 : i32
    %c0_i32_1 = arith.constant 0 : i32
    return %c0_i32, %c0_i32_0 : i32, i32
  }
  func.func @transform_10(%arg0: i32, %arg1: i32) -> (i32, i32) {
    %c0_i32 = arith.constant 0 : i32
    %c0_i32_0 = arith.constant 0 : i32
    %c0_i32_1 = arith.constant 0 : i32
    return %c0_i32, %c0_i32_0 : i32, i32
  }
  func.func @transform_11(%arg0: i32, %arg1: i32) -> (i32, i32, i32) {
    %c0_i32 = arith.constant 0 : i32
    %c0_i32_0 = arith.constant 0 : i32
    %c0_i32_1 = arith.constant 0 : i32
    return %arg1, %c0_i32, %c0_i32_0 : i32, i32, i32
  }
  func.func @transform_12(%arg0: i32, %arg1: i32) -> (i32, i32, i32) {
    %c0_i32 = arith.constant 0 : i32
    %c0_i32_0 = arith.constant 0 : i32
    %c0_i32_1 = arith.constant 0 : i32
    return %arg1, %c0_i32, %c0_i32_0 : i32, i32, i32
  }
  func.func @transform_13(%arg0: i32, %arg1: i32) -> (i32, i32, i32) {
    %c0_i32 = arith.constant 0 : i32
    %c0_i32_0 = arith.constant 0 : i32
    %c0_i32_1 = arith.constant 0 : i32
    return %arg1, %c0_i32, %c0_i32_0 : i32, i32, i32
  }
  func.func @transform_14(%arg0: i32, %arg1: i32) -> (i32, i32, i32) {
    %c0_i32 = arith.constant 0 : i32
    %c0_i32_0 = arith.constant 0 : i32
    %c0_i32_1 = arith.constant 0 : i32
    return %arg1, %c0_i32, %c0_i32_0 : i32, i32, i32
  }
  func.func @transform_15(%arg0: i32, %arg1: i32) -> (i32, i32, i32) {
    %c0_i32 = arith.constant 0 : i32
    %c0_i32_0 = arith.constant 0 : i32
    %c0_i32_1 = arith.constant 0 : i32
    return %arg1, %c0_i32, %c0_i32_0 : i32, i32, i32
  }
  func.func @transform_16(%arg0: i32, %arg1: i32) -> (i32, i32, i32) {
    %c0_i32 = arith.constant 0 : i32
    %c0_i32_0 = arith.constant 0 : i32
    %c0_i32_1 = arith.constant 0 : i32
    return %arg1, %c0_i32, %c0_i32_0 : i32, i32, i32
  }
  func.func @transform_17(%arg0: i32, %arg1: i32) -> (i32, i32, i32) {
    %c0_i32 = arith.constant 0 : i32
    %c0_i32_0 = arith.constant 0 : i32
    %c0_i32_1 = arith.constant 0 : i32
    return %arg1, %c0_i32, %c0_i32_0 : i32, i32, i32
  }
  func.func @transform_18(%arg0: i32, %arg1: i32) -> (i32, i32, i32) {
    %c0_i32 = arith.constant 0 : i32
    %c0_i32_0 = arith.constant 0 : i32
    %c0_i32_1 = arith.constant 0 : i32
    return %arg1, %c0_i32, %c0_i32_0 : i32, i32, i32
  }
  func.func @transform_19(%arg0: i32, %arg1: i32) -> (i32, i32, i32) {
    %c0_i32 = arith.constant 0 : i32
    %c0_i32_0 = arith.constant 0 : i32
    %c0_i32_1 = arith.constant 0 : i32
    return %arg1, %c0_i32, %c0_i32_0 : i32, i32, i32
  }
  func.func @transform_20(%arg0: i32, %arg1: i32) -> (i32, i32, i32) {
    %c0_i32 = arith.constant 0 : i32
    %c0_i32_0 = arith.constant 0 : i32
    %c0_i32_1 = arith.constant 0 : i32
    return %arg1, %c0_i32, %c0_i32_0 : i32, i32, i32
  }
  func.func @transform_21(%arg0: i32, %arg1: i32) -> (i32, i32, i32) {
    %c0_i32 = arith.constant 0 : i32
    %c0_i32_0 = arith.constant 0 : i32
    %c0_i32_1 = arith.constant 0 : i32
    return %arg0, %c0_i32, %c0_i32_0 : i32, i32, i32
  }
}

</mosaic_0001>

<bundles_post_ra>
// kernel: tpu_custom_call.1
= control target key start
LH: loop header
LB: loop body
LE: loop exit
PB: predicated region body
PF: predicated region fallthrough
CT: control target
= control target key end

     0   :  { %s7922_s0 = inlined_call_operand.vmem [shape: s32[6], index: 0, kind: input, shape index: {}]   ;;  %s7923_s1 = inlined_call_operand.vmem [shape: f32[2], index: 1, kind: input, shape index: {}]   ;;  %s7924_s2 = inlined_call_operand.vmem [shape: f32[2], index: 2, kind: input, shape index: {}]   ;;  %s7925_s3 = inlined_call_operand.vmem [shape: f32[2,136,8], index: 3, kind: input, shape index: {}]   ;;  %s7926_s4 = inlined_call_operand.vmem [shape: f32[136,4], index: 4, kind: input, shape index: {}]   ;;  %s7927_s5 = inlined_call_operand.vmem [shape: f32[4,136], index: 5, kind: input, shape index: {}]   ;;  %s7928_s6 = inlined_call_operand.vmem [shape: f32[136,1], index: 6, kind: input, shape index: {}]   ;;  %s7929_s7 = inlined_call_operand.vmem [shape: f32[1,8], index: 7, kind: input, shape index: {}]   ;;  %s7930_s8 = inlined_call_operand.vmem [shape: f32[1,8], index: 8, kind: input, shape index: {}]   ;;  %s7931_s9 = inlined_call_operand.vmem [shape: f32[8,16], index: 9, kind: input, shape index: {}]   ;;  %s7932_s10 = inlined_call_operand.vmem [shape: f32[1,16], index: 10, kind: input, shape index: {}]   ;;  %s7933_s11 = inlined_call_operand.vmem [shape: f32[2,16,32], index: 11, kind: input, shape index: {}]   ;;  %s7934_s12 = inlined_call_operand.vmem [shape: f32[2,1,32], index: 12, kind: input, shape index: {}]   ;;  %s7935_s13 = inlined_call_operand.vmem [shape: f32[2,1,32], index: 13, kind: input, shape index: {}]   ;;  %s7936_s14 = inlined_call_operand.vmem [shape: f32[2,1,32], index: 14, kind: input, shape index: {}]   ;;  %s7937_s15 = inlined_call_operand.vmem [shape: f32[2,3,32], index: 15, kind: input, shape index: {}]   ;;  %s7938_s16 = inlined_call_operand.vmem [shape: f32[2,1,32], index: 16, kind: input, shape index: {}]   ;;  %s7939_s17 = inlined_call_operand.vmem [shape: f32[2,1,32], index: 17, kind: input, shape index: {}]   ;;  %s7940_s18 = inlined_call_operand.vmem [shape: f32[2,1,32], index: 18, kind: input, shape index: {}]   ;;  %s7941_s19 = inlined_call_operand.vmem [shape: f32[2,32,16], index: 19, kind: input, shape index: {}]   ;;  %s7942_s20 = inlined_call_operand.vmem [shape: f32[2,1,16], index: 20, kind: input, shape index: {}]   ;;  %s7943_s21 = inlined_call_operand.hbm [shape: f32[2,4,16], index: 21, kind: output, shape index: {}]  }
   0x1   :  { %7995 = sst [smem:[#allocation42_spill]] %s7922_s0 }
   0x2   :  { %7996 = sst [smem:[#allocation43_spill]] %s7923_s1 }
   0x3   :  { %7997 = sst [smem:[#allocation44_spill]] %s7924_s2 }
   0x4   :  { %7998 = sst [smem:[#allocation45_spill]] %s7925_s3 }
   0x5   :  { %7999 = sst [smem:[#allocation46_spill]] %s7926_s4 }
   0x6   :  { %8000 = sst [smem:[#allocation47_spill]] %s7927_s5 }
   0x7   :  { %8001 = sst [smem:[#allocation48_spill]] %s7930_s8 }
   0x8   :  { %8002 = sst [smem:[#allocation49_spill]] %s7932_s10 }
   0x9   :  { %8003 = sst [smem:[#allocation50_spill]] %s7933_s11 }
   0xa   :  { %8004 = sst [smem:[#allocation51_spill]] %s7937_s15 }
   0xb   :  { %8005 = sst [smem:[#allocation52_spill]] %s7943_s21 }
   0xc   :  { %26 = vsyncpa [#allocation6], 0 }
   0xd   :  { %27 = vsyncpa [#allocation8], 0 }
   0xe   :  { %28 = vsyncpa [#allocation5], 0 }
   0xf   :  { %30 = vsyncpa [#allocation5 + $0x1], 0  ;;  %s5918_s2 = smov 0   ;;  %s5920_s25 = smov 0  }
  0x10   :  { %s5922_s26 = smov 0   ;;  %s5924_s27 = smov 0  }
  0x11   :  { %s5926_s3 = smov 0   ;;  %s5928_s28 = smov 0  }
  0x12   :  { %s5930_s29 = smov 0   ;;  %s5932_s0 = smov 0  }
  0x13 LB: > { %8006 = sst [smem:[#allocation14_spill]] %s5767_s2  ;;  %s4656_s4 = sadd.s32 4294967295, %s5795_s0   ;;  %s5795_s0 = sphi %s5932_s0, %s36_s0   ;;  %s5791_s29 = sphi %s5930_s29, %s8094_s29   ;;  %s5787_s28 = sphi %s5928_s28, %s8093_s28   ;;  %s5783_s3 = sphi %s5926_s3, %s8092_s3   ;;  %s5779_s27 = sphi %s5924_s27, %s8091_s27   ;;  %s5775_s26 = sphi %s5922_s26, %s8090_s26   ;;  %s5771_s25 = sphi %s5920_s25, %s8089_s25   ;;  %s5767_s2 = sphi %s5918_s2, %s8088_s2  }
  0x14   : > { %8007 = sst [smem:[#allocation15_spill]] %s5771_s25  ;;  %s4657_s30 = sadd.s32 4294967294, %s5795_s0  }
  0x15   : > { %8008 = sst [smem:[#allocation16_spill]] %s5775_s26  ;;  %s45_s5 = sadd.s32 1, %s5787_s28 }
  0x16   : > { %8009 = sst [smem:[#allocation17_spill]] %s5787_s28  ;;  %s48_s22 = sadd.s32 1, %s5791_s29 }
  0x17   : > { %8010 = sst [smem:[#allocation18_spill]] %s5791_s29  ;;  %p46_p0 = scmp.ge.s32.totalorder %s45_s5, 2 }
  0x18   : > { %8011 = sst [smem:[#allocation19_spill]] %s5795_s0  ;;  %s551_s23 = sadd.s32 1, %s5775_s26 }
  0x19   : > { %p561_p1 = scmp.ne.s32.totalorder %s5775_s26, %s5771_s25  ;;  %p562_p2 = scmp.eq.s32.totalorder %s4656_s4, 3 }
  0x1a   : > { %s8096_s5 = smov (%p46_p0, %s45_s5), 0  ;;  %s8098_s22 = smov (!%p46_p0, %s48_s22), %s5791_s29 }
  0x1b   : > { %8012 = sst [smem:[#allocation20_spill]] %s8096_s5  ;;  %p5968_p3 = por %p562_p2, %p561_p1 }
  0x1c   : > { %p567_p4 = scmp.ne.s32.totalorder %s5771_s25, %s5767_s2  ;;  %p50_p5 = scmp.ge.s32.totalorder %s8098_s22, 2 }
  0x1d   : > { %s8013_s1 = scalar_select %p5968_p3, 1, 0 }
  0x1e   : > { %p568_p6 = scmp.eq.s32.totalorder %s4657_s30, 3  ;;  %p4658_p7 = scmp.ge.s32.totalorder %s5795_s0, 1 }
  0x1f   : > { %8014 = sst [smem:[#allocation21_spill]] %s8013_s1  ;;  %p575_p8 = scmp.lt.s32.totalorder %s5795_s0, 5 }
  0x20   : > { %s8100_s22 = smov (%p50_p5, %s8098_s22), 0  ;;  %p5978_p9 = por %p568_p6, %p567_p4 }
  0x21   : > { %8015 = sst [smem:[#allocation22_spill]] %s8100_s22  ;;  %p5982_p10 = pnand %p4658_p7, %p575_p8 }
  0x22   : > { %s8016_s24 = scalar_select %p5978_p9, 1, 0 }
  0x23   : > { %s8018_s5 = scalar_select %p5982_p10, 1, 0 }
  0x24   : > { %8017 = sst [smem:[#allocation23_spill]] %s8016_s24  ;;  %s548_s28 = ssub.s32 %s5791_s29, %s8100_s22 }
  0x25   : > { %p549_p11 = scmp.eq.s32.totalorder %s548_s28, 0  ;;  %p5528_p12 = pneg %p5982_p10 }
  0x26   : > { %p5990_p13 = scmp.eq.s32.totalorder %s4656_s4, 0  ;;  %s8020_s21 = sld [smem:[#allocation43_spill]] }
  0x27   : > { %s5998_s10 = scalar_select %p549_p11, %s5775_s26, %s551_s23  }
  0x28   : > { %s8019_s30 = scalar_select %p5990_p13, 1, 0 }
  0x29   : > { %8021 = sst [smem:[#allocation24_spill]] %s5998_s10  ;;  %p6002_p0 = pnand %p5990_p13, %p5528_p12 }
  0x2b   : > { %p5652_p2 = pneg %p6002_p0 }
  0x2c   : > { %s599_s1 = sshll.u32 %s8020_s21, 4  ;;  %s600_s1 = int_to_ptr.vmem [resolvable:$true] %s599_s1 }
  0x2d   : > { %s5650_s28 = scalar_lea.vmem %s600_s1, 16  ;;  %p5658_p6 = scmp.lt.s32.totalorder %s600_s1, %s600_s1 }
  0x2e   : > { %p5651_p1 = scmp.ne.s32.totalorder %s600_s1, %s5650_s28  ;;  %p5659_p7 = scmp.lt.s32.totalorder %s5650_s28, %s5650_s28 }
  0x30   : > { %p5653_p4 = pnand %p5652_p2, %p5651_p1  ;;  %p5660_p8 = por %p5659_p7, %p5658_p6 }
  0x32   : > { %p5654_p5 = pneg %p5653_p4 }
  0x34   : > { %p5661_p11 = pnand %p5660_p8, %p5654_p5 }
  0x36   : > { %5664 = shalt.err (!%p5661_p11)
}
  0x37   : > { %s5797_s21 = smov [#allocation7]   ;;  %s8023_s4 = sld [smem:[#allocation42_spill]] }
  0x38   : > { %5534 = dma.vmem_to_smem (!%p6002_p0), %s600_s1, 16, %s5797_s21, [#allocation8]  }
  0x39   : > { %s8024_s10 = sld [smem:[#allocation44_spill]] }
  0x3d   : > { %s588_s23 = sshll.u32 %s8023_s4, 4  ;;  %s589_s23 = int_to_ptr.vmem [resolvable:$true] %s588_s23 }
  0x3e   : > { %s5665_s8 = scalar_lea.vmem %s589_s23, 16  ;;  %p5673_p5 = scmp.lt.s32.totalorder %s589_s23, %s589_s23 }
  0x3f   : > { %s610_s26 = sshll.u32 %s8024_s10, 4  ;;  %p5666_p12 = scmp.ne.s32.totalorder %s589_s23, %s5665_s8  ;;  %s611_s26 = int_to_ptr.vmem [resolvable:$true] %s610_s26 }
  0x40   : > { %p5674_p6 = scmp.lt.s32.totalorder %s5665_s8, %s5665_s8 }
  0x41   : > { %p5668_p1 = pnand %p5666_p12, %p5652_p2 }
  0x42   : > { %p5675_p7 = por %p5674_p6, %p5673_p5 }
  0x43   : > { %p5669_p4 = pneg %p5668_p1 }
  0x45   : > { %p5676_p8 = pnand %p5675_p7, %p5669_p4 }
  0x47   : > { %5679 = shalt.err (!%p5676_p8)
}
  0x48   : > { %s5798_s1 = smov [#allocation4]   ;;  %s5680_s28 = scalar_lea.vmem %s611_s26, 16 }
  0x49   : > { %5531 = dma.vmem_to_smem (!%p6002_p0), %s589_s23, 16, %s5798_s1, [#allocation6]  }
  0x4a   : > { %p5681_p11 = scmp.ne.s32.totalorder %s611_s26, %s5680_s28  ;;  %p5688_p13 = scmp.lt.s32.totalorder %s611_s26, %s611_s26 }
  0x4b   : > { %p5689_p12 = scmp.lt.s32.totalorder %s5680_s28, %s5680_s28 }
  0x4c   : > { %p5683_p9 = pnand %p5681_p11, %p5652_p2 }
  0x4d   : > { %p5690_p1 = por %p5689_p12, %p5688_p13 }
  0x4e   : > { %p5684_p3 = pneg %p5683_p9 }
  0x50   : > { %p5691_p10 = pnand %p5690_p1, %p5684_p3 }
  0x52   : > { %5694 = shalt.err (!%p5691_p10)
}
  0x53   : > { %s5799_s8 = smov [#allocation9]   ;;  %p8025_p4 = scmp.ne.s32.totalorder %s8018_s5, 0 }
  0x54   : > { %5537 = dma.vmem_to_smem (!%p6002_p0), %s611_s26, 16, %s5799_s8, [#allocation8]  }
  0x55   : > { %717 = sbr.rel (%p8025_p4) target bundleno = 3438 (0xd6e), region = 104 }
  0x5a   : > { %p8026_p5 = scmp.ne.s32.totalorder %s8019_s30, 0 }
  0x5c   : > { %5754 = dma.done.wait (%p8026_p5), [#allocation6], 16  }
  0x5d   : > { %5756 = vsyncadd (%p8026_p5), [#allocation6], 4294967280 }
  0x5e   : > { %5758 = dma.done.wait (%p8026_p5), [#allocation8], 32  }
  0x5f   : > { %5760 = vsyncadd (%p8026_p5), [#allocation8], 4294967264 }
  0x60   : > { %731 = sfence }
  0x61   : > { %s7960_s10 = sand.u32 1, %s5771_s25   ;;  %p821_p3 = scmp.lt.s32.totalorder %s5783_s3, 1  ;;  %v6148_v18 = vld [vmem:[%s7928_s6] sm:$0xff]  ;;  %v6153_v19 = vld [vmem:[%s7928_s6 + $0x8] sm:$0xff]  ;;  %v6158_v20 = vld [vmem:[%s7928_s6 + $0x10] sm:$0xff] }
  0x62   : > { %s8027_s5 = sld [smem:[#allocation46_spill]]  ;;  %s6058_s2 = sshll.u32 %s7960_s10, 2  ;;  %v6173_v21 = vld [vmem:[%s7928_s6 + $0x18] sm:$0xff]  ;;  %v6178_v22 = vld [vmem:[%s7928_s6 + $0x20] sm:$0xff]  ;;  %v6183_v23 = vld [vmem:[%s7928_s6 + $0x28] sm:$0xff] }
  0x63   : > { %p826_p9 = scmp.lt.s32.totalorder %s5779_s27, 1  ;;  %s8040_s21 = sld [smem:[#allocation47_spill]]  ;;  %v6196_v24 = vld [vmem:[%s7928_s6 + $0x30] sm:$0xff]  ;;  %v6201_v25 = vld [vmem:[%s7928_s6 + $0x38] sm:$0xff]  ;;  %v6206_v26 = vld [vmem:[%s7928_s6 + $0x40] sm:$0xff] }
  0x64   : > { %s822_s0 = scalar_select %p821_p3, %s5783_s3, 1  ;;  %v6216_v27 = vld [vmem:[%s7928_s6 + $0x48] sm:$0xff]  ;;  %v6221_v28 = vld [vmem:[%s7928_s6 + $0x50] sm:$0xff]  ;;  %v6226_v29 = vld [vmem:[%s7928_s6 + $0x58] sm:$0xff] }
  0x65   : > { %s6108_s29 = scalar_select %p826_p9, %s5779_s27, 1  ;;  %v6240_v30 = vld [vmem:[%s7928_s6 + $0x60] sm:$0xff]  ;;  %v6245_v31 = vld [vmem:[%s7928_s6 + $0x68] sm:$0xff]  ;;  %v6250_v32 = vld [vmem:[%s7928_s6 + $0x70] sm:$0xff] }
  0x66   : > { %s5513_s1 = smul.u32 136, %s822_s0  ;;  %s8041_s10 = sld [smem:[#allocation45_spill]]  ;;  %8044 = vst [vmem:[#allocation37_spill] sm:$0xff] %v6245_v31  ;;  %8045 = vst [vmem:[#allocation38_spill] sm:$0xff] %v6250_v32  ;;  %v6260_v33 = vld [vmem:[%s7928_s6 + $0x78] sm:$0xff]  ;;  %v6265_v34 = vld [vmem:[%s7928_s6 + $0x80] sm:$0xff] }
  0x67   : > { %s4856_s4 = sshll.u32 %s6108_s29, 4  ;;  %s8042_s11 = sld [smem:[#allocation50_spill]]  ;;  %8046 = vst [vmem:[#allocation39_spill] sm:$0xff] %v6260_v33  ;;  %8047 = vst [vmem:[#allocation40_spill] sm:$0xff] %v6265_v34 }
  0x68   : > { %v6044_v0 = vld [vmem:[%s8027_s5] sm:$0xff]  ;;  %v6049_v1 = vld [vmem:[%s8027_s5 + $0x8] sm:$0xff]  ;;  %v6054_v2 = vld [vmem:[%s8027_s5 + $0x10] sm:$0xff]  ;;  %s8043_s15 = sld [smem:[#allocation51_spill]]  ;;  %p4674_p10 = scmp.ne.s32.totalorder %s5779_s27, 0 }
  0x69   : > { %v6064_v3 = vld [vmem:[%s8027_s5 + $0x18] sm:$0xff]  ;;  %v6069_v4 = vld [vmem:[%s8027_s5 + $0x20] sm:$0xff]  ;;  %v6074_v5 = vld [vmem:[%s8027_s5 + $0x28] sm:$0xff]  ;;  %s8048_s26 = sld [smem:[#allocation48_spill]] (!%p4674_p10) }
  0x6a   : > { %8028 = vst [vmem:[#allocation25_spill] sm:$0xff] %v6074_v5  ;;  %v6079_v6 = vld [vmem:[%s8027_s5 + $0x30] sm:$0xff]  ;;  %v6084_v7 = vld [vmem:[%s8027_s5 + $0x38] sm:$0xff]  ;;  %v6089_v8 = vld [vmem:[%s8027_s5 + $0x40] sm:$0xff] }
  0x6b   : > { %8029 = vst [vmem:[#allocation26_spill] sm:$0xff] %v6079_v6  ;;  %8030 = vst [vmem:[#allocation27_spill] sm:$0xff] %v6084_v7  ;;  %v6095_v9 = vld [vmem:[%s8027_s5 + $0x48] sm:$0xff]  ;;  %v6100_v10 = vld [vmem:[%s8027_s5 + $0x50] sm:$0xff] }
  0x6c   : > { %8031 = vst [vmem:[#allocation28_spill] sm:$0xff] %v6089_v8  ;;  %8032 = vst [vmem:[#allocation29_spill] sm:$0xff] %v6095_v9  ;;  %v6105_v11 = vld [vmem:[%s8027_s5 + $0x58] sm:$0xff]  ;;  %v6113_v12 = vld [vmem:[%s8027_s5 + $0x60] sm:$0xff]  ;;  %s6163_s23 = scalar_lea.vmem %s8041_s10, %s5513_s1  ;;  %s4671_s1 = sshll.u32 %s6108_s29, 2 }
  0x6d   : > { %8033 = vst [vmem:[#allocation30_spill] sm:$0xff] %v6100_v10  ;;  %8034 = vst [vmem:[#allocation31_spill] sm:$0xff] %v6105_v11  ;;  %v6118_v13 = vld [vmem:[%s8027_s5 + $0x68] sm:$0xff]  ;;  %v6123_v14 = vld [vmem:[%s8027_s5 + $0x70] sm:$0xff]  ;;  %s6168_s28 = scalar_lea.vmem %s8042_s11, %s4856_s4  ;;  %s860_s4 = scalar_lea.vmem %s7942_s20, %s6108_s29 }
  0x6e   : > { %8035 = vst [vmem:[#allocation32_spill] sm:$0xff] %v6113_v12  ;;  %8036 = vst [vmem:[#allocation33_spill] sm:$0xff] %v6118_v13  ;;  %v6128_v15 = vld [vmem:[%s8027_s5 + $0x78] sm:$0xff]  ;;  %v6133_v16 = vld [vmem:[%s8027_s5 + $0x80] sm:$0xff]  ;;  %s6231_s25 = scalar_lea.vmem %s8043_s15, %s4671_s1  ;;  %s852_s1 = scalar_lea.vmem %s7940_s18, %s6108_s29 }
  0x6f   : > { %8037 = vst [vmem:[#allocation34_spill] sm:$0xff] %v6123_v14  ;;  %8038 = vst [vmem:[#allocation35_spill] sm:$0xff] %v6128_v15  ;;  %v6138_v17 = vld [vmem:[%s8040_s21] sm:$0xff]  ;;  %s4857_s21 = sshll.u32 %s6108_s29, 5  ;;  %s820_s10 = scalar_lea.vmem [#allocation10], %s6058_s2 }
  0x70   : > { %8039 = vst [vmem:[#allocation36_spill] sm:$0xff] %v6133_v16  ;;  %s6270_s30 = scalar_lea.vmem %s7941_s19, %s4857_s21  ;;  %899 = sbr.rel (%p4674_p10) target bundleno = 1122 (0x462), region = 120 }
  0x71   : > { %s8050_s5 = sld [smem:[#allocation49_spill]] (!%p4674_p10) }
  0x75   : > { %vm900_vm0 = vcmask 261120   ;;  %v6279_v35 = vld [vmem:[%s6163_s23 + $0x78] sm:$0xff]  ;;  %v6283_v36 = vcombine.high %v6138_v17, %v6138_v17  ;;  %vm924_vm1 = vcmask 64512   ;;  %v7963_v37 = vmov 0.0   ;;  %v6289_v38 = vld [vmem:[%s6163_s23 + $0x70] sm:$0xff]  ;;  %v6297_v39 = vld [vmem:[%s6163_s23 + $0x68] sm:$0xff] }
  0x76   : > { %901 = vst.msk [vmem:[#allocation3] sm:$0xff] %vm900_vm0, %v7963_v37  ;;  %902 = vst.msk [vmem:[#allocation3 + $0x90] sm:$0xff] %vm900_vm0, %v7963_v37  ;;  %927 = vmatprep.subr.mxu1 %v7963_v37  ;;  %5024 = vmatprep.subr.mxu0 %v7963_v37  ;;  %v6302_v40 = vld [vmem:[%s6163_s23 + $0x60] sm:$0xff]  ;;  %v6307_v41 = vld [vmem:[%s6163_s23 + $0x58] sm:$0xff]  ;;  %v1012_v54 = vmul.f32 %v6279_v35, %v6279_v35  ;;  %v1011_v55 = vmul.f32 %v6289_v38, %v6289_v38  ;;  %vm1084_vm2 = vcmask 60416   ;;  %vm5801_vm3 = vmmov 0  }
  0x77   : > { %928 = vmatpush1.msra.mxu1 %v6279_v35  ;;  %4675 = vmatprep.mubr.msk.f32.mxu1 %vm924_vm1, %v6283_v36  ;;  %v6312_v42 = vld [vmem:[%s6163_s23 + $0x50] sm:$0xff]  ;;  %v6317_v43 = vld [vmem:[%s6163_s23 + $0x48] sm:$0xff]  ;;  %v6322_v44 = vld [vmem:[%s6163_s23 + $0x40] sm:$0xff]  ;;  %v1010_v56 = vmul.f32 %v6297_v39, %v6297_v39  ;;  %v1009_v57 = vmul.f32 %v6302_v40, %v6302_v40  ;;  %v1008_v58 = vmul.f32 %v6307_v41, %v6307_v41  ;;  %vm1149_vm4 = vcmask 1043456  }
  0x78   : > { %929 = vmatprep.subr.mxu1 %v7963_v37  ;;  %v6327_v45 = vld [vmem:[%s6163_s23 + $0x38] sm:$0xff]  ;;  %v6332_v46 = vld [vmem:[%s6163_s23 + $0x30] sm:$0xff]  ;;  %v6337_v47 = vld [vmem:[%s6163_s23 + $0x28] sm:$0xff]  ;;  %v1007_v59 = vmul.f32 %v6312_v42, %v6312_v42  ;;  %v1006_v60 = vmul.f32 %v6317_v43, %v6317_v43  ;;  %v1005_v61 = vmul.f32 %v6322_v44, %v6322_v44  ;;  %5026 = vmatprep.mubr.msk.f32.mxu0 %vm5801_vm3, %v7963_v37  ;;  %vm1097_vm5 = vcmask 31744  }
  0x79   : > { %930 = vmatpush1.msra.mxu1 %v6289_v38  ;;  %v6342_v48 = vld [vmem:[%s6163_s23 + $0x20] sm:$0xff]  ;;  %v6347_v49 = vld [vmem:[%s6163_s23 + $0x18] sm:$0xff]  ;;  %v6352_v50 = vld [vmem:[%s6163_s23 + $0x10] sm:$0xff]  ;;  %v1004_v62 = vmul.f32 %v6327_v45, %v6327_v45  ;;  %v1003_v63 = vmul.f32 %v6332_v46, %v6332_v46  ;;  %vm1915_vm6 = vcmask 130048  }
  0x7a   : > { %931 = vmatprep.subr.mxu1 %v7963_v37  ;;  %v6357_v51 = vld [vmem:[%s6163_s23 + $0x8] sm:$0xff]  ;;  %v6362_v52 = vld [vmem:[%s6163_s23] sm:$0xff] }
  0x7b   : > { %932 = vmatpush1.msra.mxu1 %v6297_v39  ;;  %v6367_v53 = vld [vmem:[%s6163_s23 + $0x80] sm:$0xff] }
  0x7c   : > { %933 = vmatprep.subr.mxu1 %v7963_v37 }
  0x7d   : > { %934 = vmatpush1.msra.mxu1 %v6302_v40 }
  0x7e   : > { %935 = vmatprep.subr.mxu1 %v7963_v37 }
  0x7f   : > { %936 = vmatpush1.msra.mxu1 %v6307_v41 }
  0x80   : > { %937 = vmatprep.subr.mxu1 %v7963_v37 }
  0x81   : > { %938 = vmatpush1.msra.mxu1 %v6312_v42 }
  0x82   : > { %939 = vmatprep.subr.mxu1 %v7963_v37 }
  0x83   : > { %940 = vmatpush1.msra.mxu1 %v6317_v43 }
  0x84   : > { %941 = vmatprep.subr.mxu1 %v7963_v37 }
  0x85   : > { %942 = vmatpush1.msra.mxu1 %v6322_v44 }
  0x86   : > { %943 = vmatprep.subr.mxu1 %v7963_v37 }
  0x87   : > { %944 = vmatpush1.msra.mxu1 %v6327_v45 }
  0x88   : > { %945 = vmatprep.subr.mxu1 %v7963_v37 }
  0x89   : > { %946 = vmatpush1.msra.mxu1 %v6332_v46 }
  0x8a   : > { %947 = vmatprep.subr.mxu1 %v7963_v37 }
  0x8b   : > { %948 = vmatpush1.msra.mxu1 %v6337_v47 }
  0x8c   : > { %949 = vmatprep.subr.mxu1 %v7963_v37 }
  0x8d   : > { %950 = vmatpush1.msra.mxu1 %v6342_v48 }
  0x8e   : > { %951 = vmatprep.subr.mxu1 %v7963_v37 }
  0x8f   : > { %952 = vmatpush1.msra.mxu1 %v6347_v49 }
  0x90   : > { %953 = vmatprep.subr.mxu1 %v7963_v37 }
  0x91   : > { %954 = vmatpush1.msra.mxu1 %v6352_v50 }
  0x92   : > { %955 = vmatprep.subr.mxu1 %v7963_v37 }
  0x93   : > { %956 = vmatpush1.msra.mxu1 %v6357_v51 }
  0x94   : > { %957 = vmatprep.subr.mxu1 %v7963_v37 }
  0x95   : > { %958 = vmatpush1.msra.mxu1 %v6362_v52 }
  0x96   : > { %989 = vmatprep.subr.mxu1 %v7963_v37 }
  0x97   : > { %990 = vmatpush2.msra.mxu1 %v6367_v53 }
  0x98   : > { %992 = vmatmul.mubr.f32.vlgmr.msra.gmra.mxu1 %v6138_v17  ;;  %1014 = vmatprep.subr.mxu1 %v7963_v37 }
  0x99   : > { %1015 = vmatpush1.msra.mxu1 %v1012_v54  ;;  %4676 = vmatprep.mubr.msk.f32.mxu1 %vm924_vm1, %v6283_v36  ;;  %v1002_v36 = vmul.f32 %v6337_v47, %v6337_v47  ;;  %v1001_v54 = vmul.f32 %v6342_v48, %v6342_v48 }
  0x9a   : > { %1016 = vmatprep.subr.mxu1 %v7963_v37 }
  0x9b   : > { %1017 = vmatpush1.msra.mxu1 %v1011_v55  ;;  %v1000_v55 = vmul.f32 %v6347_v49, %v6347_v49 }
  0x9c   : > { %1018 = vmatprep.subr.mxu1 %v7963_v37 }
  0x9d   : > { %1019 = vmatpush1.msra.mxu1 %v1010_v56  ;;  %v999_v56 = vmul.f32 %v6352_v50, %v6352_v50 }
  0x9e   : > { %1020 = vmatprep.subr.mxu1 %v7963_v37 }
  0x9f   : > { %1021 = vmatpush1.msra.mxu1 %v1009_v57  ;;  %v998_v57 = vmul.f32 %v6357_v51, %v6357_v51 }
  0xa0   : > { %1022 = vmatprep.subr.mxu1 %v7963_v37 }
  0xa1   : > { %1023 = vmatpush1.msra.mxu1 %v1008_v58  ;;  %v997_v58 = vmul.f32 %v6362_v52, %v6362_v52 }
  0xa2   : > { %1024 = vmatprep.subr.mxu1 %v7963_v37 }
  0xa3   : > { %1025 = vmatpush1.msra.mxu1 %v1007_v59  ;;  %v1013_v59 = vmul.f32 %v6367_v53, %v6367_v53 }
  0xa4   : > { %1026 = vmatprep.subr.mxu1 %v7963_v37 }
  0xa5   : > { %1027 = vmatpush1.msra.mxu1 %v1006_v60 }
  0xa6   : > { %1028 = vmatprep.subr.mxu1 %v7963_v37 }
  0xa7   : > { %1029 = vmatpush1.msra.mxu1 %v1005_v61 }
  0xa8   : > { %1030 = vmatprep.subr.mxu1 %v7963_v37 }
  0xa9   : > { %1031 = vmatpush1.msra.mxu1 %v1004_v62 }
  0xaa   : > { %1032 = vmatprep.subr.mxu1 %v7963_v37 }
  0xab   : > { %1033 = vmatpush1.msra.mxu1 %v1003_v63 }
  0xac   : > { %1034 = vmatprep.subr.mxu1 %v7963_v37 }
  0xad   : > { %1035 = vmatpush1.msra.mxu1 %v1002_v36 }
  0xae   : > { %1036 = vmatprep.subr.mxu1 %v7963_v37 }
  0xaf   : > { %1037 = vmatpush1.msra.mxu1 %v1001_v54 }
  0xb0   : > { %1038 = vmatprep.subr.mxu1 %v7963_v37 }
  0xb1   : > { %1039 = vmatpush1.msra.mxu1 %v1000_v55 }
  0xb2   : > { %1040 = vmatprep.subr.mxu1 %v7963_v37 }
  0xb3   : > { %1041 = vmatpush1.msra.mxu1 %v999_v56 }
  0xb4   : > { %1042 = vmatprep.subr.mxu1 %v7963_v37 }
  0xb5   : > { %1043 = vmatpush1.msra.mxu1 %v998_v57 }
  0xb6   : > { %1044 = vmatprep.subr.mxu1 %v7963_v37 }
  0xb7   : > { %1045 = vmatpush1.msra.mxu1 %v997_v58 }
  0xb8   : > { %1076 = vmatprep.subr.mxu1 %v7963_v37 }
  0xb9   : > { %1077 = vmatpush2.msra.mxu1 %v1013_v59 }
  0xba   : > { %1079 = vmatmul.mubr.f32.vlgmr.msra.gmra.mxu1 %v6138_v17  ;;  %5077 = vmatprep.subr.mxu1 %v7963_v37 }
  0xbb   : > { %5079 = vmatprep.mubr.msk.f32.mxu1 %vm5801_vm3, %v7963_v37 }
 0x158   : > { %v993_v60 = vpop.f32.mrf.mxu1 }
 0x159   : > { %v1085_v61 = vsel %vm1084_vm2, %v993_v60, 0.0 }
 0x15a   : > { %1086 = vadd.xlane.f32.xlu0 %v1085_v61  ;;  %v995_v62 = vpop.f32.mrf.mxu1 }
 0x17a   : > { %v1080_v63 = vpop.f32.mrf.mxu1 }
 0x17b   : > { %v1089_v36 = vsel %vm1084_vm2, %v1080_v63, 0.0  ;;  %v5802_v63 = vmov 0  }
 0x17c   : > { %1090 = vadd.xlane.f32.xlu0 %v1089_v36  ;;  %v1082_v54 = vpop.f32.mrf.mxu1  ;;  %5623 = vset.pattern.permute.xlu1 %v5802_v63  ;;  %v1706_v36 = vld [vmem:[%s7931_s9] sm:$0xff] }
 0x17d   : > { %5624 = vset.pattern.permute.xlu0 %v5802_v63 }
 0x1e3   : > { %v1087_v55 = vpop.xlane.xlu0 %1086 }
 0x1e4   : > { %v1088_v56 = vmul.f32 0.00390625, %v1087_v55 }
 0x1e6   : > { %5025 = vmatpush3.msk.msra.mxu0 %vm1149_vm4, %v1088_v56  ;;  %v1093_v58 = vmul.f32 %v1088_v56, %v1088_v56 }
 0x1e7   : > { %5027 = vmatmul.mubr.msk.f32.vlgmr.msra.gmra.mxu0 %vm1097_vm5, %v6044_v0  ;;  %5130 = vmatprep.subr.mxu0 %v7963_v37 }
 0x1e8   : > { %5029 = vmatprep.mubr.msk.f32.mxu0 %vm5801_vm3, %v7963_v37  ;;  %5131 = vmatpush3.msra.mxu0 %v1706_v36 }
 0x1eb   : > { %5030 = vmatmul.mubr.msk.f32.gmra.mxu0 %vm1097_vm5, %v6049_v1 }
 0x1ec   : > { %5032 = vmatprep.mubr.msk.f32.mxu0 %vm5801_vm3, %v7963_v37 }
 0x1ef   : > { %5033 = vmatmul.mubr.msk.f32.gmra.mxu0 %vm1097_vm5, %v6054_v2 }
 0x1f0   : > { %5035 = vmatprep.mubr.msk.f32.mxu0 %vm5801_vm3, %v7963_v37 }
 0x1f3   : > { %5036 = vmatmul.mubr.msk.f32.gmra.mxu0 %vm1097_vm5, %v6064_v3 }
 0x1f4   : > { %5038 = vmatprep.mubr.msk.f32.mxu0 %vm5801_vm3, %v7963_v37 }
 0x1f7   : > { %5039 = vmatmul.mubr.msk.f32.gmra.mxu0 %vm1097_vm5, %v6069_v4 }
 0x1f8   : > { %5041 = vmatprep.mubr.msk.f32.mxu0 %vm5801_vm3, %v7963_v37 }
 0x1fb   : > { %5042 = vmatmul.mubr.msk.f32.gmra.mxu0 %vm1097_vm5, %v6074_v5 }
 0x1fc   : > { %5044 = vmatprep.mubr.msk.f32.mxu0 %vm5801_vm3, %v7963_v37 }
 0x1ff   : > { %5045 = vmatmul.mubr.msk.f32.gmra.mxu0 %vm1097_vm5, %v6079_v6 }
 0x200   : > { %5047 = vmatprep.mubr.msk.f32.mxu0 %vm5801_vm3, %v7963_v37 }
 0x203   : > { %5048 = vmatmul.mubr.msk.f32.gmra.mxu0 %vm1097_vm5, %v6084_v7 }
 0x204   : > { %5050 = vmatprep.mubr.msk.f32.mxu0 %vm5801_vm3, %v7963_v37 }
 0x205   : > { %v1091_v57 = vpop.xlane.xlu0 %1090 }
 0x206   : > { %v1092_v59 = vmul.f32 0.00390625, %v1091_v57 }
 0x207   : > { %5051 = vmatmul.mubr.msk.f32.gmra.mxu0 %vm1097_vm5, %v6089_v8 }
 0x208   : > { %v1094_v60 = vsub.f32 %v1092_v59, %v1093_v58  ;;  %5053 = vmatprep.mubr.msk.f32.mxu0 %vm5801_vm3, %v7963_v37 }
 0x20a   : > { %v1095_v61 = vadd.f32 1e-08, %v1094_v60 }
 0x20b   : > { %5054 = vmatmul.mubr.msk.f32.gmra.mxu0 %vm1097_vm5, %v6095_v9 }
 0x20c   : > { %5625 = vrsqrt.f32 %v1095_v61  ;;  %5056 = vmatprep.mubr.msk.f32.mxu0 %vm5801_vm3, %v7963_v37 }
 0x20f   : > { %5057 = vmatmul.mubr.msk.f32.gmra.mxu0 %vm1097_vm5, %v6100_v10 }
 0x210   : > { %5059 = vmatprep.mubr.msk.f32.mxu0 %vm5801_vm3, %v7963_v37 }
 0x213   : > { %5060 = vmatmul.mubr.msk.f32.gmra.mxu0 %vm1097_vm5, %v6105_v11 }
 0x214   : > { %5062 = vmatprep.mubr.msk.f32.mxu0 %vm5801_vm3, %v7963_v37 }
 0x217   : > { %5063 = vmatmul.mubr.msk.f32.gmra.mxu0 %vm1097_vm5, %v6113_v12 }
 0x218   : > { %5065 = vmatprep.mubr.msk.f32.mxu0 %vm5801_vm3, %v7963_v37 }
 0x219   : > { %v5626_v62 = vpop.eup %5625 }
 0x21a   : > { %5078 = vmatpush3.msk.msra.mxu1 %vm1149_vm4, %v5626_v62 }
 0x21b   : > { %5066 = vmatmul.mubr.msk.f32.gmra.mxu0 %vm1097_vm5, %v6118_v13  ;;  %5080 = vmatmul.mubr.msk.f32.vlgmr.msra.gmra.mxu1 %vm1097_vm5, %v6044_v0 }
 0x21c   : > { %5068 = vmatprep.mubr.msk.f32.mxu0 %vm5801_vm3, %v7963_v37  ;;  %5082 = vmatprep.mubr.msk.f32.mxu1 %vm5801_vm3, %v7963_v37 }
 0x21f   : > { %5069 = vmatmul.mubr.msk.f32.gmra.mxu0 %vm1097_vm5, %v6123_v14  ;;  %5083 = vmatmul.mubr.msk.f32.gmra.mxu1 %vm1097_vm5, %v6049_v1 }
 0x220   : > { %5071 = vmatprep.mubr.msk.f32.mxu0 %vm5801_vm3, %v7963_v37  ;;  %5085 = vmatprep.mubr.msk.f32.mxu1 %vm5801_vm3, %v7963_v37 }
 0x223   : > { %5072 = vmatmul.mubr.msk.f32.gmra.mxu0 %vm1097_vm5, %v6128_v15  ;;  %5086 = vmatmul.mubr.msk.f32.gmra.mxu1 %vm1097_vm5, %v6054_v2 }
 0x224   : > { %5074 = vmatprep.mubr.msk.f32.mxu0 %vm5801_vm3, %v7963_v37  ;;  %5088 = vmatprep.mubr.msk.f32.mxu1 %vm5801_vm3, %v7963_v37 }
 0x227   : > { %5075 = vmatmul.mubr.msk.f32.gmra.mxu0 %vm1097_vm5, %v6133_v16  ;;  %5089 = vmatmul.mubr.msk.f32.gmra.mxu1 %vm1097_vm5, %v6064_v3 }
 0x228   : > { %5091 = vmatprep.mubr.msk.f32.mxu1 %vm5801_vm3, %v7963_v37  ;;  %5132 = vmatprep.mubr.msk.f32.mxu0 %vm5801_vm3, %v7963_v37 }
 0x22b   : > { %5092 = vmatmul.mubr.msk.f32.gmra.mxu1 %vm1097_vm5, %v6069_v4 }
 0x22c   : > { %5094 = vmatprep.mubr.msk.f32.mxu1 %vm5801_vm3, %v7963_v37 }
 0x22f   : > { %5095 = vmatmul.mubr.msk.f32.gmra.mxu1 %vm1097_vm5, %v6074_v5 }
 0x230   : > { %5097 = vmatprep.mubr.msk.f32.mxu1 %vm5801_vm3, %v7963_v37 }
 0x233   : > { %5098 = vmatmul.mubr.msk.f32.gmra.mxu1 %vm1097_vm5, %v6079_v6 }
 0x234   : > { %5100 = vmatprep.mubr.msk.f32.mxu1 %vm5801_vm3, %v7963_v37 }
 0x237   : > { %5101 = vmatmul.mubr.msk.f32.gmra.mxu1 %vm1097_vm5, %v6084_v7 }
 0x238   : > { %5103 = vmatprep.mubr.msk.f32.mxu1 %vm5801_vm3, %v7963_v37 }
 0x23b   : > { %5104 = vmatmul.mubr.msk.f32.gmra.mxu1 %vm1097_vm5, %v6089_v8 }
 0x23c   : > { %5106 = vmatprep.mubr.msk.f32.mxu1 %vm5801_vm3, %v7963_v37 }
 0x23f   : > { %5107 = vmatmul.mubr.msk.f32.gmra.mxu1 %vm1097_vm5, %v6095_v9 }
 0x240   : > { %5109 = vmatprep.mubr.msk.f32.mxu1 %vm5801_vm3, %v7963_v37 }
 0x243   : > { %5110 = vmatmul.mubr.msk.f32.gmra.mxu1 %vm1097_vm5, %v6100_v10 }
 0x244   : > { %5112 = vmatprep.mubr.msk.f32.mxu1 %vm5801_vm3, %v7963_v37 }
 0x247   : > { %5113 = vmatmul.mubr.msk.f32.gmra.mxu1 %vm1097_vm5, %v6105_v11 }
 0x248   : > { %5115 = vmatprep.mubr.msk.f32.mxu1 %vm5801_vm3, %v7963_v37 }
 0x24b   : > { %5116 = vmatmul.mubr.msk.f32.gmra.mxu1 %vm1097_vm5, %v6113_v12 }
 0x24c   : > { %5118 = vmatprep.mubr.msk.f32.mxu1 %vm5801_vm3, %v7963_v37 }
 0x24f   : > { %5119 = vmatmul.mubr.msk.f32.gmra.mxu1 %vm1097_vm5, %v6118_v13 }
 0x250   : > { %5121 = vmatprep.mubr.msk.f32.mxu1 %vm5801_vm3, %v7963_v37 }
 0x253   : > { %5122 = vmatmul.mubr.msk.f32.gmra.mxu1 %vm1097_vm5, %v6123_v14 }
 0x254   : > { %5124 = vmatprep.mubr.msk.f32.mxu1 %vm5801_vm3, %v7963_v37 }
 0x257   : > { %5125 = vmatmul.mubr.msk.f32.gmra.mxu1 %vm1097_vm5, %v6128_v15 }
 0x258   : > { %5127 = vmatprep.mubr.msk.f32.mxu1 %vm5801_vm3, %v7963_v37 }
 0x25b   : > { %5128 = vmatmul.mubr.msk.f32.gmra.mxu1 %vm1097_vm5, %v6133_v16 }
 0x2a7   : > { %v1219_v54 = vpop.f32.mrf.mxu0 }
 0x2a8   : > { %1458 = vperm.xlu1 %5623, %v1219_v54  }
 0x2a9   : > { %v5028_v55 = vpop.f32.mrf.mxu0 }
 0x2ab   : > { %v1224_v56 = vpop.f32.mrf.mxu0 }
 0x2ac   : > { %1463 = vperm.xlu0 %5624, %v1224_v56  }
 0x2ad   : > { %v5031_v57 = vpop.f32.mrf.mxu0 }
 0x2af   : > { %v1229_v58 = vpop.f32.mrf.mxu0 }
 0x2b0   : > { %1468 = vperm.xlu1 %5623, %v1229_v58  }
 0x2b1   : > { %v5034_v59 = vpop.f32.mrf.mxu0 }
 0x2b3   : > { %v1234_v60 = vpop.f32.mrf.mxu0 }
 0x2b4   : > { %1473 = vperm.xlu1 %5623, %v1234_v60  }
 0x2b5   : > { %v5037_v61 = vpop.f32.mrf.mxu0 }
 0x2b7   : > { %v1239_v62 = vpop.f32.mrf.mxu0 }
 0x2b8   : > { %1478 = vperm.xlu1 %5623, %v1239_v62  }
 0x2b9   : > { %v5040_v63 = vpop.f32.mrf.mxu0 }
 0x2bb   : > { %v1244_v37 = vpop.f32.mrf.mxu0 }
 0x2bc   : > { %1483 = vperm.xlu1 %5623, %v1244_v37  }
 0x2bd   : > { %v5043_v33 = vpop.f32.mrf.mxu0 }
 0x2bf   : > { %v1249_v34 = vpop.f32.mrf.mxu0 }
 0x2c0   : > { %1488 = vperm.xlu1 %5623, %v1249_v34  }
 0x2c1   : > { %v5046_v36 = vpop.f32.mrf.mxu0 }
 0x2c3   : > { %v1254_v54 = vpop.f32.mrf.mxu0 }
 0x2c4   : > { %1493 = vperm.xlu0 %5624, %v1254_v54  }
 0x2c5   : > { %v5049_v55 = vpop.f32.mrf.mxu0 }
 0x2c7   : > { %v1259_v56 = vpop.f32.mrf.mxu0 }
 0x2c8   : > { %1498 = vperm.xlu0 %5624, %v1259_v56  }
 0x2c9   : > { %v5052_v57 = vpop.f32.mrf.mxu0 }
 0x2cb   : > { %v1264_v58 = vpop.f32.mrf.mxu0 }
 0x2cc   : > { %1503 = vperm.xlu0 %5624, %v1264_v58  }
 0x2cd   : > { %v5055_v59 = vpop.f32.mrf.mxu0 }
 0x2cf   : > { %v1269_v60 = vpop.f32.mrf.mxu0 }
 0x2d0   : > { %1508 = vperm.xlu0 %5624, %v1269_v60  }
 0x2d1   : > { %v5058_v61 = vpop.f32.mrf.mxu0 }
 0x2d3   : > { %v1274_v62 = vpop.f32.mrf.mxu0 }
 0x2d4   : > { %1513 = vperm.xlu0 %5624, %v1274_v62  }
 0x2d5   : > { %v5061_v63 = vpop.f32.mrf.mxu0 }
 0x2d7   : > { %v1279_v37 = vpop.f32.mrf.mxu0 }
 0x2d8   : > { %1518 = vperm.xlu0 %5624, %v1279_v37  }
 0x2d9   : > { %v5064_v33 = vpop.f32.mrf.mxu0 }
 0x2db   : > { %v1284_v34 = vpop.f32.mrf.mxu0  ;;  %v1372_v36 = vpop.f32.mrf.mxu1 }
 0x2dc   : > { %1523 = vperm.xlu0 %5624, %v1284_v34   ;;  %1560 = vperm.xlu1 %5623, %v1372_v36  }
 0x2dd   : > { %v5067_v54 = vpop.f32.mrf.mxu0  ;;  %v5081_v55 = vpop.f32.mrf.mxu1 }
 0x2df   : > { %v1289_v56 = vpop.f32.mrf.mxu0  ;;  %v1377_v57 = vpop.f32.mrf.mxu1 }
 0x2e0   : > { %1528 = vperm.xlu0 %5624, %v1289_v56   ;;  %1565 = vperm.xlu1 %5623, %v1377_v57  }
 0x2e1   : > { %v5070_v58 = vpop.f32.mrf.mxu0  ;;  %v5084_v59 = vpop.f32.mrf.mxu1 }
 0x2e3   : > { %v1294_v60 = vpop.f32.mrf.mxu0  ;;  %v1382_v61 = vpop.f32.mrf.mxu1 }
 0x2e4   : > { %1533 = vperm.xlu0 %5624, %v1294_v60   ;;  %1570 = vperm.xlu1 %5623, %v1382_v61  }
 0x2e5   : > { %v5073_v62 = vpop.f32.mrf.mxu0  ;;  %v5087_v63 = vpop.f32.mrf.mxu1 }
 0x2e7   : > { %v1299_v37 = vpop.f32.mrf.mxu0  ;;  %v1387_v33 = vpop.f32.mrf.mxu1 }
 0x2e8   : > { %1538 = vperm.xlu0 %5624, %v1299_v37   ;;  %1575 = vperm.xlu1 %5623, %v1387_v33  }
 0x2e9   : > { %v5090_v34 = vpop.f32.mrf.mxu1  ;;  %v5076_v36 = vpop.f32.mrf.mxu0 }
 0x2eb   : > { %v1392_v54 = vpop.f32.mrf.mxu1 }
 0x2ec   : > { %1580 = vperm.xlu1 %5623, %v1392_v54  }
 0x2ed   : > { %v5093_v55 = vpop.f32.mrf.mxu1 }
 0x2ef   : > { %v1397_v31 = vpop.f32.mrf.mxu1 }
 0x2f0   : > { %1585 = vperm.xlu1 %5623, %v1397_v31  }
 0x2f1   : > { %v5096_v56 = vpop.f32.mrf.mxu1 }
 0x2f3   : > { %v1402_v57 = vpop.f32.mrf.mxu1 }
 0x2f4   : > { %1590 = vperm.xlu1 %5623, %v1402_v57  }
 0x2f5   : > { %v5099_v58 = vpop.f32.mrf.mxu1 }
 0x2f7   : > { %v1407_v59 = vpop.f32.mrf.mxu1 }
 0x2f8   : > { %1595 = vperm.xlu1 %5623, %v1407_v59  }
 0x2f9   : > { %v5102_v60 = vpop.f32.mrf.mxu1 }
 0x2fb   : > { %v1412_v61 = vpop.f32.mrf.mxu1 }
 0x2fc   : > { %1600 = vperm.xlu1 %5623, %v1412_v61  }
 0x2fd   : > { %v5105_v62 = vpop.f32.mrf.mxu1 }
 0x2ff   : > { %v1417_v63 = vpop.f32.mrf.mxu1 }
 0x300   : > { %1605 = vperm.xlu1 %5623, %v1417_v63  }
 0x301   : > { %v5108_v37 = vpop.f32.mrf.mxu1 }
 0x303   : > { %v1422_v33 = vpop.f32.mrf.mxu1 }
 0x304   : > { %1610 = vperm.xlu1 %5623, %v1422_v33  }
 0x305   : > { %v5111_v34 = vpop.f32.mrf.mxu1 }
 0x307   : > { %v1427_v36 = vpop.f32.mrf.mxu1 }
 0x308   : > { %1615 = vperm.xlu1 %5623, %v1427_v36  }
 0x309   : > { %v5114_v54 = vpop.f32.mrf.mxu1 }
 0x30b   : > { %v1432_v31 = vpop.f32.mrf.mxu1 }
 0x30c   : > { %1620 = vperm.xlu1 %5623, %v1432_v31  }
 0x30d   : > { %v5117_v55 = vpop.f32.mrf.mxu1 }
 0x30f   : > { %v1437_v56 = vpop.f32.mrf.mxu1 }
 0x310   : > { %1625 = vperm.xlu1 %5623, %v1437_v56   ;;  %v6576_v56 = vld [vmem:[%s7929_s7] ss:$0 sm:$0xff] }
 0x311   : > { %v5120_v57 = vpop.f32.mrf.mxu1 }
 0x313   : > { %v1442_v58 = vpop.f32.mrf.mxu1 }
 0x314   : > { %1630 = vperm.xlu1 %5623, %v1442_v58  }
 0x315   : > { %v5123_v59 = vpop.f32.mrf.mxu1 }
 0x316   : > { %v6581_v59 = vld [vmem:[%s8048_s26] ss:$0 sm:$0xff] }
 0x317   : > { %v1447_v60 = vpop.f32.mrf.mxu1 }
 0x318   : > { %1635 = vperm.xlu1 %5623, %v1447_v60  }
 0x319   : > { %v5126_v61 = vpop.f32.mrf.mxu1 }
 0x31b   : > { %v1452_v62 = vpop.f32.mrf.mxu1 }
 0x31c   : > { %1640 = vperm.xlu1 %5623, %v1452_v62  }
 0x31d   : > { %v5129_v63 = vpop.f32.mrf.mxu1 }
 0x323   : > { %v1459_v37 = vpop.permute.xlu1 %1458 }
 0x324   : > { %v1541_v31 = vsub.f32 %v6362_v52, %v1459_v37 }
 0x327   : > { %v1464_v55 = vpop.permute.xlu0 %1463 }
 0x328   : > { %v1542_v60 = vsub.f32 %v6357_v51, %v1464_v55 }
 0x32b   : > { %v1469_v33 = vpop.permute.xlu1 %1468 }
 0x32c   : > { %v1543_v16 = vsub.f32 %v6352_v50, %v1469_v33 }
 0x32f   : > { %v1474_v34 = vpop.permute.xlu1 %1473 }
 0x330   : > { %v1544_v55 = vsub.f32 %v6347_v49, %v1474_v34 }
 0x333   : > { %v1479_v36 = vpop.permute.xlu1 %1478 }
 0x337   : > { %v1484_v54 = vpop.permute.xlu1 %1483 }
 0x338   : > { %v1546_v34 = vsub.f32 %v6337_v47, %v1484_v54 }
 0x33b   : > { %v1489_v32 = vpop.permute.xlu1 %1488 }
 0x33f   : > { %v1494_v37 = vpop.permute.xlu0 %1493 }
 0x357   : > { %v1561_v57 = vpop.permute.xlu1 %1560 }
 0x358   : > { %v1643_v58 = vmul.f32 %v1561_v57, %v1541_v31  ;;  %v8049_v57 = vmov 0.0  }
 0x35a   : > { %v1666_v61 = vmul.f32 %v6576_v56, %v1643_v58 }
 0x35b   : > { %v1566_v62 = vpop.permute.xlu1 %1565 }
 0x35c   : > { %v1689_v52 = vadd.f32 %v6581_v59, %v1666_v61  ;;  %v1644_v63 = vmul.f32 %v1566_v62, %v1542_v60  ;;  %v1499_v60 = vpop.permute.xlu0 %1498  ;;  %v1545_v62 = vsub.f32 %v6342_v48, %v1479_v36 }
 0x35e   : > { %v1667_v15 = vmul.f32 %v6576_v56, %v1644_v63  ;;  %5133 = vmatmul.mubr.msk.f32.vlgmr.msra.gmra.mxu0 %vm924_vm1, %v1689_v52 }
 0x35f   : > { %v1571_v31 = vpop.permute.xlu1 %1570  ;;  %5135 = vmatprep.mubr.msk.f32.mxu0 %vm5801_vm3, %v8049_v57 }
 0x360   : > { %v1690_v14 = vadd.f32 %v6581_v59, %v1667_v15  ;;  %v1645_v51 = vmul.f32 %v1571_v31, %v1543_v16  ;;  %v1504_v49 = vpop.permute.xlu0 %1503 }
 0x362   : > { %v1668_v58 = vmul.f32 %v6576_v56, %v1645_v51  ;;  %5136 = vmatmul.mubr.msk.f32.gmra.mxu0 %vm924_vm1, %v1690_v14  ;;  %v1547_v51 = vsub.f32 %v6332_v46, %v1489_v32 }
 0x363   : > { %v1576_v61 = vpop.permute.xlu1 %1575  ;;  %5138 = vmatprep.mubr.msk.f32.mxu0 %vm5801_vm3, %v8049_v57 }
 0x364   : > { %v1691_v50 = vadd.f32 %v6581_v59, %v1668_v58  ;;  %v1646_v33 = vmul.f32 %v1576_v61, %v1544_v55  ;;  %v1509_v58 = vpop.permute.xlu0 %1508 }
 0x366   : > { %v1669_v52 = vmul.f32 %v6576_v56, %v1646_v33  ;;  %5139 = vmatmul.mubr.msk.f32.gmra.mxu0 %vm924_vm1, %v1691_v50  ;;  %v1548_v50 = vsub.f32 %v6327_v45, %v1494_v37 }
 0x367   : > { %v1581_v15 = vpop.permute.xlu1 %1580  ;;  %5141 = vmatprep.mubr.msk.f32.mxu0 %vm5801_vm3, %v8049_v57 }
 0x368   : > { %v1692_v14 = vadd.f32 %v6581_v59, %v1669_v52  ;;  %v1647_v16 = vmul.f32 %v1581_v15, %v1545_v62  ;;  %v1514_v52 = vpop.permute.xlu0 %1513  ;;  %v1549_v15 = vsub.f32 %v6322_v44, %v1499_v60 }
 0x36a   : > { %v1670_v63 = vmul.f32 %v6576_v56, %v1647_v16  ;;  %5142 = vmatmul.mubr.msk.f32.gmra.mxu0 %vm924_vm1, %v1692_v14 }
 0x36b   : > { %v1586_v31 = vpop.permute.xlu1 %1585  ;;  %5144 = vmatprep.mubr.msk.f32.mxu0 %vm5801_vm3, %v8049_v57 }
 0x36c   : > { %v1693_v48 = vadd.f32 %v6581_v59, %v1670_v63  ;;  %v1648_v36 = vmul.f32 %v1586_v31, %v1546_v34  ;;  %v1550_v34 = vsub.f32 %v6317_v43, %v1504_v49  ;;  %v1519_v31 = vpop.permute.xlu0 %1518 }
 0x36e   : > { %v1671_v55 = vmul.f32 %v6576_v56, %v1648_v36  ;;  %5145 = vmatmul.mubr.msk.f32.gmra.mxu0 %vm924_vm1, %v1693_v48  ;;  %v1551_v36 = vsub.f32 %v6312_v42, %v1509_v58 }
 0x36f   : > { %v1591_v61 = vpop.permute.xlu1 %1590  ;;  %5147 = vmatprep.mubr.msk.f32.mxu0 %vm5801_vm3, %v8049_v57 }
 0x370   : > { %v1694_v47 = vadd.f32 %v6581_v59, %v1671_v55  ;;  %v1649_v54 = vmul.f32 %v1591_v61, %v1547_v51  ;;  %v1524_v61 = vpop.permute.xlu0 %1523 }
 0x372   : > { %v1672_v33 = vmul.f32 %v6576_v56, %v1649_v54  ;;  %5148 = vmatmul.mubr.msk.f32.gmra.mxu0 %vm924_vm1, %v1694_v47  ;;  %v1552_v47 = vsub.f32 %v6307_v41, %v1514_v52 }
 0x373   : > { %v1596_v62 = vpop.permute.xlu1 %1595  ;;  %5150 = vmatprep.mubr.msk.f32.mxu0 %vm5801_vm3, %v8049_v57 }
 0x374   : > { %v1695_v32 = vadd.f32 %v6581_v59, %v1672_v33  ;;  %v1650_v46 = vmul.f32 %v1596_v62, %v1548_v50  ;;  %v1553_v33 = vsub.f32 %v6302_v40, %v1519_v31 }
 0x376   : > { %v1673_v14 = vmul.f32 %v6576_v56, %v1650_v46  ;;  %5151 = vmatmul.mubr.msk.f32.gmra.mxu0 %vm924_vm1, %v1695_v32  ;;  %v1529_v32 = vpop.permute.xlu0 %1528 }
 0x377   : > { %v1601_v16 = vpop.permute.xlu1 %1600  ;;  %5153 = vmatprep.mubr.msk.f32.mxu0 %vm5801_vm3, %v8049_v57 }
 0x378   : > { %v1696_v45 = vadd.f32 %v6581_v59, %v1673_v14  ;;  %v1651_v37 = vmul.f32 %v1601_v16, %v1549_v15  ;;  %v1554_v15 = vsub.f32 %v6297_v39, %v1524_v61 }
 0x37a   : > { %v1674_v63 = vmul.f32 %v6576_v56, %v1651_v37  ;;  %5154 = vmatmul.mubr.msk.f32.gmra.mxu0 %vm924_vm1, %v1696_v45  ;;  %v1534_v37 = vpop.permute.xlu0 %1533 }
 0x37b   : > { %v1606_v48 = vpop.permute.xlu1 %1605  ;;  %5156 = vmatprep.mubr.msk.f32.mxu0 %vm5801_vm3, %v8049_v57 }
 0x37c   : > { %v1697_v44 = vadd.f32 %v6581_v59, %v1674_v63  ;;  %v1652_v60 = vmul.f32 %v1606_v48, %v1550_v34  ;;  %v1555_v34 = vsub.f32 %v6289_v38, %v1529_v32 }
 0x37e   : > { %v1675_v51 = vmul.f32 %v6576_v56, %v1652_v60  ;;  %5157 = vmatmul.mubr.msk.f32.gmra.mxu0 %vm924_vm1, %v1697_v44  ;;  %v1556_v44 = vsub.f32 %v6279_v35, %v1534_v37 }
 0x37f   : > { %v1611_v55 = vpop.permute.xlu1 %1610  ;;  %5159 = vmatprep.mubr.msk.f32.mxu0 %vm5801_vm3, %v8049_v57 }
 0x380   : > { %v1698_v43 = vadd.f32 %v6581_v59, %v1675_v51  ;;  %v1653_v49 = vmul.f32 %v1611_v55, %v1551_v36  ;;  %v1539_v36 = vpop.permute.xlu0 %1538 }
 0x382   : > { %v1676_v54 = vmul.f32 %v6576_v56, %v1653_v49  ;;  %5160 = vmatmul.mubr.msk.f32.gmra.mxu0 %vm924_vm1, %v1698_v43  ;;  %v1557_v43 = vsub.f32 %v6367_v53, %v1539_v36 }
 0x383   : > { %v1616_v50 = vpop.permute.xlu1 %1615  ;;  %5162 = vmatprep.mubr.msk.f32.mxu0 %vm5801_vm3, %v8049_v57 }
 0x384   : > { %v1699_v42 = vadd.f32 %v6581_v59, %v1676_v54  ;;  %v1654_v58 = vmul.f32 %v1616_v50, %v1552_v47  ;;  %v6685_v50 = vld [vmem:[%s8050_s5] ss:$0 sm:$0xff] }
 0x386   : > { %v1677_v62 = vmul.f32 %v6576_v56, %v1654_v58  ;;  %5163 = vmatmul.mubr.msk.f32.gmra.mxu0 %vm924_vm1, %v1699_v42 }
 0x387   : > { %v1621_v46 = vpop.permute.xlu1 %1620  ;;  %5165 = vmatprep.mubr.msk.f32.mxu0 %vm5801_vm3, %v8049_v57 }
 0x388   : > { %v1700_v41 = vadd.f32 %v6581_v59, %v1677_v62  ;;  %v1655_v52 = vmul.f32 %v1621_v46, %v1553_v33 }
 0x38a   : > { %v1678_v14 = vmul.f32 %v6576_v56, %v1655_v52  ;;  %5166 = vmatmul.mubr.msk.f32.gmra.mxu0 %vm924_vm1, %v1700_v41 }
 0x38b   : > { %v1626_v16 = vpop.permute.xlu1 %1625  ;;  %5168 = vmatprep.mubr.msk.f32.mxu0 %vm5801_vm3, %v8049_v57 }
 0x38c   : > { %v1701_v40 = vadd.f32 %v6581_v59, %v1678_v14  ;;  %v1656_v45 = vmul.f32 %v1626_v16, %v1554_v15 }
 0x38e   : > { %v1679_v63 = vmul.f32 %v6576_v56, %v1656_v45  ;;  %5169 = vmatmul.mubr.msk.f32.gmra.mxu0 %vm924_vm1, %v1701_v40 }
 0x38f   : > { %v1631_v31 = vpop.permute.xlu1 %1630  ;;  %5171 = vmatprep.mubr.msk.f32.mxu0 %vm5801_vm3, %v8049_v57 }
 0x390   : > { %v1702_v39 = vadd.f32 %v6581_v59, %v1679_v63  ;;  %v1657_v48 = vmul.f32 %v1631_v31, %v1555_v34 }
 0x392   : > { %v1680_v60 = vmul.f32 %v6576_v56, %v1657_v48  ;;  %5172 = vmatmul.mubr.msk.f32.gmra.mxu0 %vm924_vm1, %v1702_v39 }
 0x393   : > { %v1636_v51 = vpop.permute.xlu1 %1635  ;;  %5174 = vmatprep.mubr.msk.f32.mxu0 %vm5801_vm3, %v8049_v57 }
 0x394   : > { %v1703_v38 = vadd.f32 %v6581_v59, %v1680_v60  ;;  %v1658_v55 = vmul.f32 %v1636_v51, %v1556_v44 }
 0x396   : > { %v1681_v49 = vmul.f32 %v6576_v56, %v1658_v55  ;;  %5175 = vmatmul.mubr.msk.f32.gmra.mxu0 %vm924_vm1, %v1703_v38 }
 0x397   : > { %v1641_v61 = vpop.permute.xlu1 %1640  ;;  %5177 = vmatprep.mubr.msk.f32.mxu0 %vm5801_vm3, %v8049_v57 }
 0x398   : > { %v1704_v35 = vadd.f32 %v6581_v59, %v1681_v49  ;;  %v1659_v47 = vmul.f32 %v1641_v61, %v1557_v43 }
 0x39a   : > { %v1682_v54 = vmul.f32 %v6576_v56, %v1659_v47  ;;  %5178 = vmatmul.mubr.msk.f32.gmra.mxu0 %vm924_vm1, %v1704_v35 }
 0x39b   : > { %5180 = vmatprep.mubr.msk.f32.mxu0 %vm5801_vm3, %v8049_v57 }
 0x39c   : > { %v1705_v53 = vadd.f32 %v6581_v59, %v1682_v54 }
 0x39e   : > { %5181 = vmatmul.mubr.msk.f32.gmra.mxu0 %vm924_vm1, %v1705_v53 }
 0x41e   : > { %v1831_v42 = vpop.f32.mrf.mxu0 }
 0x41f   : > { %v1832_v58 = vadd.f32 %v6685_v50, %v1831_v42 }
 0x420   : > { %v5134_v33 = vpop.f32.mrf.mxu0 }
 0x421   : > { %1916 = vst.msk [vmem:[#allocation2] sm:$0xff] %vm1915_vm6, %v1832_v58 }
 0x422   : > { %v1836_v56 = vpop.f32.mrf.mxu0 }
 0x423   : > { %v1837_v62 = vadd.f32 %v6685_v50, %v1836_v56 }
 0x424   : > { %v5137_v57 = vpop.f32.mrf.mxu0 }
 0x425   : > { %1917 = vst.msk [vmem:[#allocation2 + $0x8] sm:$0xff] %vm1915_vm6, %v1837_v62 }
 0x426   : > { %v1841_v59 = vpop.f32.mrf.mxu0 }
 0x427   : > { %v1842_v32 = vadd.f32 %v6685_v50, %v1841_v59 }
 0x428   : > { %v5140_v46 = vpop.f32.mrf.mxu0 }
 0x429   : > { %1918 = vst.msk [vmem:[#allocation2 + $0x10] sm:$0xff] %vm1915_vm6, %v1842_v32 }
 0x42a   : > { %v1846_v41 = vpop.f32.mrf.mxu0 }
 0x42b   : > { %v1847_v52 = vadd.f32 %v6685_v50, %v1846_v41 }
 0x42c   : > { %v5143_v15 = vpop.f32.mrf.mxu0 }
 0x42d   : > { %1919 = vst.msk [vmem:[#allocation2 + $0x18] sm:$0xff] %vm1915_vm6, %v1847_v52 }
 0x42e   : > { %v1851_v14 = vpop.f32.mrf.mxu0 }
 0x42f   : > { %v1852_v16 = vadd.f32 %v6685_v50, %v1851_v14 }
 0x430   : > { %v5146_v40 = vpop.f32.mrf.mxu0 }
 0x431   : > { %1920 = vst.msk [vmem:[#allocation2 + $0x20] sm:$0xff] %vm1915_vm6, %v1852_v16 }
 0x432   : > { %v1856_v45 = vpop.f32.mrf.mxu0 }
 0x433   : > { %v1857_v37 = vadd.f32 %v6685_v50, %v1856_v45 }
 0x434   : > { %v5149_v34 = vpop.f32.mrf.mxu0 }
 0x435   : > { %1921 = vst.msk [vmem:[#allocation2 + $0x28] sm:$0xff] %vm1915_vm6, %v1857_v37 }
 0x436   : > { %v1861_v63 = vpop.f32.mrf.mxu0 }
 0x437   : > { %v1862_v31 = vadd.f32 %v6685_v50, %v1861_v63 }
 0x438   : > { %v5152_v39 = vpop.f32.mrf.mxu0 }
 0x439   : > { %1922 = vst.msk [vmem:[#allocation2 + $0x30] sm:$0xff] %vm1915_vm6, %v1862_v31 }
 0x43a   : > { %v1866_v48 = vpop.f32.mrf.mxu0 }
 0x43b   : > { %v1867_v44 = vadd.f32 %v6685_v50, %v1866_v48 }
 0x43c   : > { %v5155_v60 = vpop.f32.mrf.mxu0 }
 0x43d   : > { %1923 = vst.msk [vmem:[#allocation2 + $0x38] sm:$0xff] %vm1915_vm6, %v1867_v44 }
 0x43e   : > { %v1871_v36 = vpop.f32.mrf.mxu0 }
 0x43f   : > { %v1872_v51 = vadd.f32 %v6685_v50, %v1871_v36 }
 0x440   : > { %v5158_v38 = vpop.f32.mrf.mxu0 }
 0x441   : > { %1924 = vst.msk [vmem:[#allocation2 + $0x40] sm:$0xff] %vm1915_vm6, %v1872_v51 }
 0x442   : > { %v1876_v55 = vpop.f32.mrf.mxu0 }
 0x443   : > { %v1877_v43 = vadd.f32 %v6685_v50, %v1876_v55 }
 0x444   : > { %v5161_v49 = vpop.f32.mrf.mxu0 }
 0x445   : > { %1925 = vst.msk [vmem:[#allocation2 + $0x48] sm:$0xff] %vm1915_vm6, %v1877_v43 }
 0x446   : > { %v1881_v61 = vpop.f32.mrf.mxu0 }
 0x447   : > { %v1882_v35 = vadd.f32 %v6685_v50, %v1881_v61 }
 0x448   : > { %v5164_v47 = vpop.f32.mrf.mxu0 }
 0x449   : > { %1926 = vst.msk [vmem:[#allocation2 + $0x50] sm:$0xff] %vm1915_vm6, %v1882_v35 }
 0x44a   : > { %v1886_v54 = vpop.f32.mrf.mxu0 }
 0x44b   : > { %v1887_v53 = vadd.f32 %v6685_v50, %v1886_v54 }
 0x44c   : > { %v5167_v42 = vpop.f32.mrf.mxu0 }
 0x44d   : > { %1927 = vst.msk [vmem:[#allocation2 + $0x58] sm:$0xff] %vm1915_vm6, %v1887_v53 }
 0x44e   : > { %v1891_v58 = vpop.f32.mrf.mxu0 }
 0x44f   : > { %v1892_v33 = vadd.f32 %v6685_v50, %v1891_v58 }
 0x450   : > { %v5170_v56 = vpop.f32.mrf.mxu0 }
 0x451   : > { %1928 = vst.msk [vmem:[#allocation2 + $0x60] sm:$0xff] %vm1915_vm6, %v1892_v33 }
 0x452   : > { %v1896_v62 = vpop.f32.mrf.mxu0 }
 0x453   : > { %v1897_v57 = vadd.f32 %v6685_v50, %v1896_v62 }
 0x454   : > { %v5173_v59 = vpop.f32.mrf.mxu0 }
 0x455   : > { %1929 = vst.msk [vmem:[#allocation2 + $0x68] sm:$0xff] %vm1915_vm6, %v1897_v57 }
 0x456   : > { %v1901_v32 = vpop.f32.mrf.mxu0 }
 0x457   : > { %v1902_v46 = vadd.f32 %v6685_v50, %v1901_v32 }
 0x458   : > { %v5176_v41 = vpop.f32.mrf.mxu0 }
 0x459   : > { %1930 = vst.msk [vmem:[#allocation2 + $0x70] sm:$0xff] %vm1915_vm6, %v1902_v46 }
 0x45a   : > { %v1906_v52 = vpop.f32.mrf.mxu0 }
 0x45b   : > { %v1907_v15 = vadd.f32 %v6685_v50, %v1906_v52 }
 0x45c   : > { %v5179_v14 = vpop.f32.mrf.mxu0 }
 0x45d   : > { %1931 = vst.msk [vmem:[#allocation2 + $0x78] sm:$0xff] %vm1915_vm6, %v1907_v15 }
 0x45e   : > { %v1911_v16 = vpop.f32.mrf.mxu0 }
 0x45f   : > { %v1912_v40 = vadd.f32 %v6685_v50, %v1911_v16 }
 0x460   : > { %v5182_v45 = vpop.f32.mrf.mxu0 }
 0x461   : > { %1932 = vst.msk [vmem:[#allocation2 + $0x80] sm:$0xff] %vm1915_vm6, %v1912_v40 }
 0x462 PF: > { %v1951_v37 = vld [vmem:[%s6168_s28 + $0x8] sm:$0xff]  ;;  %v7971_v34 = vmov 0.0   ;;  %v1950_v63 = vld [vmem:[%s6168_s28] sm:$0xff]  ;;  %vm5804_vm7 = vmmov 0   ;;  %vm1959_vm8 = vcmask 130048   ;;  %v1939_v39 = vld [vmem:[#allocation2 + $0x30] sm:$0xff]  ;;  %v6784_v42 = vcombine.high %v6138_v17, %v6138_v17  ;;  %s8052_s8 = scalar_lea.vmem %s7934_s12, %s6108_s29  ;;  %s8060_s11 = scalar_lea.vmem %s7935_s13, %s6108_s29 }
 0x463   : > { %5509 = vmatprep.subr.mxu1 %v7971_v34  ;;  %5202 = vmatprep.mubr.msk.f32.mxu1 %vm5804_vm7, %v7971_v34  ;;  %v1938_v31 = vld [vmem:[#allocation2 + $0x28] sm:$0xff]  ;;  %v1933_v50 = vld [vmem:[#allocation2] sm:$0xff]  ;;  %v1940_v44 = vld [vmem:[#allocation2 + $0x38] sm:$0xff]  ;;  %vm2218_vm9 = vcmask 64512   ;;  %s2161_s28 = sld [smem:[#allocation7 + %s5779_s27]]  ;;  %s8061_s24 = scalar_lea.vmem %s7936_s14, %s6108_s29 }
 0x464   : > { %5511 = vmatpush3.msra.mxu1 %v1951_v37  ;;  %5183 = vmatprep.subr.mxu0 %v7971_v34  ;;  %v1934_v48 = vld [vmem:[#allocation2 + $0x8] sm:$0xff]  ;;  %v1935_v60 = vld [vmem:[#allocation2 + $0x10] sm:$0xff]  ;;  %v1941_v36 = vld [vmem:[#allocation2 + $0x40] sm:$0xff]  ;;  %8051 = vst [vmem:[#allocation41_spill] sm:$0xff] %v6784_v42  ;;  %s3121_s5 = smul.u32 3, %s5779_s27  ;;  %s3319_s0 = sld [smem:[#allocation9 + %s5779_s27]] }
 0x465   : > { %5510 = vmatprep.subr.mxu1 %v7971_v34  ;;  %5184 = vmatpush3.msra.mxu0 %v1951_v37  ;;  %v1936_v51 = vld [vmem:[#allocation2 + $0x18] sm:$0xff]  ;;  %v1942_v38 = vld [vmem:[#allocation2 + $0x48] sm:$0xff]  ;;  %v1937_v55 = vld [vmem:[#allocation2 + $0x20] sm:$0xff]  ;;  %p4850_p13 = scmp.ne.s32.totalorder %s5779_s27, 1 }
 0x466   : > { %5512 = vmatpush3.msra.mxu1 %v1950_v63  ;;  %5185 = vmatprep.subr.mxu0 %v7971_v34  ;;  %v1943_v43 = vld [vmem:[#allocation2 + $0x50] sm:$0xff]  ;;  %v1944_v49 = vld [vmem:[#allocation2 + $0x58] sm:$0xff]  ;;  %v1945_v61 = vld [vmem:[#allocation2 + $0x60] sm:$0xff]  ;;  %s3237_s15 = sadd.s32 2, %s3121_s5  ;;  %s3122_s23 = sld [smem:[#allocation4 + %s3121_s5]] }
 0x467   : > { %5203 = vmatmul.mubr.msk.f32.vlgmr.msra.gmra.mxu1 %vm1959_vm8, %v1938_v31  ;;  %5186 = vmatpush3.msra.mxu0 %v1950_v63  ;;  %v1946_v35 = vld [vmem:[#allocation2 + $0x68] sm:$0xff]  ;;  %v1947_v47 = vld [vmem:[#allocation2 + $0x70] sm:$0xff]  ;;  %v1948_v54 = vld [vmem:[#allocation2 + $0x78] sm:$0xff]  ;;  %s3238_s21 = sld [smem:[#allocation4 + %s3237_s15]]  ;;  %s8076_s15 = scalar_lea.vmem %s7939_s17, %s6108_s29 }
 0x468   : > { %5205 = vmatprep.mubr.msk.f32.mxu1 %vm5804_vm7, %v7971_v34  ;;  %5187 = vmatprep.mubr.msk.f32.mxu0 %vm5804_vm7, %v7971_v34  ;;  %v1949_v53 = vld [vmem:[#allocation2 + $0x80] sm:$0xff] }
 0x469   : > { %5188 = vmatmul.mubr.msk.f32.vlgmr.msra.gmra.mxu0 %vm1959_vm8, %v1933_v50  ;;  %2221 = vmatprep.subr.mxu1 %v7971_v34 }
 0x46a   : > { %5190 = vmatprep.mubr.msk.f32.mxu0 %vm5804_vm7, %v7971_v34  ;;  %5238 = vmatprep.subr.mxu0 %v7971_v34 }
 0x46b   : > { %5206 = vmatmul.mubr.msk.f32.gmra.mxu1 %vm1959_vm8, %v1939_v39 }
 0x46c   : > { %5208 = vmatprep.mubr.msk.f32.mxu1 %vm5804_vm7, %v7971_v34 }
 0x46d   : > { %5191 = vmatmul.mubr.msk.f32.gmra.mxu0 %vm1959_vm8, %v1934_v48 }
 0x46e   : > { %5193 = vmatprep.mubr.msk.f32.mxu0 %vm5804_vm7, %v7971_v34 }
 0x46f   : > { %5209 = vmatmul.mubr.msk.f32.gmra.mxu1 %vm1959_vm8, %v1940_v44 }
 0x470   : > { %5211 = vmatprep.mubr.msk.f32.mxu1 %vm5804_vm7, %v7971_v34 }
 0x471   : > { %5194 = vmatmul.mubr.msk.f32.gmra.mxu0 %vm1959_vm8, %v1935_v60 }
 0x472   : > { %5196 = vmatprep.mubr.msk.f32.mxu0 %vm5804_vm7, %v7971_v34 }
 0x473   : > { %5212 = vmatmul.mubr.msk.f32.gmra.mxu1 %vm1959_vm8, %v1941_v36 }
 0x474   : > { %5214 = vmatprep.mubr.msk.f32.mxu1 %vm5804_vm7, %v7971_v34 }
 0x475   : > { %5197 = vmatmul.mubr.msk.f32.gmra.mxu0 %vm1959_vm8, %v1936_v51 }
 0x476   : > { %5199 = vmatprep.mubr.msk.f32.mxu0 %vm5804_vm7, %v7971_v34 }
 0x477   : > { %5215 = vmatmul.mubr.msk.f32.gmra.mxu1 %vm1959_vm8, %v1942_v38 }
 0x478   : > { %5217 = vmatprep.mubr.msk.f32.mxu1 %vm5804_vm7, %v7971_v34 }
 0x479   : > { %5200 = vmatmul.mubr.msk.f32.gmra.mxu0 %vm1959_vm8, %v1937_v55 }
 0x47a   : > { %5240 = vmatprep.mubr.msk.f32.mxu0 %vm5804_vm7, %v7971_v34 }
 0x47b   : > { %5218 = vmatmul.mubr.msk.f32.gmra.mxu1 %vm1959_vm8, %v1943_v43 }
 0x47c   : > { %5220 = vmatprep.mubr.msk.f32.mxu1 %vm5804_vm7, %v7971_v34 }
 0x47f   : > { %5221 = vmatmul.mubr.msk.f32.gmra.mxu1 %vm1959_vm8, %v1944_v49 }
 0x480   : > { %5223 = vmatprep.mubr.msk.f32.mxu1 %vm5804_vm7, %v7971_v34 }
 0x483   : > { %5224 = vmatmul.mubr.msk.f32.gmra.mxu1 %vm1959_vm8, %v1945_v61  ;;  %v6808_v61 = vld [vmem:[%s8052_s8] ss:$0 sm:$0xff] }
 0x484   : > { %5226 = vmatprep.mubr.msk.f32.mxu1 %vm5804_vm7, %v7971_v34 }
 0x487   : > { %5227 = vmatmul.mubr.msk.f32.gmra.mxu1 %vm1959_vm8, %v1946_v35 }
 0x488   : > { %5229 = vmatprep.mubr.msk.f32.mxu1 %vm5804_vm7, %v7971_v34 }
 0x48b   : > { %5230 = vmatmul.mubr.msk.f32.gmra.mxu1 %vm1959_vm8, %v1947_v47 }
 0x48c   : > { %5232 = vmatprep.mubr.msk.f32.mxu1 %vm5804_vm7, %v7971_v34 }
 0x48f   : > { %5233 = vmatmul.mubr.msk.f32.gmra.mxu1 %vm1959_vm8, %v1948_v54 }
 0x490   : > { %5235 = vmatprep.mubr.msk.f32.mxu1 %vm5804_vm7, %v7971_v34 }
 0x493   : > { %5236 = vmatmul.mubr.msk.f32.gmra.mxu1 %vm1959_vm8, %v1949_v53 }
 0x494   : > { %4751 = vmatprep.mubr.msk.f32.mxu1 %vm2218_vm9, %v6784_v42 }
 0x527   : > { %v6788_v58 = vpop.f32.mrf.mxu1 }
 0x529   : > { %v5204_v33 = vpop.f32.mrf.mxu1  ;;  %v6790_v56 = vpop.f32.mrf.mxu0 }
 0x52b   : > { %v6792_v62 = vpop.f32.mrf.mxu1  ;;  %v5189_v57 = vpop.f32.mrf.mxu0 }
 0x52c   : > { %v6813_v57 = vstv %s2161_s28  ;;  %s3179_s28 = sadd.s32 1, %s3121_s5  ;;  %s8062_s5 = scalar_lea.vmem %s7938_s16, %s6108_s29 }
 0x52d   : > { %v5207_v59 = vpop.f32.mrf.mxu1  ;;  %v6794_v32 = vpop.f32.mrf.mxu0  ;;  %s3180_s8 = sld [smem:[#allocation4 + %s3179_s28]] }
 0x52f   : > { %v2112_v46 = vpop.f32.mrf.mxu1  ;;  %v5192_v41 = vpop.f32.mrf.mxu0 }
 0x531   : > { %v5210_v52 = vpop.f32.mrf.mxu1  ;;  %v6796_v15 = vpop.f32.mrf.mxu0 }
 0x533   : > { %v2117_v14 = vpop.f32.mrf.mxu1  ;;  %v5195_v16 = vpop.f32.mrf.mxu0  ;;  %s7294_s26 = scalar_lea.vmem [#allocation3], %s3180_s8 }
 0x535   : > { %v5213_v40 = vpop.f32.mrf.mxu1  ;;  %v6798_v45 = vpop.f32.mrf.mxu0 }
 0x537   : > { %v2122_v37 = vpop.f32.mrf.mxu1  ;;  %v5198_v63 = vpop.f32.mrf.mxu0 }
 0x539   : > { %v5216_v31 = vpop.f32.mrf.mxu1  ;;  %v6800_v50 = vpop.f32.mrf.mxu0 }
 0x53b   : > { %v2127_v39 = vpop.f32.mrf.mxu1  ;;  %v5201_v48 = vpop.f32.mrf.mxu0 }
 0x53d   : > { %v5219_v44 = vpop.f32.mrf.mxu1 }
 0x53f   : > { %v2132_v60 = vpop.f32.mrf.mxu1 }
 0x540   : > { %v2133_v63 = vadd.f32 %v6808_v61, %v2132_v60  ;;  %v2123_v60 = vadd.f32 %v6808_v61, %v2122_v37  ;;  %v2113_v37 = vadd.f32 %v6808_v61, %v2112_v46  ;;  %v2103_v46 = vadd.f32 %v6808_v61, %v6788_v58 }
 0x541   : > { %v5222_v36 = vpop.f32.mrf.mxu1 }
 0x542   : > { %v2128_v36 = vadd.f32 %v6808_v61, %v2127_v39  ;;  %vm2173_vm14 = vcmp.ge.f32.partialorder %v2133_v63, 0.0  ;;  %v2118_v39 = vadd.f32 %v6808_v61, %v2117_v14  ;;  %vm2171_vm0 = vcmp.ge.f32.partialorder %v2123_v60, 0.0 }
 0x543   : > { %v2137_v51 = vpop.f32.mrf.mxu1  ;;  %v2108_v14 = vadd.f32 %v6808_v61, %v6792_v62  ;;  %vm2169_vm2 = vcmp.ge.f32.partialorder %v2113_v37, 0.0  ;;  %v2185_v58 = vmul.f32 %v6813_v57, %v2103_v46  ;;  %vm2167_vm4 = vcmp.ge.f32.partialorder %v2103_v46, 0.0 }
 0x544   : > { %v2138_v41 = vadd.f32 %v6808_v61, %v2137_v51  ;;  %vm2172_vm15 = vcmp.ge.f32.partialorder %v2128_v36, 0.0  ;;  %vm2170_vm1 = vcmp.ge.f32.partialorder %v2118_v39, 0.0 }
 0x545   : > { %v5225_v38 = vpop.f32.mrf.mxu1  ;;  %v2186_v62 = vmul.f32 %v6813_v57, %v2108_v14  ;;  %vm2168_vm3 = vcmp.ge.f32.partialorder %v2108_v14, 0.0 }
 0x546   : > { %v2192_v51 = vmul.f32 %v6813_v57, %v2138_v41  ;;  %vm2174_vm13 = vcmp.ge.f32.partialorder %v2138_v41, 0.0 }
 0x547   : > { %v2142_v55 = vpop.f32.mrf.mxu1 }
 0x548   : > { %v2143_v53 = vadd.f32 %v6808_v61, %v2142_v55  ;;  %v2191_v55 = vmul.f32 %v6813_v57, %v2133_v63 }
 0x549   : > { %v5228_v43 = vpop.f32.mrf.mxu1 }
 0x54a   : > { %v2193_v31 = vmul.f32 %v6813_v57, %v2143_v53  ;;  %vm2175_vm12 = vcmp.ge.f32.partialorder %v2143_v53, 0.0 }
 0x54b   : > { %v2147_v49 = vpop.f32.mrf.mxu1 }
 0x54c   : > { %v2148_v47 = vadd.f32 %v6808_v61, %v2147_v49  ;;  %v6834_v43 = vsel %vm2175_vm12, %v2143_v53, %v2193_v31  ;;  %v2190_v49 = vmul.f32 %v6813_v57, %v2128_v36  ;;  %v2188_v53 = vmul.f32 %v6813_v57, %v2118_v39 }
 0x54d   : > { %v5231_v35 = vpop.f32.mrf.mxu1 }
 0x54e   : > { %v2194_v52 = vmul.f32 %v6813_v57, %v2148_v47  ;;  %vm2176_vm11 = vcmp.ge.f32.partialorder %v2148_v47, 0.0  ;;  %v6840_v35 = vsel %vm2174_vm13, %v2138_v41, %v2192_v51 }
 0x54f   : > { %v2152_v54 = vpop.f32.mrf.mxu1 }
 0x550   : > { %v2153_v33 = vadd.f32 %v6808_v61, %v2152_v54  ;;  %v6828_v38 = vsel %vm2176_vm11, %v2148_v47, %v2194_v52  ;;  %v2189_v47 = vmul.f32 %v6813_v57, %v2123_v60  ;;  %v6846_v54 = vsel %vm2173_vm14, %v2133_v63, %v2191_v55 }
 0x551   : > { %v5234_v59 = vpop.f32.mrf.mxu1  ;;  %v2098_v52 = vadd.f32 %v6808_v61, %v6800_v50  ;;  %v2093_v63 = vadd.f32 %v6808_v61, %v6798_v45  ;;  %v2088_v50 = vadd.f32 %v6808_v61, %v6796_v15  ;;  %v2083_v45 = vadd.f32 %v6808_v61, %v6794_v32 }
 0x552   : > { %vm2177_vm10 = vcmp.ge.f32.partialorder %v2153_v33, 0.0  ;;  %v2195_v16 = vmul.f32 %v6813_v57, %v2153_v33  ;;  %v2187_v59 = vmul.f32 %v6813_v57, %v2113_v37  ;;  %v6860_v41 = vsel %vm2171_vm0, %v2123_v60, %v2189_v47 }
 0x553   : > { %v6818_v40 = vpop.f32.mrf.mxu1  ;;  %vm2166_vm5 = vcmp.ge.f32.partialorder %v2098_v52, 0.0  ;;  %v2183_v51 = vmul.f32 %v6813_v57, %v2093_v63  ;;  %v6888_v60 = vsel %vm2167_vm4, %v2103_v46, %v2185_v58  ;;  %vm2165_vm6 = vcmp.ge.f32.partialorder %v2093_v63, 0.0 }
 0x554   : > { %v6822_v48 = vsel %vm2177_vm10, %v2153_v33, %v2195_v16  ;;  %v6853_v33 = vsel %vm2172_vm15, %v2128_v36, %v2190_v49  ;;  %v6867_v16 = vsel %vm2170_vm1, %v2118_v39, %v2188_v53  ;;  %v6874_v31 = vsel %vm2169_vm2, %v2113_v37, %v2187_v59 }
 0x555   : > { %2222 = vmatpush1.msra.mxu1 %v6822_v48  ;;  %v5237_v44 = vpop.f32.mrf.mxu1  ;;  %v6881_v36 = vsel %vm2168_vm3, %v2108_v14, %v2186_v62  ;;  %v2078_v15 = vadd.f32 %v6808_v61, %v6790_v56  ;;  %v2182_v55 = vmul.f32 %v6813_v57, %v2088_v50  ;;  %vm2164_vm10 = vcmp.ge.f32.partialorder %v2088_v50, 0.0 }
 0x556   : > { %2223 = vmatprep.subr.mxu1 %v7971_v34  ;;  %v2184_v44 = vmul.f32 %v6813_v57, %v2098_v52  ;;  %v2181_v32 = vmul.f32 %v6813_v57, %v2083_v45  ;;  %v2158_v49 = vadd.f32 %v6808_v61, %v6818_v40  ;;  %v6902_v37 = vsel %vm2165_vm6, %v2093_v63, %v2183_v51 }
 0x557   : > { %2224 = vmatpush1.msra.mxu1 %v6828_v38  ;;  %vm2163_vm11 = vcmp.ge.f32.partialorder %v2083_v45, 0.0  ;;  %v2180_v56 = vmul.f32 %v6813_v57, %v2078_v15  ;;  %v6907_v47 = vsel %vm2164_vm10, %v2088_v50, %v2182_v55  ;;  %vm2162_vm12 = vcmp.ge.f32.partialorder %v2078_v15, 0.0 }
 0x558   : > { %2225 = vmatprep.subr.mxu1 %v7971_v34  ;;  %v6895_v39 = vsel %vm2166_vm5, %v2098_v52, %v2184_v44  ;;  %v2196_v14 = vmul.f32 %v6813_v57, %v2158_v49  ;;  %v6912_v53 = vsel %vm2163_vm11, %v2083_v45, %v2181_v32  ;;  %vm2178_vm13 = vcmp.ge.f32.partialorder %v2158_v49, 0.0 }
 0x559   : > { %2226 = vmatpush1.msra.mxu1 %v6834_v43  ;;  %v6916_v61 = vsel %vm2162_vm12, %v2078_v15, %v2180_v56  ;;  %v2306_v57 = vmul.f32 %v6822_v48, %v6822_v48  ;;  %v2305_v46 = vmul.f32 %v6828_v38, %v6828_v38  ;;  %v2304_v59 = vmul.f32 %v6834_v43, %v6834_v43 }
 0x55a   : > { %2227 = vmatprep.subr.mxu1 %v7971_v34  ;;  %v6920_v40 = vsel %vm2178_vm13, %v2158_v49, %v2196_v14  ;;  %v2303_v62 = vmul.f32 %v6840_v35, %v6840_v35  ;;  %v2302_v52 = vmul.f32 %v6846_v54, %v6846_v54  ;;  %v2301_v58 = vmul.f32 %v6853_v33, %v6853_v33 }
 0x55b   : > { %2228 = vmatpush1.msra.mxu1 %v6840_v35  ;;  %v2300_v63 = vmul.f32 %v6860_v41, %v6860_v41  ;;  %v2299_v50 = vmul.f32 %v6867_v16, %v6867_v16  ;;  %v2298_v44 = vmul.f32 %v6874_v31, %v6874_v31  ;;  %v2297_v45 = vmul.f32 %v6881_v36, %v6881_v36 }
 0x55c   : > { %2229 = vmatprep.subr.mxu1 %v7971_v34  ;;  %v2296_v51 = vmul.f32 %v6888_v60, %v6888_v60  ;;  %v2295_v15 = vmul.f32 %v6895_v39, %v6895_v39  ;;  %v2294_v55 = vmul.f32 %v6902_v37, %v6902_v37  ;;  %v2293_v32 = vmul.f32 %v6907_v47, %v6907_v47 }
 0x55d   : > { %2230 = vmatpush1.msra.mxu1 %v6846_v54  ;;  %v2292_v49 = vmul.f32 %v6912_v53, %v6912_v53  ;;  %v2291_v56 = vmul.f32 %v6916_v61, %v6916_v61  ;;  %v2307_v14 = vmul.f32 %v6920_v40, %v6920_v40  ;;  %vm2378_vm14 = vcmask 257024  }
 0x55e   : > { %2231 = vmatprep.subr.mxu1 %v7971_v34  ;;  %vm2443_vm15 = vcmask 1043456   ;;  %vm2391_vm0 = vcmask 31744   ;;  %vm3102_vm1 = vcmask 261120  }
 0x55f   : > { %2232 = vmatpush1.msra.mxu1 %v6853_v33 }
 0x560   : > { %2233 = vmatprep.subr.mxu1 %v7971_v34 }
 0x561   : > { %2234 = vmatpush1.msra.mxu1 %v6860_v41 }
 0x562   : > { %2235 = vmatprep.subr.mxu1 %v7971_v34 }
 0x563   : > { %2236 = vmatpush1.msra.mxu1 %v6867_v16 }
 0x564   : > { %2237 = vmatprep.subr.mxu1 %v7971_v34 }
 0x565   : > { %2238 = vmatpush1.msra.mxu1 %v6874_v31 }
 0x566   : > { %2239 = vmatprep.subr.mxu1 %v7971_v34 }
 0x567   : > { %2240 = vmatpush1.msra.mxu1 %v6881_v36 }
 0x568   : > { %2241 = vmatprep.subr.mxu1 %v7971_v34 }
 0x569   : > { %2242 = vmatpush1.msra.mxu1 %v6888_v60 }
 0x56a   : > { %2243 = vmatprep.subr.mxu1 %v7971_v34 }
 0x56b   : > { %2244 = vmatpush1.msra.mxu1 %v6895_v39 }
 0x56c   : > { %2245 = vmatprep.subr.mxu1 %v7971_v34 }
 0x56d   : > { %2246 = vmatpush1.msra.mxu1 %v6902_v37 }
 0x56e   : > { %2247 = vmatprep.subr.mxu1 %v7971_v34 }
 0x56f   : > { %2248 = vmatpush1.msra.mxu1 %v6907_v47 }
 0x570   : > { %2249 = vmatprep.subr.mxu1 %v7971_v34 }
 0x571   : > { %2250 = vmatpush1.msra.mxu1 %v6912_v53 }
 0x572   : > { %2251 = vmatprep.subr.mxu1 %v7971_v34 }
 0x573   : > { %2252 = vmatpush1.msra.mxu1 %v6916_v61 }
 0x574   : > { %2283 = vmatprep.subr.mxu1 %v7971_v34 }
 0x575   : > { %2284 = vmatpush2.msra.mxu1 %v6920_v40 }
 0x576   : > { %2286 = vmatmul.mubr.f32.vlgmr.msra.gmra.mxu1 %v6138_v17  ;;  %2308 = vmatprep.subr.mxu1 %v7971_v34 }
 0x577   : > { %2309 = vmatpush1.msra.mxu1 %v2306_v57  ;;  %4752 = vmatprep.mubr.msk.f32.mxu1 %vm2218_vm9, %v6784_v42 }
 0x578   : > { %2310 = vmatprep.subr.mxu1 %v7971_v34 }
 0x579   : > { %2311 = vmatpush1.msra.mxu1 %v2305_v46 }
 0x57a   : > { %2312 = vmatprep.subr.mxu1 %v7971_v34 }
 0x57b   : > { %2313 = vmatpush1.msra.mxu1 %v2304_v59 }
 0x57c   : > { %2314 = vmatprep.subr.mxu1 %v7971_v34 }
 0x57d   : > { %2315 = vmatpush1.msra.mxu1 %v2303_v62 }
 0x57e   : > { %2316 = vmatprep.subr.mxu1 %v7971_v34 }
 0x57f   : > { %2317 = vmatpush1.msra.mxu1 %v2302_v52 }
 0x580   : > { %2318 = vmatprep.subr.mxu1 %v7971_v34 }
 0x581   : > { %2319 = vmatpush1.msra.mxu1 %v2301_v58 }
 0x582   : > { %2320 = vmatprep.subr.mxu1 %v7971_v34 }
 0x583   : > { %2321 = vmatpush1.msra.mxu1 %v2300_v63  ;;  %v5805_v63 = vmov 0  }
 0x584   : > { %2322 = vmatprep.subr.mxu1 %v7971_v34  ;;  %5628 = vset.pattern.permute.xlu1 %v5805_v63 }
 0x585   : > { %2323 = vmatpush1.msra.mxu1 %v2299_v50  ;;  %5627 = vset.pattern.permute.xlu0 %v5805_v63 }
 0x586   : > { %2324 = vmatprep.subr.mxu1 %v7971_v34  ;;  %3007 = vperm.xlu1 %5628, %v6153_v19  }
 0x587   : > { %2325 = vmatpush1.msra.mxu1 %v2298_v44 }
 0x588   : > { %2326 = vmatprep.subr.mxu1 %v7971_v34 }
 0x589   : > { %2327 = vmatpush1.msra.mxu1 %v2297_v45 }
 0x58a   : > { %2328 = vmatprep.subr.mxu1 %v7971_v34  ;;  %3017 = vperm.xlu1 %5628, %v6173_v21  }
 0x58b   : > { %2329 = vmatpush1.msra.mxu1 %v2296_v51 }
 0x58c   : > { %2330 = vmatprep.subr.mxu1 %v7971_v34 }
 0x58d   : > { %2331 = vmatpush1.msra.mxu1 %v2295_v15 }
 0x58e   : > { %2332 = vmatprep.subr.mxu1 %v7971_v34  ;;  %3027 = vperm.xlu1 %5628, %v6183_v23  }
 0x58f   : > { %2333 = vmatpush1.msra.mxu1 %v2294_v55 }
 0x590   : > { %2334 = vmatprep.subr.mxu1 %v7971_v34 }
 0x591   : > { %2335 = vmatpush1.msra.mxu1 %v2293_v32 }
 0x592   : > { %2336 = vmatprep.subr.mxu1 %v7971_v34  ;;  %3037 = vperm.xlu1 %5628, %v6201_v25   ;;  %v8054_v25 = vld [vmem:[#allocation35_spill] sm:$0xff] }
 0x593   : > { %2337 = vmatpush1.msra.mxu1 %v2292_v49 }
 0x594   : > { %2338 = vmatprep.subr.mxu1 %v7971_v34 }
 0x595   : > { %2339 = vmatpush1.msra.mxu1 %v2291_v56 }
 0x596   : > { %2370 = vmatprep.subr.mxu1 %v7971_v34  ;;  %3047 = vperm.xlu1 %5628, %v6216_v27  }
 0x597   : > { %2371 = vmatpush2.msra.mxu1 %v2307_v14 }
 0x598   : > { %2373 = vmatmul.mubr.f32.vlgmr.msra.gmra.mxu1 %v6138_v17  ;;  %5291 = vmatprep.subr.mxu1 %v7971_v34 }
 0x599   : > { %5293 = vmatprep.mubr.msk.f32.mxu1 %vm5804_vm7, %v7971_v34 }
 0x59a   : > { %3057 = vperm.xlu1 %5628, %v6226_v29  }
 0x636   : > { %v2287_v57 = vpop.f32.mrf.mxu1 }
 0x637   : > { %v2379_v46 = vsel %vm2378_vm14, %v2287_v57, 0.0 }
 0x638   : > { %2380 = vadd.xlane.f32.xlu0 %v2379_v46  ;;  %v2289_v59 = vpop.f32.mrf.mxu1 }
 0x658   : > { %v2374_v62 = vpop.f32.mrf.mxu1 }
 0x659   : > { %v2383_v52 = vsel %vm2378_vm14, %v2374_v62, 0.0 }
 0x65a   : > { %2384 = vadd.xlane.f32.xlu0 %v2383_v52  ;;  %v2376_v58 = vpop.f32.mrf.mxu1 }
 0x670   : > { %3002 = vperm.xlu0 %5627, %v6148_v18  }
 0x674   : > { %3012 = vperm.xlu0 %5627, %v6158_v20  }
 0x678   : > { %3022 = vperm.xlu0 %5627, %v6178_v22  }
 0x67c   : > { %3032 = vperm.xlu0 %5627, %v6196_v24   ;;  %v8053_v24 = vld [vmem:[#allocation34_spill] sm:$0xff] }
 0x680   : > { %3042 = vperm.xlu0 %5627, %v6206_v26   ;;  %v8055_v26 = vld [vmem:[#allocation36_spill] sm:$0xff] }
 0x684   : > { %3052 = vperm.xlu0 %5627, %v6221_v28  }
 0x688   : > { %3062 = vperm.xlu0 %5627, %v6240_v30  }
 0x6c1   : > { %v2381_v50 = vpop.xlane.xlu0 %2380 }
 0x6c2   : > { %v2382_v44 = vmul.f32 0.0009765625, %v2381_v50 }
 0x6c4   : > { %5239 = vmatpush3.msk.msra.mxu0 %vm2443_vm15, %v2382_v44  ;;  %v2387_v19 = vmul.f32 %v2382_v44, %v2382_v44 }
 0x6c5   : > { %5241 = vmatmul.mubr.msk.f32.vlgmr.msra.gmra.mxu0 %vm2391_vm0, %v6044_v0  ;;  %3374 = vmatprep.subr.mxu0 %v7971_v34 }
 0x6c6   : > { %5243 = vmatprep.mubr.msk.f32.mxu0 %vm5804_vm7, %v7971_v34 }
 0x6c9   : > { %5244 = vmatmul.mubr.msk.f32.gmra.mxu0 %vm2391_vm0, %v6049_v1 }
 0x6ca   : > { %5246 = vmatprep.mubr.msk.f32.mxu0 %vm5804_vm7, %v7971_v34 }
 0x6cd   : > { %5247 = vmatmul.mubr.msk.f32.gmra.mxu0 %vm2391_vm0, %v6054_v2 }
 0x6ce   : > { %5249 = vmatprep.mubr.msk.f32.mxu0 %vm5804_vm7, %v7971_v34 }
 0x6d1   : > { %5250 = vmatmul.mubr.msk.f32.gmra.mxu0 %vm2391_vm0, %v6064_v3 }
 0x6d2   : > { %5252 = vmatprep.mubr.msk.f32.mxu0 %vm5804_vm7, %v7971_v34 }
 0x6d5   : > { %5253 = vmatmul.mubr.msk.f32.gmra.mxu0 %vm2391_vm0, %v6069_v4 }
 0x6d6   : > { %5255 = vmatprep.mubr.msk.f32.mxu0 %vm5804_vm7, %v7971_v34 }
 0x6d9   : > { %5256 = vmatmul.mubr.msk.f32.gmra.mxu0 %vm2391_vm0, %v6074_v5 }
 0x6da   : > { %5258 = vmatprep.mubr.msk.f32.mxu0 %vm5804_vm7, %v7971_v34 }
 0x6dd   : > { %5259 = vmatmul.mubr.msk.f32.gmra.mxu0 %vm2391_vm0, %v6079_v6 }
 0x6de   : > { %5261 = vmatprep.mubr.msk.f32.mxu0 %vm5804_vm7, %v7971_v34 }
 0x6e1   : > { %5262 = vmatmul.mubr.msk.f32.gmra.mxu0 %vm2391_vm0, %v6084_v7 }
 0x6e2   : > { %5264 = vmatprep.mubr.msk.f32.mxu0 %vm5804_vm7, %v7971_v34 }
 0x6e3   : > { %v2385_v18 = vpop.xlane.xlu0 %2384 }
 0x6e4   : > { %v2386_v20 = vmul.f32 0.0009765625, %v2385_v18 }
 0x6e5   : > { %5265 = vmatmul.mubr.msk.f32.gmra.mxu0 %vm2391_vm0, %v6089_v8 }
 0x6e6   : > { %v2388_v21 = vsub.f32 %v2386_v20, %v2387_v19  ;;  %5267 = vmatprep.mubr.msk.f32.mxu0 %vm5804_vm7, %v7971_v34 }
 0x6e8   : > { %v2389_v22 = vadd.f32 1e-08, %v2388_v21 }
 0x6e9   : > { %5268 = vmatmul.mubr.msk.f32.gmra.mxu0 %vm2391_vm0, %v6095_v9 }
 0x6ea   : > { %5629 = vrsqrt.f32 %v2389_v22  ;;  %5270 = vmatprep.mubr.msk.f32.mxu0 %vm5804_vm7, %v7971_v34 }
 0x6ed   : > { %5271 = vmatmul.mubr.msk.f32.gmra.mxu0 %vm2391_vm0, %v6100_v10 }
 0x6ee   : > { %5273 = vmatprep.mubr.msk.f32.mxu0 %vm5804_vm7, %v7971_v34 }
 0x6f1   : > { %5274 = vmatmul.mubr.msk.f32.gmra.mxu0 %vm2391_vm0, %v6105_v11 }
 0x6f2   : > { %5276 = vmatprep.mubr.msk.f32.mxu0 %vm5804_vm7, %v7971_v34 }
 0x6f5   : > { %5277 = vmatmul.mubr.msk.f32.gmra.mxu0 %vm2391_vm0, %v6113_v12 }
 0x6f6   : > { %5279 = vmatprep.mubr.msk.f32.mxu0 %vm5804_vm7, %v7971_v34 }
 0x6f7   : > { %v5630_v23 = vpop.eup %5629 }
 0x6f8   : > { %5292 = vmatpush3.msk.msra.mxu1 %vm2443_vm15, %v5630_v23 }
 0x6f9   : > { %5280 = vmatmul.mubr.msk.f32.gmra.mxu0 %vm2391_vm0, %v6118_v13  ;;  %5294 = vmatmul.mubr.msk.f32.vlgmr.msra.gmra.mxu1 %vm2391_vm0, %v6044_v0 }
 0x6fa   : > { %5282 = vmatprep.mubr.msk.f32.mxu0 %vm5804_vm7, %v7971_v34  ;;  %5296 = vmatprep.mubr.msk.f32.mxu1 %vm5804_vm7, %v7971_v34 }
 0x6fb   : > { %3461 = vmatprep.subr.mxu1 %v7971_v34 }
 0x6fd   : > { %5283 = vmatmul.mubr.msk.f32.gmra.mxu0 %vm2391_vm0, %v8053_v24  ;;  %5297 = vmatmul.mubr.msk.f32.gmra.mxu1 %vm2391_vm0, %v6049_v1 }
 0x6fe   : > { %5285 = vmatprep.mubr.msk.f32.mxu0 %vm5804_vm7, %v7971_v34  ;;  %5299 = vmatprep.mubr.msk.f32.mxu1 %vm5804_vm7, %v7971_v34 }
 0x701   : > { %5286 = vmatmul.mubr.msk.f32.gmra.mxu0 %vm2391_vm0, %v8054_v25  ;;  %5300 = vmatmul.mubr.msk.f32.gmra.mxu1 %vm2391_vm0, %v6054_v2 }
 0x702   : > { %5288 = vmatprep.mubr.msk.f32.mxu0 %vm5804_vm7, %v7971_v34  ;;  %5302 = vmatprep.mubr.msk.f32.mxu1 %vm5804_vm7, %v7971_v34 }
 0x705   : > { %5289 = vmatmul.mubr.msk.f32.gmra.mxu0 %vm2391_vm0, %v8055_v26  ;;  %5303 = vmatmul.mubr.msk.f32.gmra.mxu1 %vm2391_vm0, %v6064_v3 }
 0x706   : > { %5305 = vmatprep.mubr.msk.f32.mxu1 %vm5804_vm7, %v7971_v34  ;;  %4792 = vmatprep.mubr.msk.f32.mxu0 %vm2218_vm9, %v6784_v42 }
 0x709   : > { %5306 = vmatmul.mubr.msk.f32.gmra.mxu1 %vm2391_vm0, %v6069_v4 }
 0x70a   : > { %5308 = vmatprep.mubr.msk.f32.mxu1 %vm5804_vm7, %v7971_v34 }
 0x70d   : > { %5309 = vmatmul.mubr.msk.f32.gmra.mxu1 %vm2391_vm0, %v6074_v5 }
 0x70e   : > { %5311 = vmatprep.mubr.msk.f32.mxu1 %vm5804_vm7, %v7971_v34 }
 0x711   : > { %5312 = vmatmul.mubr.msk.f32.gmra.mxu1 %vm2391_vm0, %v6079_v6 }
 0x712   : > { %5314 = vmatprep.mubr.msk.f32.mxu1 %vm5804_vm7, %v7971_v34 }
 0x715   : > { %5315 = vmatmul.mubr.msk.f32.gmra.mxu1 %vm2391_vm0, %v6084_v7 }
 0x716   : > { %5317 = vmatprep.mubr.msk.f32.mxu1 %vm5804_vm7, %v7971_v34 }
 0x719   : > { %5318 = vmatmul.mubr.msk.f32.gmra.mxu1 %vm2391_vm0, %v6089_v8 }
 0x71a   : > { %5320 = vmatprep.mubr.msk.f32.mxu1 %vm5804_vm7, %v7971_v34 }
 0x71d   : > { %5321 = vmatmul.mubr.msk.f32.gmra.mxu1 %vm2391_vm0, %v6095_v9 }
 0x71e   : > { %5323 = vmatprep.mubr.msk.f32.mxu1 %vm5804_vm7, %v7971_v34 }
 0x721   : > { %5324 = vmatmul.mubr.msk.f32.gmra.mxu1 %vm2391_vm0, %v6100_v10 }
 0x722   : > { %5326 = vmatprep.mubr.msk.f32.mxu1 %vm5804_vm7, %v7971_v34 }
 0x725   : > { %5327 = vmatmul.mubr.msk.f32.gmra.mxu1 %vm2391_vm0, %v6105_v11 }
 0x726   : > { %5329 = vmatprep.mubr.msk.f32.mxu1 %vm5804_vm7, %v7971_v34 }
 0x729   : > { %5330 = vmatmul.mubr.msk.f32.gmra.mxu1 %vm2391_vm0, %v6113_v12 }
 0x72a   : > { %5332 = vmatprep.mubr.msk.f32.mxu1 %vm5804_vm7, %v7971_v34 }
 0x72d   : > { %5333 = vmatmul.mubr.msk.f32.gmra.mxu1 %vm2391_vm0, %v6118_v13  ;;  %v7189_v13 = vld [vmem:[%s8061_s24] ss:$0 sm:$0xff] }
 0x72e   : > { %5335 = vmatprep.mubr.msk.f32.mxu1 %vm5804_vm7, %v7971_v34 }
 0x731   : > { %5336 = vmatmul.mubr.msk.f32.gmra.mxu1 %vm2391_vm0, %v8053_v24 }
 0x732   : > { %5338 = vmatprep.mubr.msk.f32.mxu1 %vm5804_vm7, %v7971_v34 }
 0x735   : > { %5339 = vmatmul.mubr.msk.f32.gmra.mxu1 %vm2391_vm0, %v8054_v25 }
 0x736   : > { %5341 = vmatprep.mubr.msk.f32.mxu1 %vm5804_vm7, %v7971_v34 }
 0x739   : > { %5342 = vmatmul.mubr.msk.f32.gmra.mxu1 %vm2391_vm0, %v8055_v26 }
 0x73a   : > { %4793 = vmatprep.mubr.msk.f32.mxu1 %vm2218_vm9, %v6784_v42  ;;  %v7180_v42 = vld [vmem:[%s8060_s11] ss:$0 sm:$0xff]  ;;  %s7291_s11 = scalar_lea.vmem [#allocation3], %s3122_s23 }
 0x785   : > { %v2513_v27 = vpop.f32.mrf.mxu0 }
 0x786   : > { %2752 = vperm.xlu1 %5628, %v2513_v27  }
 0x787   : > { %v5242_v28 = vpop.f32.mrf.mxu0 }
 0x789   : > { %v2518_v29 = vpop.f32.mrf.mxu0 }
 0x78a   : > { %2757 = vperm.xlu1 %5628, %v2518_v29  }
 0x78b   : > { %v5245_v30 = vpop.f32.mrf.mxu0 }
 0x78d   : > { %v2523_v45 = vpop.f32.mrf.mxu0 }
 0x78e   : > { %2762 = vperm.xlu0 %5627, %v2523_v45  }
 0x78f   : > { %v5248_v51 = vpop.f32.mrf.mxu0 }
 0x791   : > { %v2528_v15 = vpop.f32.mrf.mxu0 }
 0x792   : > { %2767 = vperm.xlu1 %5628, %v2528_v15  }
 0x793   : > { %v5251_v55 = vpop.f32.mrf.mxu0 }
 0x795   : > { %v2533_v32 = vpop.f32.mrf.mxu0 }
 0x796   : > { %2772 = vperm.xlu1 %5628, %v2533_v32  }
 0x797   : > { %v5254_v49 = vpop.f32.mrf.mxu0 }
 0x799   : > { %v2538_v56 = vpop.f32.mrf.mxu0 }
 0x79a   : > { %2777 = vperm.xlu1 %5628, %v2538_v56  }
 0x79b   : > { %v5257_v14 = vpop.f32.mrf.mxu0 }
 0x79d   : > { %v2543_v57 = vpop.f32.mrf.mxu0 }
 0x79e   : > { %2782 = vperm.xlu1 %5628, %v2543_v57  }
 0x79f   : > { %v5260_v46 = vpop.f32.mrf.mxu0 }
 0x7a1   : > { %v2548_v59 = vpop.f32.mrf.mxu0 }
 0x7a2   : > { %2787 = vperm.xlu1 %5628, %v2548_v59  }
 0x7a3   : > { %v5263_v62 = vpop.f32.mrf.mxu0 }
 0x7a5   : > { %v2553_v52 = vpop.f32.mrf.mxu0 }
 0x7a6   : > { %2792 = vperm.xlu1 %5628, %v2553_v52  }
 0x7a7   : > { %v5266_v58 = vpop.f32.mrf.mxu0 }
 0x7a9   : > { %v2558_v63 = vpop.f32.mrf.mxu0 }
 0x7aa   : > { %2797 = vperm.xlu1 %5628, %v2558_v63  }
 0x7ab   : > { %v5269_v50 = vpop.f32.mrf.mxu0 }
 0x7ad   : > { %v2563_v44 = vpop.f32.mrf.mxu0 }
 0x7ae   : > { %2802 = vperm.xlu1 %5628, %v2563_v44  }
 0x7af   : > { %v5272_v18 = vpop.f32.mrf.mxu0 }
 0x7b1   : > { %v2568_v19 = vpop.f32.mrf.mxu0 }
 0x7b2   : > { %2807 = vperm.xlu1 %5628, %v2568_v19  }
 0x7b3   : > { %v5275_v20 = vpop.f32.mrf.mxu0 }
 0x7b5   : > { %v2573_v21 = vpop.f32.mrf.mxu0 }
 0x7b6   : > { %2812 = vperm.xlu1 %5628, %v2573_v21  }
 0x7b7   : > { %v5278_v22 = vpop.f32.mrf.mxu0 }
 0x7b9   : > { %v2578_v23 = vpop.f32.mrf.mxu0  ;;  %v2666_v27 = vpop.f32.mrf.mxu1 }
 0x7ba   : > { %2817 = vperm.xlu1 %5628, %v2578_v23  }
 0x7bb   : > { %v5281_v28 = vpop.f32.mrf.mxu0  ;;  %v5295_v29 = vpop.f32.mrf.mxu1 }
 0x7bd   : > { %v2583_v30 = vpop.f32.mrf.mxu0  ;;  %v2671_v45 = vpop.f32.mrf.mxu1 }
 0x7be   : > { %2854 = vperm.xlu1 %5628, %v2666_v27   ;;  %2822 = vperm.xlu0 %5627, %v2583_v30   ;;  %v7136_v27 = vpop.permute.xlu1 %3007 }
 0x7bf   : > { %v5284_v51 = vpop.f32.mrf.mxu0  ;;  %v5298_v15 = vpop.f32.mrf.mxu1 }
 0x7c1   : > { %v2588_v55 = vpop.f32.mrf.mxu0  ;;  %v2676_v32 = vpop.f32.mrf.mxu1 }
 0x7c2   : > { %2859 = vperm.xlu0 %5627, %v2671_v45   ;;  %2827 = vperm.xlu1 %5628, %v2588_v55   ;;  %v7138_v45 = vpop.permute.xlu1 %3017 }
 0x7c3   : > { %v5287_v49 = vpop.f32.mrf.mxu0  ;;  %v5301_v56 = vpop.f32.mrf.mxu1 }
 0x7c5   : > { %v2593_v14 = vpop.f32.mrf.mxu0  ;;  %v2681_v57 = vpop.f32.mrf.mxu1 }
 0x7c6   : > { %2864 = vperm.xlu1 %5628, %v2676_v32   ;;  %2832 = vperm.xlu0 %5627, %v2593_v14   ;;  %v7140_v32 = vpop.permute.xlu1 %3027 }
 0x7c7   : > { %v5304_v46 = vpop.f32.mrf.mxu1  ;;  %v5290_v59 = vpop.f32.mrf.mxu0 }
 0x7c9   : > { %v2686_v62 = vpop.f32.mrf.mxu1 }
 0x7ca   : > { %2874 = vperm.xlu1 %5628, %v2686_v62   ;;  %2869 = vperm.xlu0 %5627, %v2681_v57   ;;  %v7142_v57 = vpop.permute.xlu1 %3037 }
 0x7cb   : > { %v5307_v52 = vpop.f32.mrf.mxu1 }
 0x7cd   : > { %v2691_v58 = vpop.f32.mrf.mxu1 }
 0x7ce   : > { %2879 = vperm.xlu0 %5627, %v2691_v58   ;;  %v7144_v52 = vpop.permute.xlu1 %3047 }
 0x7cf   : > { %v5310_v63 = vpop.f32.mrf.mxu1 }
 0x7d0   : > { %v8056_v63 = vld [vmem:[#allocation38_spill] sm:$0xff] }
 0x7d1   : > { %v2696_v50 = vpop.f32.mrf.mxu1 }
 0x7d2   : > { %2884 = vperm.xlu1 %5628, %v2696_v50  }
 0x7d3   : > { %v5313_v44 = vpop.f32.mrf.mxu1 }
 0x7d4   : > { %v7147_v44 = vpop.permute.xlu1 %3057 }
 0x7d5   : > { %v2701_v18 = vpop.f32.mrf.mxu1 }
 0x7d6   : > { %2889 = vperm.xlu0 %5627, %v2701_v18   ;;  %v8057_v18 = vld [vmem:[#allocation37_spill] sm:$0xff] }
 0x7d7   : > { %v5316_v19 = vpop.f32.mrf.mxu1 }
 0x7d8   : > { %v8058_v19 = vld [vmem:[#allocation40_spill] sm:$0xff] }
 0x7d9   : > { %v2706_v20 = vpop.f32.mrf.mxu1 }
 0x7da   : > { %2894 = vperm.xlu1 %5628, %v2706_v20   ;;  %v8059_v20 = vld [vmem:[#allocation39_spill] sm:$0xff] }
 0x7db   : > { %v5319_v21 = vpop.f32.mrf.mxu1 }
 0x7dd   : > { %v2711_v22 = vpop.f32.mrf.mxu1 }
 0x7de   : > { %2899 = vperm.xlu0 %5627, %v2711_v22  }
 0x7df   : > { %v5322_v23 = vpop.f32.mrf.mxu1 }
 0x7e0   : > { %v3003_v23 = vpop.permute.xlu0 %3002 }
 0x7e1   : > { %v2716_v28 = vpop.f32.mrf.mxu1 }
 0x7e2   : > { %2904 = vperm.xlu1 %5628, %v2716_v28  }
 0x7e3   : > { %v5325_v29 = vpop.f32.mrf.mxu1 }
 0x7e4   : > { %v3013_v29 = vpop.permute.xlu0 %3012 }
 0x7e5   : > { %v2721_v30 = vpop.f32.mrf.mxu1 }
 0x7e6   : > { %2909 = vperm.xlu0 %5627, %v2721_v30  }
 0x7e7   : > { %v5328_v51 = vpop.f32.mrf.mxu1 }
 0x7e9   : > { %v2726_v15 = vpop.f32.mrf.mxu1 }
 0x7ea   : > { %2914 = vperm.xlu1 %5628, %v2726_v15   ;;  %v3023_v15 = vpop.permute.xlu0 %3022 }
 0x7eb   : > { %v5331_v55 = vpop.f32.mrf.mxu1 }
 0x7ed   : > { %v2731_v49 = vpop.f32.mrf.mxu1 }
 0x7ee   : > { %2919 = vperm.xlu0 %5627, %v2731_v49   ;;  %v7152_v49 = vpop.permute.xlu0 %3032 }
 0x7ef   : > { %v5334_v56 = vpop.f32.mrf.mxu1 }
 0x7f1   : > { %v2736_v14 = vpop.f32.mrf.mxu1 }
 0x7f2   : > { %2924 = vperm.xlu1 %5628, %v2736_v14  }
 0x7f3   : > { %v5337_v46 = vpop.f32.mrf.mxu1 }
 0x7f4   : > { %v7158_v46 = vpop.permute.xlu0 %3042 }
 0x7f5   : > { %v2741_v59 = vpop.f32.mrf.mxu1 }
 0x7f6   : > { %2929 = vperm.xlu0 %5627, %v2741_v59  }
 0x7f7   : > { %v5340_v62 = vpop.f32.mrf.mxu1 }
 0x7f8   : > { %v7162_v62 = vpop.permute.xlu0 %3052 }
 0x7f9   : > { %v2746_v58 = vpop.f32.mrf.mxu1 }
 0x7fa   : > { %2934 = vperm.xlu1 %5628, %v2746_v58   ;;  %3072 = vperm.xlu0 %5627, %v8056_v63  }
 0x7fb   : > { %v5343_v50 = vpop.f32.mrf.mxu1 }
 0x7fc   : > { %v7168_v50 = vpop.permute.xlu0 %3062 }
 0x7fe   : > { %3067 = vperm.xlu1 %5628, %v8057_v18   ;;  %3082 = vperm.xlu0 %5627, %v8058_v19  }
 0x801   : > { %v2753_v21 = vpop.permute.xlu1 %2752 }
 0x802   : > { %3077 = vperm.xlu1 %5628, %v8059_v20   ;;  %v2835_v34 = vsub.f32 %v6916_v61, %v2753_v21 }
 0x805   : > { %v2758_v22 = vpop.permute.xlu1 %2757 }
 0x806   : > { %v2836_v12 = vsub.f32 %v6912_v53, %v2758_v22 }
 0x809   : > { %v2763_v19 = vpop.permute.xlu0 %2762 }
 0x80a   : > { %v2837_v8 = vsub.f32 %v6907_v47, %v2763_v19 }
 0x80d   : > { %v2768_v28 = vpop.permute.xlu1 %2767 }
 0x80e   : > { %v2838_v22 = vsub.f32 %v6902_v37, %v2768_v28 }
 0x811   : > { %v2773_v30 = vpop.permute.xlu1 %2772 }
 0x812   : > { %v2839_v5 = vsub.f32 %v6895_v39, %v2773_v30 }
 0x815   : > { %v2778_v51 = vpop.permute.xlu1 %2777 }
 0x819   : > { %v2783_v55 = vpop.permute.xlu1 %2782 }
 0x81a   : > { %v2841_v30 = vsub.f32 %v6881_v36, %v2783_v55 }
 0x81d   : > { %v7154_v56 = vpop.permute.xlu1 %2787 }
 0x821   : > { %v7156_v14 = vpop.permute.xlu1 %2792 }
 0x825   : > { %v7160_v59 = vpop.permute.xlu1 %2797 }
 0x829   : > { %v7164_v58 = vpop.permute.xlu1 %2802 }
 0x82d   : > { %v7166_v63 = vpop.permute.xlu1 %2807 }
 0x831   : > { %v7170_v18 = vpop.permute.xlu1 %2812 }
 0x835   : > { %v7172_v20 = vpop.permute.xlu1 %2817 }
 0x839   : > { %v2855_v26 = vpop.permute.xlu1 %2854  ;;  %v7182_v25 = vpop.permute.xlu0 %2822 }
 0x83a   : > { %v2937_v24 = vmul.f32 %v2855_v26, %v2835_v34 }
 0x83c   : > { %v2960_v61 = vmul.f32 %v7180_v42, %v2937_v24 }
 0x83d   : > { %v2860_v21 = vpop.permute.xlu0 %2859  ;;  %v7193_v11 = vpop.permute.xlu1 %2827 }
 0x83e   : > { %v2983_v10 = vadd.f32 %v7189_v13, %v2960_v61  ;;  %v2938_v9 = vmul.f32 %v2860_v21, %v2836_v12  ;;  %v2840_v21 = vsub.f32 %v6888_v60, %v2778_v51 }
 0x840   : > { %v3085_v34 = vmul.f32 %v3003_v23, %v2983_v10  ;;  %v2961_v26 = vmul.f32 %v7180_v42, %v2938_v9 }
 0x841   : > { %v2865_v7 = vpop.permute.xlu1 %2864  ;;  %v7198_v6 = vpop.permute.xlu0 %2832 }
 0x842   : > { %3103 = vst.msk [vmem:[#allocation3 + $0x8] sm:$0xff] %vm3102_vm1, %v3085_v34  ;;  %v2984_v53 = vadd.f32 %v7189_v13, %v2961_v26  ;;  %v2939_v24 = vmul.f32 %v2865_v7, %v2837_v8 }
 0x844   : > { %v3086_v12 = vmul.f32 %v7136_v27, %v2984_v53  ;;  %v2962_v61 = vmul.f32 %v7180_v42, %v2939_v24  ;;  %v2842_v24 = vsub.f32 %v6874_v31, %v7154_v56  ;;  %v2844_v56 = vsub.f32 %v6860_v41, %v7160_v59 }
 0x845   : > { %v2875_v47 = vpop.permute.xlu1 %2874  ;;  %v2870_v10 = vpop.permute.xlu0 %2869  ;;  %v2846_v59 = vsub.f32 %v6846_v54, %v7166_v63 }
 0x846   : > { %3104 = vst.msk [vmem:[#allocation3 + $0x10] sm:$0xff] %vm3102_vm1, %v3086_v12  ;;  %v2985_v9 = vadd.f32 %v7189_v13, %v2962_v61  ;;  %v2941_v23 = vmul.f32 %v2875_v47, %v2839_v5  ;;  %v2940_v19 = vmul.f32 %v2870_v10, %v2838_v22  ;;  %v2843_v12 = vsub.f32 %v6867_v16, %v7156_v14 }
 0x847   : > { %v2845_v14 = vsub.f32 %v6853_v33, %v7164_v58  ;;  %v2847_v58 = vsub.f32 %v6840_v35, %v7170_v18  ;;  %v2849_v35 = vsub.f32 %v6828_v38, %v7182_v25  ;;  %v2851_v38 = vsub.f32 %v6920_v40, %v7198_v6 }
 0x848   : > { %v3087_v34 = vmul.f32 %v3013_v29, %v2985_v9  ;;  %v2964_v7 = vmul.f32 %v7180_v42, %v2941_v23  ;;  %v2963_v8 = vmul.f32 %v7180_v42, %v2940_v19 }
 0x849   : > { %v2880_v39 = vpop.permute.xlu0 %2879 }
 0x84a   : > { %3105 = vst.msk [vmem:[#allocation3 + $0x18] sm:$0xff] %vm3102_vm1, %v3087_v34  ;;  %v2987_v37 = vadd.f32 %v7189_v13, %v2964_v7  ;;  %v2986_v27 = vadd.f32 %v7189_v13, %v2963_v8  ;;  %v2942_v28 = vmul.f32 %v2880_v39, %v2840_v21 }
 0x84c   : > { %v3089_v26 = vmul.f32 %v3023_v15, %v2987_v37  ;;  %v3088_v5 = vmul.f32 %v7138_v45, %v2986_v27  ;;  %v2965_v60 = vmul.f32 %v7180_v42, %v2942_v28 }
 0x84d   : > { %v2885_v29 = vpop.permute.xlu1 %2884 }
 0x84e   : > { %3107 = vst.msk [vmem:[#allocation3 + $0x28] sm:$0xff] %vm3102_vm1, %v3089_v26  ;;  %3106 = vst.msk [vmem:[#allocation3 + $0x20] sm:$0xff] %vm3102_vm1, %v3088_v5  ;;  %v2988_v51 = vadd.f32 %v7189_v13, %v2965_v60  ;;  %v2943_v53 = vmul.f32 %v2885_v29, %v2841_v30  ;;  %v2848_v29 = vsub.f32 %v6834_v43, %v7172_v20 }
 0x850   : > { %v3090_v22 = vmul.f32 %v7140_v32, %v2988_v51  ;;  %v2966_v36 = vmul.f32 %v7180_v42, %v2943_v53 }
 0x851   : > { %v2890_v15 = vpop.permute.xlu0 %2889 }
 0x852   : > { %3108 = vst.msk [vmem:[#allocation3 + $0x30] sm:$0xff] %vm3102_vm1, %v3090_v22  ;;  %v2989_v45 = vadd.f32 %v7189_v13, %v2966_v36  ;;  %v2944_v55 = vmul.f32 %v2890_v15, %v2842_v24  ;;  %v2850_v22 = vsub.f32 %v6822_v48, %v7193_v11  ;;  %v3141_v48 = vlaneseq }
 0x854   : > { %v3091_v61 = vmul.f32 %v7152_v49, %v2989_v45  ;;  %v2967_v47 = vmul.f32 %v7180_v42, %v2944_v55 }
 0x855   : > { %v2895_v10 = vpop.permute.xlu1 %2894 }
 0x856   : > { %3109 = vst.msk [vmem:[#allocation3 + $0x38] sm:$0xff] %vm3102_vm1, %v3091_v61  ;;  %v2990_v31 = vadd.f32 %v7189_v13, %v2967_v47  ;;  %v2945_v32 = vmul.f32 %v2895_v10, %v2843_v12 }
 0x858   : > { %v3092_v9 = vmul.f32 %v7142_v57, %v2990_v31  ;;  %v2968_v23 = vmul.f32 %v7180_v42, %v2945_v32  ;;  %v3142_v31 = vshrl.u32 %v3141_v48, 7 }
 0x859   : > { %v2900_v19 = vpop.permute.xlu0 %2899 }
 0x85a   : > { %3110 = vst.msk [vmem:[#allocation3 + $0x40] sm:$0xff] %vm3102_vm1, %v3092_v9  ;;  %v2991_v16 = vadd.f32 %v7189_v13, %v2968_v23  ;;  %v2946_v49 = vmul.f32 %v2900_v19, %v2844_v56  ;;  %v3143_v9 = vsub.s32 0, %v3142_v31  ;;  %v3201_v23 = vsub.s32 1, %v3142_v31  ;;  %v3120_v19 = vld [vmem:[%s6231_s25] sm:$0x7]  ;;  %s7297_s25 = scalar_lea.vmem [#allocation3], %s3238_s21 }
 0x85c   : > { %v3093_v21 = vmul.f32 %v7158_v46, %v2991_v16  ;;  %v2969_v34 = vmul.f32 %v7180_v42, %v2946_v49  ;;  %v3259_v16 = vsub.s32 2, %v3142_v31  ;;  %v7285_v49 = vrot.slane %v3120_v19, %v3143_v9 }
 0x85d   : > { %v2905_v7 = vpop.permute.xlu1 %2904 }
 0x85e   : > { %3111 = vst.msk [vmem:[#allocation3 + $0x48] sm:$0xff] %vm3102_vm1, %v3093_v21  ;;  %v2992_v41 = vadd.f32 %v7189_v13, %v2969_v34  ;;  %v2947_v57 = vmul.f32 %v2905_v7, %v2845_v14  ;;  %v7287_v14 = vrot.slane %v3120_v19, %v3201_v23  ;;  %v7289_v21 = vrot.slane %v3120_v19, %v3259_v16 }
 0x860   : > { %v3094_v8 = vmul.f32 %v7144_v52, %v2992_v41  ;;  %v2970_v39 = vmul.f32 %v7180_v42, %v2947_v57 }
 0x861   : > { %v2910_v37 = vpop.permute.xlu0 %2909 }
 0x862   : > { %3112 = vst.msk [vmem:[#allocation3 + $0x50] sm:$0xff] %vm3102_vm1, %v3094_v8  ;;  %v2993_v33 = vadd.f32 %v7189_v13, %v2970_v39  ;;  %v2948_v46 = vmul.f32 %v2910_v37, %v2846_v59  ;;  %v7302_v59 = vstv %s3319_s0 }
 0x864   : > { %v3095_v27 = vmul.f32 %v7162_v62, %v2993_v33  ;;  %v2971_v28 = vmul.f32 %v7180_v42, %v2948_v46  ;;  %v7313_v46 = vld [vmem:[%s8062_s5] ss:$0 sm:$0xff] }
 0x865   : > { %v2915_v30 = vpop.permute.xlu1 %2914 }
 0x866   : > { %3113 = vst.msk [vmem:[#allocation3 + $0x58] sm:$0xff] %vm3102_vm1, %v3095_v27  ;;  %v2994_v54 = vadd.f32 %v7189_v13, %v2971_v28  ;;  %v2949_v52 = vmul.f32 %v2915_v30, %v2847_v58 }
 0x868   : > { %v3096_v63 = vmul.f32 %v7147_v44, %v2994_v54  ;;  %v2972_v26 = vmul.f32 %v7180_v42, %v2949_v52 }
 0x869   : > { %v2920_v18 = vpop.permute.xlu0 %2919 }
 0x86a   : > { %3114 = vst.msk [vmem:[#allocation3 + $0x60] sm:$0xff] %vm3102_vm1, %v3096_v63  ;;  %v2995_v5 = vadd.f32 %v7189_v13, %v2972_v26  ;;  %v2950_v51 = vmul.f32 %v2920_v18, %v2848_v29 }
 0x86c   : > { %v3097_v62 = vmul.f32 %v7168_v50, %v2995_v5  ;;  %v2973_v25 = vmul.f32 %v7180_v42, %v2950_v51 }
 0x86d   : > { %v2925_v60 = vpop.permute.xlu1 %2924 }
 0x86e   : > { %3115 = vst.msk [vmem:[#allocation3 + $0x68] sm:$0xff] %vm3102_vm1, %v3097_v62  ;;  %v2951_v44 = vmul.f32 %v2925_v60, %v2849_v35  ;;  %v2996_v11 = vadd.f32 %v7189_v13, %v2973_v25 }
 0x870   : > { %v2974_v53 = vmul.f32 %v7180_v42, %v2951_v44 }
 0x871   : > { %v2930_v24 = vpop.permute.xlu0 %2929 }
 0x872   : > { %v2952_v50 = vmul.f32 %v2930_v24, %v2850_v22  ;;  %v2997_v36 = vadd.f32 %v7189_v13, %v2974_v53 }
 0x874   : > { %v2975_v55 = vmul.f32 %v7180_v42, %v2952_v50 }
 0x875   : > { %v2935_v43 = vpop.permute.xlu1 %2934  ;;  %v3073_v20 = vpop.permute.xlu0 %3072 }
 0x876   : > { %v2953_v15 = vmul.f32 %v2935_v43, %v2851_v38  ;;  %v3099_v45 = vmul.f32 %v3073_v20, %v2997_v36 }
 0x878   : > { %v2976_v12 = vmul.f32 %v7180_v42, %v2953_v15  ;;  %3117 = vst.msk [vmem:[#allocation3 + $0x78] sm:$0xff] %vm3102_vm1, %v3099_v45  ;;  %v2998_v42 = vadd.f32 %v7189_v13, %v2975_v55 }
 0x879   : > { %v3068_v6 = vpop.permute.xlu1 %3067  ;;  %v3083_v47 = vpop.permute.xlu0 %3082 }
 0x87a   : > { %v3098_v40 = vmul.f32 %v3068_v6, %v2996_v11  ;;  %v2999_v61 = vadd.f32 %v7189_v13, %v2976_v12 }
 0x87c   : > { %3116 = vst.msk [vmem:[#allocation3 + $0x70] sm:$0xff] %vm3102_vm1, %v3098_v40  ;;  %v3101_v10 = vmul.f32 %v3083_v47, %v2999_v61 }
 0x87d   : > { %v3078_v32 = vpop.permute.xlu1 %3077 }
 0x87e   : > { %3119 = vst.msk [vmem:[#allocation3 + $0x88] sm:$0xff] %vm3102_vm1, %v3101_v10  ;;  %v3100_v56 = vmul.f32 %v3078_v32, %v2998_v42 }
 0x880   : > { %3118 = vst.msk [vmem:[#allocation3 + $0x80] sm:$0xff] %vm3102_vm1, %v3100_v56 }
 0x887   : > { %v3139_v13 = vld [vmem:[%s7291_s11 + $0x78] sm:$0xff]  ;;  %v3138_v8 = vld [vmem:[%s7291_s11 + $0x70] sm:$0xff]  ;;  %v3137_v30 = vld [vmem:[%s7291_s11 + $0x68] sm:$0xff] }
 0x888   : > { %v3197_v34 = vld [vmem:[%s7294_s26 + $0x78] sm:$0xff]  ;;  %v3160_v41 = vmul.f32 %v7285_v49, %v3139_v13  ;;  %v3196_v39 = vld [vmem:[%s7294_s26 + $0x70] sm:$0xff]  ;;  %v3159_v58 = vmul.f32 %v7285_v49, %v3138_v8  ;;  %v3195_v54 = vld [vmem:[%s7294_s26 + $0x68] sm:$0xff]  ;;  %v3158_v26 = vmul.f32 %v7285_v49, %v3137_v30 }
 0x889   : > { %v3255_v7 = vld [vmem:[%s7297_s25 + $0x78] sm:$0xff]  ;;  %v3218_v57 = vmul.f32 %v7287_v14, %v3197_v34  ;;  %v3254_v37 = vld [vmem:[%s7297_s25 + $0x70] sm:$0xff]  ;;  %v3217_v27 = vmul.f32 %v7287_v14, %v3196_v39  ;;  %v3253_v52 = vld [vmem:[%s7297_s25 + $0x68] sm:$0xff]  ;;  %v3216_v5 = vmul.f32 %v7287_v14, %v3195_v54 }
 0x88a   : > { %v3276_v33 = vmul.f32 %v7289_v21, %v3255_v7  ;;  %v3275_v28 = vmul.f32 %v7289_v21, %v3254_v37  ;;  %v3274_v35 = vmul.f32 %v7289_v21, %v3253_v52  ;;  %v3136_v62 = vld [vmem:[%s7291_s11 + $0x60] sm:$0xff]  ;;  %v3135_v24 = vld [vmem:[%s7291_s11 + $0x58] sm:$0xff]  ;;  %v3134_v20 = vld [vmem:[%s7291_s11 + $0x50] sm:$0xff] }
 0x88b   : > { %v3235_v63 = vadd.f32 %v3218_v57, %v3160_v41  ;;  %v3194_v18 = vld [vmem:[%s7294_s26 + $0x60] sm:$0xff]  ;;  %v3234_v29 = vadd.f32 %v3217_v27, %v3159_v58  ;;  %v3157_v44 = vmul.f32 %v7285_v49, %v3136_v62  ;;  %v3193_v22 = vld [vmem:[%s7294_s26 + $0x58] sm:$0xff]  ;;  %v3233_v50 = vadd.f32 %v3216_v5, %v3158_v26  ;;  %v3192_v15 = vld [vmem:[%s7294_s26 + $0x50] sm:$0xff] }
 0x88c   : > { %v3252_v60 = vld [vmem:[%s7297_s25 + $0x60] sm:$0xff]  ;;  %v3215_v51 = vmul.f32 %v7287_v14, %v3194_v18  ;;  %v3251_v38 = vld [vmem:[%s7297_s25 + $0x58] sm:$0xff]  ;;  %v3156_v36 = vmul.f32 %v7285_v49, %v3135_v24  ;;  %v3214_v43 = vmul.f32 %v7287_v14, %v3193_v22  ;;  %v3250_v45 = vld [vmem:[%s7297_s25 + $0x50] sm:$0xff]  ;;  %v3155_v48 = vmul.f32 %v7285_v49, %v3134_v20 }
 0x88d   : > { %v3273_v53 = vmul.f32 %v7289_v21, %v3252_v60  ;;  %v3293_v25 = vadd.f32 %v3276_v33, %v3235_v63  ;;  %v3292_v55 = vadd.f32 %v3275_v28, %v3234_v29  ;;  %v3272_v11 = vmul.f32 %v7289_v21, %v3251_v38  ;;  %v3133_v6 = vld [vmem:[%s7291_s11 + $0x48] sm:$0xff]  ;;  %v3132_v5 = vld [vmem:[%s7291_s11 + $0x40] sm:$0xff]  ;;  %v3189_v22 = vld [vmem:[%s7294_s26 + $0x38] sm:$0xff] }
 0x88e   : > { %v3232_v12 = vadd.f32 %v3215_v51, %v3157_v44  ;;  %v3291_v61 = vadd.f32 %v3274_v35, %v3233_v50  ;;  %v3231_v47 = vadd.f32 %v3214_v43, %v3156_v36  ;;  %v3213_v10 = vmul.f32 %v7287_v14, %v3192_v15  ;;  %v3191_v33 = vld [vmem:[%s7294_s26 + $0x48] sm:$0xff]  ;;  %v3190_v35 = vld [vmem:[%s7294_s26 + $0x40] sm:$0xff]  ;;  %v3131_v44 = vld [vmem:[%s7291_s11 + $0x38] sm:$0xff] }
 0x88f   : > { %v3317_v40 = vadd.f32 %v7313_v46, %v3293_v25  ;;  %v3316_v42 = vadd.f32 %v7313_v46, %v3292_v55  ;;  %v3271_v32 = vmul.f32 %v7289_v21, %v3250_v45  ;;  %v3154_v56 = vmul.f32 %v7285_v49, %v3133_v6  ;;  %v3249_v54 = vld [vmem:[%s7297_s25 + $0x48] sm:$0xff]  ;;  %v3248_v29 = vld [vmem:[%s7297_s25 + $0x40] sm:$0xff]  ;;  %v3247_v36 = vld [vmem:[%s7297_s25 + $0x38] sm:$0xff] }
 0x890   : > { %v3290_v31 = vadd.f32 %v3273_v53, %v3232_v12  ;;  %v3315_v23 = vadd.f32 %v7313_v46, %v3291_v61  ;;  %v3289_v19 = vadd.f32 %v3272_v11, %v3231_v47  ;;  %v3230_v34 = vadd.f32 %v3213_v10, %v3155_v48  ;;  %v3130_v43 = vld [vmem:[%s7291_s11 + $0x30] sm:$0xff]  ;;  %v3129_v10 = vld [vmem:[%s7291_s11 + $0x28] sm:$0xff] }
 0x891   : > { %vm3335_vm2 = vcmp.ge.f32.partialorder %v3317_v40, 0.0  ;;  %v3353_v9 = vmul.f32 %v7302_v59, %v3317_v40  ;;  %vm3334_vm3 = vcmp.ge.f32.partialorder %v3316_v42, 0.0  ;;  %v3352_v16 = vmul.f32 %v7302_v59, %v3316_v42  ;;  %v3188_v48 = vld [vmem:[%s7294_s26 + $0x30] sm:$0xff] }
 0x892   : > { %v3314_v13 = vadd.f32 %v7313_v46, %v3290_v31  ;;  %vm3333_vm4 = vcmp.ge.f32.partialorder %v3315_v23, 0.0  ;;  %v3351_v41 = vmul.f32 %v7302_v59, %v3315_v23  ;;  %v3313_v57 = vadd.f32 %v7313_v46, %v3289_v19  ;;  %v3246_v6 = vld [vmem:[%s7297_s25 + $0x30] sm:$0xff] }
 0x893   : > { %v7350_v7 = vsel %vm3335_vm2, %v3317_v40, %v3353_v9  ;;  %v7357_v39 = vsel %vm3334_vm3, %v3316_v42, %v3352_v16  ;;  %v8063_v58 = vmov 0.0   ;;  %v3288_v26 = vadd.f32 %v3271_v32, %v3230_v34  ;;  %v3245_v9 = vld [vmem:[%s7297_s25 + $0x28] sm:$0xff] }
 0x894   : > { %3375 = vmatpush1.msra.mxu0 %v7350_v7  ;;  %v3459_v8 = vmul.f32 %v7350_v7, %v7350_v7  ;;  %vm3332_vm5 = vcmp.ge.f32.partialorder %v3314_v13, 0.0  ;;  %v3350_v37 = vmul.f32 %v7302_v59, %v3314_v13  ;;  %v3458_v27 = vmul.f32 %v7357_v39, %v7357_v39 }
 0x895   : > { %3376 = vmatprep.subr.mxu0 %v8063_v58  ;;  %v7364_v28 = vsel %vm3333_vm4, %v3315_v23, %v3351_v41  ;;  %vm3331_vm6 = vcmp.ge.f32.partialorder %v3313_v57, 0.0  ;;  %v3349_v30 = vmul.f32 %v7302_v59, %v3313_v57  ;;  %v3212_v60 = vmul.f32 %v7287_v14, %v3191_v33 }
 0x896   : > { %3377 = vmatpush1.msra.mxu0 %v7357_v39  ;;  %3462 = vmatpush1.msra.mxu1 %v3459_v8  ;;  %v3457_v52 = vmul.f32 %v7364_v28, %v7364_v28  ;;  %v7371_v63 = vsel %vm3332_vm5, %v3314_v13, %v3350_v37  ;;  %v3312_v53 = vadd.f32 %v7313_v46, %v3288_v26  ;;  %v3128_v13 = vld [vmem:[%s7291_s11 + $0x20] sm:$0xff] }
 0x897   : > { %3378 = vmatprep.subr.mxu0 %v8063_v58  ;;  %3463 = vmatprep.subr.mxu1 %v8063_v58  ;;  %v3456_v62 = vmul.f32 %v7371_v63, %v7371_v63  ;;  %v7379_v18 = vsel %vm3331_vm6, %v3313_v57, %v3349_v30  ;;  %v3270_v24 = vmul.f32 %v7289_v21, %v3249_v54  ;;  %v3186_v30 = vld [vmem:[%s7294_s26 + $0x20] sm:$0xff] }
 0x898   : > { %3379 = vmatpush1.msra.mxu0 %v7364_v28  ;;  %3464 = vmatpush1.msra.mxu1 %v3458_v27  ;;  %v3455_v51 = vmul.f32 %v7379_v18, %v7379_v18  ;;  %v3229_v38 = vadd.f32 %v3212_v60, %v3154_v56  ;;  %v3153_v25 = vmul.f32 %v7285_v49, %v3132_v5  ;;  %vm3330_vm10 = vcmp.ge.f32.partialorder %v3312_v53, 0.0  ;;  %v3187_v56 = vld [vmem:[%s7294_s26 + $0x28] sm:$0xff]  ;;  %v3244_v54 = vld [vmem:[%s7297_s25 + $0x20] sm:$0xff] }
 0x899   : > { %3380 = vmatprep.subr.mxu0 %v8063_v58  ;;  %3465 = vmatprep.subr.mxu1 %v8063_v58  ;;  %v3211_v50 = vmul.f32 %v7287_v14, %v3190_v35  ;;  %v3348_v20 = vmul.f32 %v7302_v59, %v3312_v53  ;;  %v3269_v15 = vmul.f32 %v7289_v21, %v3248_v29 }
 0x89a   : > { %3381 = vmatpush1.msra.mxu0 %v7371_v63  ;;  %3466 = vmatpush1.msra.mxu1 %v3457_v52  ;;  %v3152_v45 = vmul.f32 %v7285_v49, %v3131_v44  ;;  %v3287_v55 = vadd.f32 %v3270_v24, %v3229_v38  ;;  %v3210_v11 = vmul.f32 %v7287_v14, %v3189_v22  ;;  %v3127_v52 = vld [vmem:[%s7291_s11 + $0x18] sm:$0xff] }
 0x89b   : > { %3382 = vmatprep.subr.mxu0 %v8063_v58  ;;  %3467 = vmatprep.subr.mxu1 %v8063_v58  ;;  %v3228_v12 = vadd.f32 %v3211_v50, %v3153_v25  ;;  %v7406_v40 = vsel %vm3330_vm10, %v3312_v53, %v3348_v20  ;;  %v3268_v61 = vmul.f32 %v7289_v21, %v3247_v36  ;;  %v3243_v25 = vld [vmem:[%s7297_s25 + $0x18] sm:$0xff] }
 0x89c   : > { %3383 = vmatpush1.msra.mxu0 %v7379_v18  ;;  %3468 = vmatpush1.msra.mxu1 %v3456_v62  ;;  %v3151_v47 = vmul.f32 %v7285_v49, %v3130_v43  ;;  %v3454_v42 = vmul.f32 %v7406_v40, %v7406_v40  ;;  %v3311_v31 = vadd.f32 %v7313_v46, %v3287_v55  ;;  %v3126_v55 = vld [vmem:[%s7291_s11 + $0x10] sm:$0xff] }
 0x89d   : > { %3384 = vmatprep.subr.mxu0 %v8063_v58  ;;  %3469 = vmatprep.subr.mxu1 %v8063_v58  ;;  %v3286_v32 = vadd.f32 %v3269_v15, %v3228_v12  ;;  %v3227_v23 = vadd.f32 %v3210_v11, %v3152_v45  ;;  %v3209_v19 = vmul.f32 %v7287_v14, %v3188_v48  ;;  %v3184_v12 = vld [vmem:[%s7294_s26 + $0x10] sm:$0xff] }
 0x89e   : > { %3385 = vmatpush1.msra.mxu0 %v7406_v40  ;;  %3470 = vmatpush1.msra.mxu1 %v3455_v51  ;;  %v3267_v16 = vmul.f32 %v7289_v21, %v3246_v6  ;;  %vm3329_vm11 = vcmp.ge.f32.partialorder %v3311_v31, 0.0  ;;  %v3347_v34 = vmul.f32 %v7302_v59, %v3311_v31  ;;  %v3150_v57 = vmul.f32 %v7285_v49, %v3129_v10  ;;  %v3185_v51 = vld [vmem:[%s7294_s26 + $0x18] sm:$0xff] }
 0x89f   : > { %3386 = vmatprep.subr.mxu0 %v8063_v58  ;;  %3471 = vmatprep.subr.mxu1 %v8063_v58  ;;  %v3310_v41 = vadd.f32 %v7313_v46, %v3286_v32  ;;  %v3285_v8 = vadd.f32 %v3268_v61, %v3227_v23  ;;  %v3226_v37 = vadd.f32 %v3209_v19, %v3151_v47  ;;  %v3125_v23 = vld [vmem:[%s7291_s11 + $0x8] sm:$0xff] }
 0x8a0   : > { %3472 = vmatpush1.msra.mxu1 %v3454_v42  ;;  %v3208_v33 = vmul.f32 %v7287_v14, %v3187_v56  ;;  %v3266_v27 = vmul.f32 %v7289_v21, %v3245_v9  ;;  %v7432_v26 = vsel %vm3329_vm11, %v3311_v31, %v3347_v34  ;;  %v3149_v35 = vmul.f32 %v7285_v49, %v3128_v13  ;;  %v3242_v42 = vld [vmem:[%s7297_s25 + $0x10] sm:$0xff] }
 0x8a1   : > { %3473 = vmatprep.subr.mxu1 %v8063_v58  ;;  %vm3328_vm12 = vcmp.ge.f32.partialorder %v3310_v41, 0.0  ;;  %v3346_v5 = vmul.f32 %v7302_v59, %v3310_v41  ;;  %3387 = vmatpush1.msra.mxu0 %v7432_v26  ;;  %v3453_v62 = vmul.f32 %v7432_v26, %v7432_v26  ;;  %v3309_v60 = vadd.f32 %v7313_v46, %v3285_v8  ;;  %v3183_v8 = vld [vmem:[%s7294_s26 + $0x8] sm:$0xff] }
 0x8a2   : > { %v3284_v29 = vadd.f32 %v3267_v16, %v3226_v37  ;;  %v3225_v44 = vadd.f32 %v3208_v33, %v3150_v57  ;;  %3388 = vmatprep.subr.mxu0 %v8063_v58  ;;  %v3207_v24 = vmul.f32 %v7287_v14, %v3186_v30  ;;  %v3265_v22 = vmul.f32 %v7289_v21, %v3244_v54  ;;  %v3241_v37 = vld [vmem:[%s7297_s25 + $0x8] sm:$0xff]  ;;  %v3124_v33 = vld [vmem:[%s7291_s11] sm:$0xff] }
 0x8a3   : > { %v7443_v53 = vsel %vm3328_vm12, %v3310_v41, %v3346_v5  ;;  %v3148_v38 = vmul.f32 %v7285_v49, %v3127_v52  ;;  %3474 = vmatpush1.msra.mxu1 %v3453_v62  ;;  %vm3327_vm13 = vcmp.ge.f32.partialorder %v3309_v60, 0.0  ;;  %v3345_v36 = vmul.f32 %v7302_v59, %v3309_v60  ;;  %v3182_v62 = vld [vmem:[%s7294_s26] sm:$0xff] }
 0x8a4   : > { %3389 = vmatpush1.msra.mxu0 %v7443_v53  ;;  %v3452_v50 = vmul.f32 %v7443_v53, %v7443_v53  ;;  %v3308_v43 = vadd.f32 %v7313_v46, %v3284_v29  ;;  %3475 = vmatprep.subr.mxu1 %v8063_v58  ;;  %v3283_v20 = vadd.f32 %v3266_v27, %v3225_v44 }
 0x8a5   : > { %3390 = vmatprep.subr.mxu0 %v8063_v58  ;;  %v3224_v15 = vadd.f32 %v3207_v24, %v3149_v35  ;;  %v3206_v45 = vmul.f32 %v7287_v14, %v3185_v51  ;;  %v7459_v11 = vsel %vm3327_vm13, %v3309_v60, %v3345_v36  ;;  %v3264_v6 = vmul.f32 %v7289_v21, %v3243_v25  ;;  %v3240_v60 = vld [vmem:[%s7297_s25] sm:$0xff] }
 0x8a6   : > { %3476 = vmatpush1.msra.mxu1 %v3452_v50  ;;  %vm3326_vm2 = vcmp.ge.f32.partialorder %v3308_v43, 0.0  ;;  %v3344_v48 = vmul.f32 %v7302_v59, %v3308_v43  ;;  %3391 = vmatpush1.msra.mxu0 %v7459_v11  ;;  %v3451_v61 = vmul.f32 %v7459_v11, %v7459_v11  ;;  %v3307_v47 = vadd.f32 %v7313_v46, %v3283_v20 }
 0x8a7   : > { %3477 = vmatprep.subr.mxu1 %v8063_v58  ;;  %v3282_v10 = vadd.f32 %v3265_v22, %v3224_v15  ;;  %3392 = vmatprep.subr.mxu0 %v8063_v58  ;;  %v3223_v32 = vadd.f32 %v3206_v45, %v3148_v38  ;;  %v3147_v56 = vmul.f32 %v7285_v49, %v3126_v55  ;;  %v3140_v22 = vld [vmem:[%s7291_s11 + $0x80] sm:$0xff] }
 0x8a8   : > { %v7470_v31 = vsel %vm3326_vm2, %v3308_v43, %v3344_v48  ;;  %v3205_v9 = vmul.f32 %v7287_v14, %v3184_v12  ;;  %3478 = vmatpush1.msra.mxu1 %v3451_v61  ;;  %vm3325_vm3 = vcmp.ge.f32.partialorder %v3307_v47, 0.0  ;;  %v3343_v16 = vmul.f32 %v7302_v59, %v3307_v47  ;;  %v3198_v15 = vld [vmem:[%s7294_s26 + $0x80] sm:$0xff] }
 0x8a9   : > { %3393 = vmatpush1.msra.mxu0 %v7470_v31  ;;  %v3450_v19 = vmul.f32 %v7470_v31, %v7470_v31  ;;  %v3306_v13 = vadd.f32 %v7313_v46, %v3282_v10  ;;  %3479 = vmatprep.subr.mxu1 %v8063_v58  ;;  %v3281_v34 = vadd.f32 %v3264_v6, %v3223_v32 }
 0x8aa   : > { %3394 = vmatprep.subr.mxu0 %v8063_v58  ;;  %v3222_v41 = vadd.f32 %v3205_v9, %v3147_v56  ;;  %v3263_v57 = vmul.f32 %v7289_v21, %v3242_v42  ;;  %v7486_v27 = vsel %vm3325_vm3, %v3307_v47, %v3343_v16  ;;  %v3146_v54 = vmul.f32 %v7285_v49, %v3125_v23  ;;  %v3256_v47 = vld [vmem:[%s7297_s25 + $0x80] sm:$0xff] }
 0x8ab   : > { %3480 = vmatpush1.msra.mxu1 %v3450_v19  ;;  %vm3324_vm4 = vcmp.ge.f32.partialorder %v3306_v13, 0.0  ;;  %v3342_v30 = vmul.f32 %v7302_v59, %v3306_v13  ;;  %3395 = vmatpush1.msra.mxu0 %v7486_v27  ;;  %v3449_v52 = vmul.f32 %v7486_v27, %v7486_v27  ;;  %v3305_v5 = vadd.f32 %v7313_v46, %v3281_v34 }
 0x8ac   : > { %3481 = vmatprep.subr.mxu1 %v8063_v58  ;;  %v3280_v35 = vadd.f32 %v3263_v57, %v3222_v41  ;;  %3396 = vmatprep.subr.mxu0 %v8063_v58  ;;  %v3204_v44 = vmul.f32 %v7287_v14, %v3183_v8  ;;  %v3262_v51 = vmul.f32 %v7289_v21, %v3241_v37 }
 0x8ad   : > { %v7498_v29 = vsel %vm3324_vm4, %v3306_v13, %v3342_v30  ;;  %v3145_v24 = vmul.f32 %v7285_v49, %v3124_v33  ;;  %3482 = vmatpush1.msra.mxu1 %v3449_v52  ;;  %vm3323_vm5 = vcmp.ge.f32.partialorder %v3305_v5, 0.0  ;;  %v3341_v25 = vmul.f32 %v7302_v59, %v3305_v5 }
 0x8ae   : > { %3397 = vmatpush1.msra.mxu0 %v7498_v29  ;;  %v3448_v38 = vmul.f32 %v7498_v29, %v7498_v29  ;;  %v3304_v50 = vadd.f32 %v7313_v46, %v3280_v35  ;;  %3483 = vmatprep.subr.mxu1 %v8063_v58  ;;  %v3221_v36 = vadd.f32 %v3204_v44, %v3146_v54 }
 0x8af   : > { %3398 = vmatprep.subr.mxu0 %v8063_v58  ;;  %v3203_v43 = vmul.f32 %v7287_v14, %v3182_v62  ;;  %v3261_v20 = vmul.f32 %v7289_v21, %v3240_v60  ;;  %v7514_v45 = vsel %vm3323_vm5, %v3305_v5, %v3341_v25  ;;  %v3161_v12 = vmul.f32 %v7285_v49, %v3140_v22 }
 0x8b0   : > { %3484 = vmatpush1.msra.mxu1 %v3448_v38  ;;  %vm3322_vm6 = vcmp.ge.f32.partialorder %v3304_v50, 0.0  ;;  %v3340_v55 = vmul.f32 %v7302_v59, %v3304_v50  ;;  %3399 = vmatpush1.msra.mxu0 %v7514_v45  ;;  %v3447_v48 = vmul.f32 %v7514_v45, %v7514_v45  ;;  %v3279_v6 = vadd.f32 %v3262_v51, %v3221_v36  ;;  %v8065_v36 = vld [vmem:[#allocation26_spill] sm:$0xff] }
 0x8b1   : > { %3485 = vmatprep.subr.mxu1 %v8063_v58  ;;  %v3220_v61 = vadd.f32 %v3203_v43, %v3145_v24  ;;  %3400 = vmatprep.subr.mxu0 %v8063_v58  ;;  %v3219_v42 = vmul.f32 %v7287_v14, %v3198_v15  ;;  %v3277_v23 = vmul.f32 %v7289_v21, %v3256_v47  ;;  %v8071_v43 = vld [vmem:[#allocation32_spill] sm:$0xff]  ;;  %v8073_v15 = vld [vmem:[#allocation34_spill] sm:$0xff] }
 0x8b2   : > { %v7524_v10 = vsel %vm3322_vm6, %v3304_v50, %v3340_v55  ;;  %3486 = vmatpush1.msra.mxu1 %v3447_v48  ;;  %v3303_v32 = vadd.f32 %v7313_v46, %v3279_v6  ;;  %v8064_v50 = vld [vmem:[#allocation25_spill] sm:$0xff]  ;;  %v8074_v55 = vld [vmem:[#allocation35_spill] sm:$0xff]  ;;  %v4101_v6 = vld [vmem:[%s6270_s30 + $0x10] sm:$0xff] }
 0x8b3   : > { %3401 = vmatpush1.msra.mxu0 %v7524_v10  ;;  %v3446_v49 = vmul.f32 %v7524_v10, %v7524_v10  ;;  %v3278_v56 = vadd.f32 %v3261_v20, %v3220_v61  ;;  %3487 = vmatprep.subr.mxu1 %v8063_v58  ;;  %v3236_v9 = vadd.f32 %v3219_v42, %v3161_v12  ;;  %v8072_v20 = vld [vmem:[#allocation33_spill] sm:$0xff]  ;;  %v8075_v12 = vld [vmem:[#allocation36_spill] sm:$0xff]  ;;  %v4102_v48 = vld [vmem:[%s6270_s30 + $0x18] sm:$0xff] }
 0x8b4   : > { %3402 = vmatprep.subr.mxu0 %v8063_v58  ;;  %vm3321_vm10 = vcmp.ge.f32.partialorder %v3303_v32, 0.0  ;;  %v3339_v19 = vmul.f32 %v7302_v59, %v3303_v32 }
 0x8b5   : > { %3488 = vmatpush1.msra.mxu1 %v3446_v49  ;;  %v3302_v14 = vadd.f32 %v7313_v46, %v3278_v56  ;;  %v3294_v16 = vadd.f32 %v3277_v23, %v3236_v9 }
 0x8b6   : > { %3489 = vmatprep.subr.mxu1 %v8063_v58  ;;  %v7537_v13 = vsel %vm3321_vm10, %v3303_v32, %v3339_v19 }
 0x8b7   : > { %vm3320_vm11 = vcmp.ge.f32.partialorder %v3302_v14, 0.0  ;;  %v3338_v34 = vmul.f32 %v7302_v59, %v3302_v14  ;;  %3403 = vmatpush1.msra.mxu0 %v7537_v13  ;;  %v3445_v41 = vmul.f32 %v7537_v13, %v7537_v13  ;;  %v3318_v21 = vadd.f32 %v7313_v46, %v3294_v16 }
 0x8b8   : > { %3404 = vmatprep.subr.mxu0 %v8063_v58 }
 0x8b9   : > { %v7545_v57 = vsel %vm3320_vm11, %v3302_v14, %v3338_v34  ;;  %3490 = vmatpush1.msra.mxu1 %v3445_v41  ;;  %vm3336_vm12 = vcmp.ge.f32.partialorder %v3318_v21, 0.0  ;;  %v3354_v37 = vmul.f32 %v7302_v59, %v3318_v21  ;;  %v4100_v41 = vld [vmem:[%s6270_s30 + $0x8] sm:$0xff] }
 0x8ba   : > { %3405 = vmatpush1.msra.mxu0 %v7545_v57  ;;  %v3444_v8 = vmul.f32 %v7545_v57, %v7545_v57  ;;  %3491 = vmatprep.subr.mxu1 %v8063_v58 }
 0x8bb   : > { %3436 = vmatprep.subr.mxu0 %v8063_v58  ;;  %v7553_v33 = vsel %vm3336_vm12, %v3318_v21, %v3354_v37 }
 0x8bc   : > { %3492 = vmatpush1.msra.mxu1 %v3444_v8  ;;  %3437 = vmatpush2.msra.mxu0 %v7553_v33  ;;  %v3460_v46 = vmul.f32 %v7553_v33, %v7553_v33 }
 0x8bd   : > { %3523 = vmatprep.subr.mxu1 %v8063_v58  ;;  %3439 = vmatmul.mubr.f32.vlgmr.msra.gmra.mxu0 %v6138_v17 }
 0x8be   : > { %5344 = vmatprep.subr.mxu0 %v8063_v58  ;;  %3524 = vmatpush2.msra.mxu1 %v3460_v46 }
 0x8bf   : > { %5346 = vmatprep.mubr.msk.f32.mxu0 %vm5804_vm7, %v8063_v58  ;;  %3526 = vmatmul.mubr.f32.vlgmr.msra.gmra.mxu1 %v6138_v17 }
 0x8c0   : > { %5397 = vmatprep.subr.mxu1 %v8063_v58  ;;  %5399 = vmatprep.mubr.msk.f32.mxu1 %vm5804_vm7, %v8063_v58 }
 0x97d   : > { %v3440_v59 = vpop.f32.mrf.mxu0 }
 0x97e   : > { %v3531_v30 = vsel %vm2378_vm14, %v3440_v59, 0.0 }
 0x97f   : > { %v3527_v54 = vpop.f32.mrf.mxu1  ;;  %3532 = vadd.xlane.f32.xlu1 %v3531_v30  ;;  %v3442_v52 = vpop.f32.mrf.mxu0 }
 0x980   : > { %v3535_v5 = vsel %vm2378_vm14, %v3527_v54, 0.0  ;;  %v4099_v54 = vld [vmem:[%s6270_s30] sm:$0xff] }
 0x981   : > { %3536 = vadd.xlane.f32.xlu0 %v3535_v5  ;;  %v3529_v35 = vpop.f32.mrf.mxu1 }
 0xa08   : > { %v3533_v62 = vpop.xlane.xlu1 %3532 }
 0xa09   : > { %v3534_v60 = vmul.f32 0.0009765625, %v3533_v62 }
 0xa0a   : > { %v3537_v44 = vpop.xlane.xlu0 %3536 }
 0xa0b   : > { %v3539_v51 = vmul.f32 %v3534_v60, %v3534_v60  ;;  %v3538_v24 = vmul.f32 0.0009765625, %v3537_v44  ;;  %5345 = vmatpush3.msk.msra.mxu0 %vm2443_vm15, %v3534_v60 }
 0xa0c   : > { %5347 = vmatmul.mubr.msk.f32.vlgmr.msra.gmra.mxu0 %vm2391_vm0, %v6044_v0  ;;  %5450 = vmatprep.subr.mxu0 %v8063_v58 }
 0xa0d   : > { %v3540_v22 = vsub.f32 %v3538_v24, %v3539_v51  ;;  %5349 = vmatprep.mubr.msk.f32.mxu0 %vm5804_vm7, %v8063_v58  ;;  %5451 = vmatpush3.msra.mxu0 %v4102_v48 }
 0xa0e   : > { %5452 = vmatprep.subr.mxu0 %v8063_v58 }
 0xa0f   : > { %v3541_v38 = vadd.f32 1e-08, %v3540_v22  ;;  %5453 = vmatpush3.msra.mxu0 %v4101_v6 }
 0xa10   : > { %5350 = vmatmul.mubr.msk.f32.gmra.mxu0 %vm2391_vm0, %v6049_v1  ;;  %5454 = vmatprep.subr.mxu0 %v8063_v58 }
 0xa11   : > { %5631 = vrsqrt.f32 %v3541_v38  ;;  %5352 = vmatprep.mubr.msk.f32.mxu0 %vm5804_vm7, %v8063_v58  ;;  %5455 = vmatpush3.msra.mxu0 %v4100_v41 }
 0xa12   : > { %5456 = vmatprep.subr.mxu0 %v8063_v58 }
 0xa13   : > { %5457 = vmatpush3.msra.mxu0 %v4099_v54 }
 0xa14   : > { %5353 = vmatmul.mubr.msk.f32.gmra.mxu0 %vm2391_vm0, %v6054_v2 }
 0xa15   : > { %5355 = vmatprep.mubr.msk.f32.mxu0 %vm5804_vm7, %v8063_v58 }
 0xa18   : > { %5356 = vmatmul.mubr.msk.f32.gmra.mxu0 %vm2391_vm0, %v6064_v3 }
 0xa19   : > { %5358 = vmatprep.mubr.msk.f32.mxu0 %vm5804_vm7, %v8063_v58 }
 0xa1c   : > { %5359 = vmatmul.mubr.msk.f32.gmra.mxu0 %vm2391_vm0, %v6069_v4 }
 0xa1d   : > { %5361 = vmatprep.mubr.msk.f32.mxu0 %vm5804_vm7, %v8063_v58 }
 0xa1e   : > { %v5632_v25 = vpop.eup %5631 }
 0xa1f   : > { %5398 = vmatpush3.msk.msra.mxu1 %vm2443_vm15, %v5632_v25 }
 0xa20   : > { %5400 = vmatmul.mubr.msk.f32.vlgmr.msra.gmra.mxu1 %vm2391_vm0, %v6044_v0  ;;  %5362 = vmatmul.mubr.msk.f32.gmra.mxu0 %vm2391_vm0, %v8064_v50  ;;  %v8066_v0 = vld [vmem:[#allocation27_spill] sm:$0xff] }
 0xa21   : > { %5402 = vmatprep.mubr.msk.f32.mxu1 %vm5804_vm7, %v8063_v58  ;;  %5364 = vmatprep.mubr.msk.f32.mxu0 %vm5804_vm7, %v8063_v58 }
 0xa24   : > { %5403 = vmatmul.mubr.msk.f32.gmra.mxu1 %vm2391_vm0, %v6049_v1  ;;  %5365 = vmatmul.mubr.msk.f32.gmra.mxu0 %vm2391_vm0, %v8065_v36  ;;  %v8067_v1 = vld [vmem:[#allocation28_spill] sm:$0xff] }
 0xa25   : > { %5405 = vmatprep.mubr.msk.f32.mxu1 %vm5804_vm7, %v8063_v58  ;;  %5367 = vmatprep.mubr.msk.f32.mxu0 %vm5804_vm7, %v8063_v58 }
 0xa28   : > { %5406 = vmatmul.mubr.msk.f32.gmra.mxu1 %vm2391_vm0, %v6054_v2  ;;  %5368 = vmatmul.mubr.msk.f32.gmra.mxu0 %vm2391_vm0, %v8066_v0  ;;  %v8068_v2 = vld [vmem:[#allocation29_spill] sm:$0xff] }
 0xa29   : > { %5408 = vmatprep.mubr.msk.f32.mxu1 %vm5804_vm7, %v8063_v58  ;;  %5370 = vmatprep.mubr.msk.f32.mxu0 %vm5804_vm7, %v8063_v58 }
 0xa2c   : > { %5409 = vmatmul.mubr.msk.f32.gmra.mxu1 %vm2391_vm0, %v6064_v3  ;;  %5371 = vmatmul.mubr.msk.f32.gmra.mxu0 %vm2391_vm0, %v8067_v1  ;;  %v8069_v3 = vld [vmem:[#allocation30_spill] sm:$0xff] }
 0xa2d   : > { %5411 = vmatprep.mubr.msk.f32.mxu1 %vm5804_vm7, %v8063_v58  ;;  %5373 = vmatprep.mubr.msk.f32.mxu0 %vm5804_vm7, %v8063_v58 }
 0xa30   : > { %5412 = vmatmul.mubr.msk.f32.gmra.mxu1 %vm2391_vm0, %v6069_v4  ;;  %5374 = vmatmul.mubr.msk.f32.gmra.mxu0 %vm2391_vm0, %v8068_v2  ;;  %v8070_v4 = vld [vmem:[#allocation31_spill] sm:$0xff] }
 0xa31   : > { %5414 = vmatprep.mubr.msk.f32.mxu1 %vm5804_vm7, %v8063_v58  ;;  %5376 = vmatprep.mubr.msk.f32.mxu0 %vm5804_vm7, %v8063_v58 }
 0xa34   : > { %5415 = vmatmul.mubr.msk.f32.gmra.mxu1 %vm2391_vm0, %v8064_v50  ;;  %5377 = vmatmul.mubr.msk.f32.gmra.mxu0 %vm2391_vm0, %v8069_v3 }
 0xa35   : > { %5417 = vmatprep.mubr.msk.f32.mxu1 %vm5804_vm7, %v8063_v58  ;;  %5379 = vmatprep.mubr.msk.f32.mxu0 %vm5804_vm7, %v8063_v58 }
 0xa38   : > { %5418 = vmatmul.mubr.msk.f32.gmra.mxu1 %vm2391_vm0, %v8065_v36  ;;  %5380 = vmatmul.mubr.msk.f32.gmra.mxu0 %vm2391_vm0, %v8070_v4 }
 0xa39   : > { %5420 = vmatprep.mubr.msk.f32.mxu1 %vm5804_vm7, %v8063_v58  ;;  %5382 = vmatprep.mubr.msk.f32.mxu0 %vm5804_vm7, %v8063_v58 }
 0xa3c   : > { %5421 = vmatmul.mubr.msk.f32.gmra.mxu1 %vm2391_vm0, %v8066_v0  ;;  %5383 = vmatmul.mubr.msk.f32.gmra.mxu0 %vm2391_vm0, %v8071_v43 }
 0xa3d   : > { %5423 = vmatprep.mubr.msk.f32.mxu1 %vm5804_vm7, %v8063_v58  ;;  %5385 = vmatprep.mubr.msk.f32.mxu0 %vm5804_vm7, %v8063_v58 }
 0xa40   : > { %5424 = vmatmul.mubr.msk.f32.gmra.mxu1 %vm2391_vm0, %v8067_v1  ;;  %5386 = vmatmul.mubr.msk.f32.gmra.mxu0 %vm2391_vm0, %v8072_v20 }
 0xa41   : > { %5426 = vmatprep.mubr.msk.f32.mxu1 %vm5804_vm7, %v8063_v58  ;;  %5388 = vmatprep.mubr.msk.f32.mxu0 %vm5804_vm7, %v8063_v58 }
 0xa44   : > { %5427 = vmatmul.mubr.msk.f32.gmra.mxu1 %vm2391_vm0, %v8068_v2  ;;  %5389 = vmatmul.mubr.msk.f32.gmra.mxu0 %vm2391_vm0, %v8073_v15 }
 0xa45   : > { %5429 = vmatprep.mubr.msk.f32.mxu1 %vm5804_vm7, %v8063_v58  ;;  %5391 = vmatprep.mubr.msk.f32.mxu0 %vm5804_vm7, %v8063_v58 }
 0xa48   : > { %5430 = vmatmul.mubr.msk.f32.gmra.mxu1 %vm2391_vm0, %v8069_v3  ;;  %5392 = vmatmul.mubr.msk.f32.gmra.mxu0 %vm2391_vm0, %v8074_v55 }
 0xa49   : > { %5432 = vmatprep.mubr.msk.f32.mxu1 %vm5804_vm7, %v8063_v58  ;;  %5394 = vmatprep.mubr.msk.f32.mxu0 %vm5804_vm7, %v8063_v58 }
 0xa4c   : > { %5433 = vmatmul.mubr.msk.f32.gmra.mxu1 %vm2391_vm0, %v8070_v4  ;;  %5395 = vmatmul.mubr.msk.f32.gmra.mxu0 %vm2391_vm0, %v8075_v12 }
 0xa4d   : > { %5435 = vmatprep.mubr.msk.f32.mxu1 %vm5804_vm7, %v8063_v58  ;;  %5458 = vmatprep.mubr.msk.f32.mxu0 %vm5804_vm7, %v8063_v58 }
 0xa50   : > { %5436 = vmatmul.mubr.msk.f32.gmra.mxu1 %vm2391_vm0, %v8071_v43 }
 0xa51   : > { %5438 = vmatprep.mubr.msk.f32.mxu1 %vm5804_vm7, %v8063_v58 }
 0xa54   : > { %5439 = vmatmul.mubr.msk.f32.gmra.mxu1 %vm2391_vm0, %v8072_v20 }
 0xa55   : > { %5441 = vmatprep.mubr.msk.f32.mxu1 %vm5804_vm7, %v8063_v58 }
 0xa58   : > { %5442 = vmatmul.mubr.msk.f32.gmra.mxu1 %vm2391_vm0, %v8073_v15 }
 0xa59   : > { %5444 = vmatprep.mubr.msk.f32.mxu1 %vm5804_vm7, %v8063_v58 }
 0xa5c   : > { %5445 = vmatmul.mubr.msk.f32.gmra.mxu1 %vm2391_vm0, %v8074_v55 }
 0xa5d   : > { %5447 = vmatprep.mubr.msk.f32.mxu1 %vm5804_vm7, %v8063_v58 }
 0xa60   : > { %5448 = vmatmul.mubr.msk.f32.gmra.mxu1 %vm2391_vm0, %v8075_v12 }
 0xacc   : > { %v3612_v61 = vpop.f32.mrf.mxu0 }
 0xacd   : > { %3851 = vperm.xlu0 %5627, %v3612_v61  }
 0xace   : > { %v5348_v47 = vpop.f32.mrf.mxu0 }
 0xad0   : > { %v3617_v42 = vpop.f32.mrf.mxu0 }
 0xad2   : > { %v5351_v49 = vpop.f32.mrf.mxu0 }
 0xad4   : > { %v3622_v32 = vpop.f32.mrf.mxu0 }
 0xad6   : > { %v5354_v56 = vpop.f32.mrf.mxu0 }
 0xad8   : > { %v3627_v9 = vpop.f32.mrf.mxu0 }
 0xada   : > { %v5357_v23 = vpop.f32.mrf.mxu0 }
 0xadc   : > { %v3632_v19 = vpop.f32.mrf.mxu0 }
 0xade   : > { %v5360_v14 = vpop.f32.mrf.mxu0 }
 0xae0   : > { %v3765_v16 = vpop.f32.mrf.mxu1  ;;  %v3637_v34 = vpop.f32.mrf.mxu0 }
 0xae1   : > { %3953 = vperm.xlu1 %5628, %v3765_v16  }
 0xae2   : > { %v5401_v21 = vpop.f32.mrf.mxu1  ;;  %v5363_v8 = vpop.f32.mrf.mxu0 }
 0xae4   : > { %v3770_v37 = vpop.f32.mrf.mxu1  ;;  %v3642_v46 = vpop.f32.mrf.mxu0 }
 0xae5   : > { %3958 = vperm.xlu0 %5627, %v3770_v37   ;;  %3856 = vperm.xlu1 %5628, %v3617_v42  }
 0xae6   : > { %v5404_v59 = vpop.f32.mrf.mxu1  ;;  %v5366_v30 = vpop.f32.mrf.mxu0 }
 0xae8   : > { %v3775_v52 = vpop.f32.mrf.mxu1  ;;  %v3647_v5 = vpop.f32.mrf.mxu0 }
 0xae9   : > { %3963 = vperm.xlu0 %5627, %v3775_v52   ;;  %3861 = vperm.xlu1 %5628, %v3622_v32  }
 0xaea   : > { %v5407_v35 = vpop.f32.mrf.mxu1  ;;  %v5369_v62 = vpop.f32.mrf.mxu0 }
 0xaec   : > { %v3780_v60 = vpop.f32.mrf.mxu1  ;;  %v3652_v44 = vpop.f32.mrf.mxu0 }
 0xaed   : > { %3968 = vperm.xlu0 %5627, %v3780_v60   ;;  %3866 = vperm.xlu1 %5628, %v3627_v9  }
 0xaee   : > { %v5410_v51 = vpop.f32.mrf.mxu1  ;;  %v5372_v24 = vpop.f32.mrf.mxu0 }
 0xaef   : > { %v7719_v24 = vld [vmem:[%s8076_s15] ss:$0 sm:$0xff] }
 0xaf0   : > { %v3785_v22 = vpop.f32.mrf.mxu1  ;;  %v3657_v38 = vpop.f32.mrf.mxu0 }
 0xaf1   : > { %3973 = vperm.xlu0 %5627, %v3785_v22   ;;  %3871 = vperm.xlu1 %5628, %v3632_v19  }
 0xaf2   : > { %v5413_v25 = vpop.f32.mrf.mxu1  ;;  %v5375_v50 = vpop.f32.mrf.mxu0 }
 0xaf3   : > { %v7726_v25 = vld [vmem:[%s852_s1] ss:$0 sm:$0xff] }
 0xaf4   : > { %v3790_v36 = vpop.f32.mrf.mxu1  ;;  %v3662_v0 = vpop.f32.mrf.mxu0 }
 0xaf5   : > { %3978 = vperm.xlu0 %5627, %v3790_v36   ;;  %3876 = vperm.xlu1 %5628, %v3637_v34  }
 0xaf6   : > { %v5416_v1 = vpop.f32.mrf.mxu1  ;;  %v5378_v2 = vpop.f32.mrf.mxu0 }
 0xaf8   : > { %v3795_v3 = vpop.f32.mrf.mxu1  ;;  %v3667_v4 = vpop.f32.mrf.mxu0 }
 0xaf9   : > { %3983 = vperm.xlu0 %5627, %v3795_v3   ;;  %3881 = vperm.xlu1 %5628, %v3642_v46  }
 0xafa   : > { %v5419_v43 = vpop.f32.mrf.mxu1  ;;  %v5381_v20 = vpop.f32.mrf.mxu0 }
 0xafc   : > { %v3800_v15 = vpop.f32.mrf.mxu1  ;;  %v3672_v55 = vpop.f32.mrf.mxu0 }
 0xafd   : > { %3988 = vperm.xlu0 %5627, %v3800_v15   ;;  %3886 = vperm.xlu1 %5628, %v3647_v5  }
 0xafe   : > { %v5422_v12 = vpop.f32.mrf.mxu1  ;;  %v5384_v48 = vpop.f32.mrf.mxu0 }
 0xb00   : > { %v3805_v6 = vpop.f32.mrf.mxu1  ;;  %v3677_v61 = vpop.f32.mrf.mxu0 }
 0xb01   : > { %3993 = vperm.xlu0 %5627, %v3805_v6   ;;  %3891 = vperm.xlu1 %5628, %v3652_v44  }
 0xb02   : > { %v5425_v47 = vpop.f32.mrf.mxu1  ;;  %v5387_v42 = vpop.f32.mrf.mxu0 }
 0xb04   : > { %v3810_v49 = vpop.f32.mrf.mxu1  ;;  %v3682_v32 = vpop.f32.mrf.mxu0 }
 0xb05   : > { %3998 = vperm.xlu0 %5627, %v3810_v49   ;;  %3896 = vperm.xlu1 %5628, %v3657_v38  }
 0xb06   : > { %v5428_v56 = vpop.f32.mrf.mxu1  ;;  %v5390_v9 = vpop.f32.mrf.mxu0 }
 0xb08   : > { %v3815_v23 = vpop.f32.mrf.mxu1  ;;  %v3687_v19 = vpop.f32.mrf.mxu0 }
 0xb09   : > { %4003 = vperm.xlu0 %5627, %v3815_v23   ;;  %3901 = vperm.xlu1 %5628, %v3662_v0  }
 0xb0a   : > { %v5431_v14 = vpop.f32.mrf.mxu1  ;;  %v5393_v16 = vpop.f32.mrf.mxu0 }
 0xb0c   : > { %v3820_v34 = vpop.f32.mrf.mxu1  ;;  %v3692_v41 = vpop.f32.mrf.mxu0 }
 0xb0d   : > { %4008 = vperm.xlu0 %5627, %v3820_v34   ;;  %3906 = vperm.xlu1 %5628, %v3667_v4  }
 0xb0e   : > { %v5434_v21 = vpop.f32.mrf.mxu1  ;;  %v5396_v8 = vpop.f32.mrf.mxu0 }
 0xb10   : > { %v3825_v37 = vpop.f32.mrf.mxu1 }
 0xb11   : > { %4013 = vperm.xlu0 %5627, %v3825_v37   ;;  %3911 = vperm.xlu1 %5628, %v3672_v55  }
 0xb12   : > { %v5437_v46 = vpop.f32.mrf.mxu1 }
 0xb14   : > { %v3830_v59 = vpop.f32.mrf.mxu1 }
 0xb15   : > { %4018 = vperm.xlu0 %5627, %v3830_v59   ;;  %3916 = vperm.xlu1 %5628, %v3677_v61  }
 0xb16   : > { %v5440_v30 = vpop.f32.mrf.mxu1 }
 0xb18   : > { %v3835_v54 = vpop.f32.mrf.mxu1 }
 0xb19   : > { %4023 = vperm.xlu0 %5627, %v3835_v54   ;;  %3921 = vperm.xlu1 %5628, %v3682_v32  }
 0xb1a   : > { %v5443_v52 = vpop.f32.mrf.mxu1 }
 0xb1c   : > { %v3840_v5 = vpop.f32.mrf.mxu1 }
 0xb1d   : > { %4028 = vperm.xlu0 %5627, %v3840_v5   ;;  %3926 = vperm.xlu1 %5628, %v3687_v19  }
 0xb1e   : > { %v5446_v35 = vpop.f32.mrf.mxu1 }
 0xb20   : > { %v3845_v62 = vpop.f32.mrf.mxu1 }
 0xb21   : > { %4033 = vperm.xlu0 %5627, %v3845_v62   ;;  %3931 = vperm.xlu1 %5628, %v3692_v41  }
 0xb22   : > { %v5449_v60 = vpop.f32.mrf.mxu1 }
 0xb48   : > { %v3852_v44 = vpop.permute.xlu0 %3851 }
 0xb49   : > { %v3934_v51 = vsub.f32 %v7545_v57, %v3852_v44 }
 0xb5c   : > { %v3954_v22 = vpop.permute.xlu1 %3953 }
 0xb5d   : > { %v4036_v38 = vmul.f32 %v3954_v22, %v3934_v51 }
 0xb5f   : > { %v4059_v50 = vmul.f32 %v7719_v24, %v4036_v38 }
 0xb60   : > { %v3959_v36 = vpop.permute.xlu0 %3958  ;;  %v3857_v0 = vpop.permute.xlu1 %3856 }
 0xb61   : > { %v4082_v57 = vadd.f32 %v7726_v25, %v4059_v50  ;;  %v3935_v1 = vsub.f32 %v7537_v13, %v3857_v0 }
 0xb63   : > { %v4037_v2 = vmul.f32 %v3959_v36, %v3935_v1  ;;  %5459 = vmatmul.mubr.msk.f32.vlgmr.msra.gmra.mxu0 %vm3102_vm1, %v4082_v57 }
 0xb64   : > { %v3964_v3 = vpop.permute.xlu0 %3963  ;;  %v3862_v4 = vpop.permute.xlu1 %3861  ;;  %5461 = vmatprep.mubr.msk.f32.mxu0 %vm5804_vm7, %v8063_v58 }
 0xb65   : > { %v4060_v43 = vmul.f32 %v7719_v24, %v4037_v2  ;;  %v3936_v20 = vsub.f32 %v7524_v10, %v3862_v4 }
 0xb67   : > { %v4083_v15 = vadd.f32 %v7726_v25, %v4060_v43  ;;  %v4038_v55 = vmul.f32 %v3964_v3, %v3936_v20 }
 0xb68   : > { %v3969_v12 = vpop.permute.xlu0 %3968  ;;  %v3867_v48 = vpop.permute.xlu1 %3866 }
 0xb69   : > { %v4061_v6 = vmul.f32 %v7719_v24, %v4038_v55  ;;  %v3937_v13 = vsub.f32 %v7514_v45, %v3867_v48  ;;  %5462 = vmatmul.mubr.msk.f32.gmra.mxu0 %vm3102_vm1, %v4083_v15 }
 0xb6a   : > { %5464 = vmatprep.mubr.msk.f32.mxu0 %vm5804_vm7, %v8063_v58 }
 0xb6b   : > { %v4084_v61 = vadd.f32 %v7726_v25, %v4061_v6  ;;  %v4039_v47 = vmul.f32 %v3969_v12, %v3937_v13 }
 0xb6c   : > { %v3974_v42 = vpop.permute.xlu0 %3973  ;;  %v3872_v49 = vpop.permute.xlu1 %3871 }
 0xb6d   : > { %v4062_v10 = vmul.f32 %v7719_v24, %v4039_v47  ;;  %v3938_v32 = vsub.f32 %v7498_v29, %v3872_v49  ;;  %5465 = vmatmul.mubr.msk.f32.gmra.mxu0 %vm3102_vm1, %v4084_v61 }
 0xb6e   : > { %5467 = vmatprep.mubr.msk.f32.mxu0 %vm5804_vm7, %v8063_v58 }
 0xb6f   : > { %v4085_v45 = vadd.f32 %v7726_v25, %v4062_v10  ;;  %v4040_v56 = vmul.f32 %v3974_v42, %v3938_v32 }
 0xb70   : > { %v3979_v9 = vpop.permute.xlu0 %3978  ;;  %v3877_v23 = vpop.permute.xlu1 %3876 }
 0xb71   : > { %v4063_v19 = vmul.f32 %v7719_v24, %v4040_v56  ;;  %v3939_v14 = vsub.f32 %v7486_v27, %v3877_v23  ;;  %5468 = vmatmul.mubr.msk.f32.gmra.mxu0 %vm3102_vm1, %v4085_v45 }
 0xb72   : > { %5470 = vmatprep.mubr.msk.f32.mxu0 %vm5804_vm7, %v8063_v58 }
 0xb73   : > { %v4086_v29 = vadd.f32 %v7726_v25, %v4063_v19  ;;  %v4041_v16 = vmul.f32 %v3979_v9, %v3939_v14 }
 0xb74   : > { %v3984_v34 = vpop.permute.xlu0 %3983  ;;  %v3882_v41 = vpop.permute.xlu1 %3881 }
 0xb75   : > { %v4064_v21 = vmul.f32 %v7719_v24, %v4041_v16  ;;  %v3940_v8 = vsub.f32 %v7470_v31, %v3882_v41  ;;  %5471 = vmatmul.mubr.msk.f32.gmra.mxu0 %vm3102_vm1, %v4086_v29 }
 0xb76   : > { %5473 = vmatprep.mubr.msk.f32.mxu0 %vm5804_vm7, %v8063_v58 }
 0xb77   : > { %v4087_v27 = vadd.f32 %v7726_v25, %v4064_v21  ;;  %v4042_v37 = vmul.f32 %v3984_v34, %v3940_v8 }
 0xb78   : > { %v3989_v46 = vpop.permute.xlu0 %3988  ;;  %v3887_v59 = vpop.permute.xlu1 %3886 }
 0xb79   : > { %v4065_v30 = vmul.f32 %v7719_v24, %v4042_v37  ;;  %v3941_v54 = vsub.f32 %v7459_v11, %v3887_v59  ;;  %5474 = vmatmul.mubr.msk.f32.gmra.mxu0 %vm3102_vm1, %v4087_v27 }
 0xb7a   : > { %5476 = vmatprep.mubr.msk.f32.mxu0 %vm5804_vm7, %v8063_v58 }
 0xb7b   : > { %v4088_v31 = vadd.f32 %v7726_v25, %v4065_v30  ;;  %v4043_v52 = vmul.f32 %v3989_v46, %v3941_v54 }
 0xb7c   : > { %v3994_v5 = vpop.permute.xlu0 %3993  ;;  %v3892_v35 = vpop.permute.xlu1 %3891 }
 0xb7d   : > { %v4066_v62 = vmul.f32 %v7719_v24, %v4043_v52  ;;  %v3942_v60 = vsub.f32 %v7443_v53, %v3892_v35  ;;  %5477 = vmatmul.mubr.msk.f32.gmra.mxu0 %vm3102_vm1, %v4088_v31 }
 0xb7e   : > { %5479 = vmatprep.mubr.msk.f32.mxu0 %vm5804_vm7, %v8063_v58 }
 0xb7f   : > { %v4089_v11 = vadd.f32 %v7726_v25, %v4066_v62  ;;  %v4044_v44 = vmul.f32 %v3994_v5, %v3942_v60  ;;  %v5634_v62 = vld [vmem:[#allocation2 + $0x8] sm:$0xff] }
 0xb80   : > { %v3999_v51 = vpop.permute.xlu0 %3998  ;;  %v3897_v22 = vpop.permute.xlu1 %3896 }
 0xb81   : > { %v4067_v38 = vmul.f32 %v7719_v24, %v4044_v44  ;;  %v3943_v50 = vsub.f32 %v7432_v26, %v3897_v22  ;;  %5480 = vmatmul.mubr.msk.f32.gmra.mxu0 %vm3102_vm1, %v4089_v11  ;;  %v5635_v22 = vld [vmem:[#allocation2 + $0x10] sm:$0xff] }
 0xb82   : > { %5482 = vmatprep.mubr.msk.f32.mxu0 %vm5804_vm7, %v8063_v58 }
 0xb83   : > { %v4090_v53 = vadd.f32 %v7726_v25, %v4067_v38  ;;  %v4045_v36 = vmul.f32 %v3999_v51, %v3943_v50 }
 0xb84   : > { %v4004_v0 = vpop.permute.xlu0 %4003  ;;  %v3902_v57 = vpop.permute.xlu1 %3901 }
 0xb85   : > { %v4068_v1 = vmul.f32 %v7719_v24, %v4045_v36  ;;  %v3944_v2 = vsub.f32 %v7406_v40, %v3902_v57  ;;  %5483 = vmatmul.mubr.msk.f32.gmra.mxu0 %vm3102_vm1, %v4090_v53 }
 0xb86   : > { %5485 = vmatprep.mubr.msk.f32.mxu0 %vm5804_vm7, %v8063_v58 }
 0xb87   : > { %v4091_v26 = vadd.f32 %v7726_v25, %v4068_v1  ;;  %v4046_v3 = vmul.f32 %v4004_v0, %v3944_v2  ;;  %v5636_v0 = vld [vmem:[#allocation2 + $0x18] sm:$0xff] }
 0xb88   : > { %v4009_v4 = vpop.permute.xlu0 %4008  ;;  %v3907_v43 = vpop.permute.xlu1 %3906 }
 0xb89   : > { %v4069_v20 = vmul.f32 %v7719_v24, %v4046_v3  ;;  %v3945_v15 = vsub.f32 %v7379_v18, %v3907_v43  ;;  %5486 = vmatmul.mubr.msk.f32.gmra.mxu0 %vm3102_vm1, %v4091_v26  ;;  %v5637_v3 = vld [vmem:[#allocation2 + $0x20] sm:$0xff] }
 0xb8a   : > { %5488 = vmatprep.mubr.msk.f32.mxu0 %vm5804_vm7, %v8063_v58 }
 0xb8b   : > { %v4092_v40 = vadd.f32 %v7726_v25, %v4069_v20  ;;  %v4047_v55 = vmul.f32 %v4009_v4, %v3945_v15 }
 0xb8c   : > { %v4014_v12 = vpop.permute.xlu0 %4013  ;;  %v3912_v48 = vpop.permute.xlu1 %3911 }
 0xb8d   : > { %v4070_v6 = vmul.f32 %v7719_v24, %v4047_v55  ;;  %v3946_v13 = vsub.f32 %v7371_v63, %v3912_v48  ;;  %5489 = vmatmul.mubr.msk.f32.gmra.mxu0 %vm3102_vm1, %v4092_v40  ;;  %v5638_v40 = vld [vmem:[#allocation2 + $0x28] sm:$0xff] }
 0xb8e   : > { %5491 = vmatprep.mubr.msk.f32.mxu0 %vm5804_vm7, %v8063_v58 }
 0xb8f   : > { %v4093_v18 = vadd.f32 %v7726_v25, %v4070_v6  ;;  %v4048_v61 = vmul.f32 %v4014_v12, %v3946_v13  ;;  %v5639_v13 = vld [vmem:[#allocation2 + $0x30] sm:$0xff] }
 0xb90   : > { %v4019_v47 = vpop.permute.xlu0 %4018  ;;  %v3917_v42 = vpop.permute.xlu1 %3916 }
 0xb91   : > { %v4071_v49 = vmul.f32 %v7719_v24, %v4048_v61  ;;  %v3947_v10 = vsub.f32 %v7364_v28, %v3917_v42  ;;  %5492 = vmatmul.mubr.msk.f32.gmra.mxu0 %vm3102_vm1, %v4093_v18 }
 0xb92   : > { %5494 = vmatprep.mubr.msk.f32.mxu0 %vm5804_vm7, %v8063_v58 }
 0xb93   : > { %v4094_v63 = vadd.f32 %v7726_v25, %v4071_v49  ;;  %v4049_v32 = vmul.f32 %v4019_v47, %v3947_v10  ;;  %v5640_v49 = vld [vmem:[#allocation2 + $0x38] sm:$0xff] }
 0xb94   : > { %v4024_v45 = vpop.permute.xlu0 %4023  ;;  %v3922_v56 = vpop.permute.xlu1 %3921 }
 0xb95   : > { %v4072_v9 = vmul.f32 %v7719_v24, %v4049_v32  ;;  %v3948_v23 = vsub.f32 %v7357_v39, %v3922_v56  ;;  %5495 = vmatmul.mubr.msk.f32.gmra.mxu0 %vm3102_vm1, %v4094_v63  ;;  %v5641_v56 = vld [vmem:[#allocation2 + $0x40] sm:$0xff] }
 0xb96   : > { %5497 = vmatprep.mubr.msk.f32.mxu0 %vm5804_vm7, %v8063_v58 }
 0xb97   : > { %v4095_v28 = vadd.f32 %v7726_v25, %v4072_v9  ;;  %v4050_v19 = vmul.f32 %v4024_v45, %v3948_v23 }
 0xb98   : > { %v4029_v14 = vpop.permute.xlu0 %4028  ;;  %v3927_v29 = vpop.permute.xlu1 %3926 }
 0xb99   : > { %v4073_v16 = vmul.f32 %v7719_v24, %v4050_v19  ;;  %v3949_v34 = vsub.f32 %v7350_v7, %v3927_v29  ;;  %5498 = vmatmul.mubr.msk.f32.gmra.mxu0 %vm3102_vm1, %v4095_v28 }
 0xb9a   : > { %5500 = vmatprep.mubr.msk.f32.mxu0 %vm5804_vm7, %v8063_v58 }
 0xb9b   : > { %v4096_v39 = vadd.f32 %v7726_v25, %v4073_v16  ;;  %v4051_v41 = vmul.f32 %v4029_v14, %v3949_v34  ;;  %v5642_v14 = vld [vmem:[#allocation2 + $0x48] sm:$0xff] }
 0xb9c   : > { %v3932_v21 = vpop.permute.xlu1 %3931  ;;  %v4034_v37 = vpop.permute.xlu0 %4033 }
 0xb9d   : > { %v4074_v8 = vmul.f32 %v7719_v24, %v4051_v41  ;;  %v3950_v27 = vsub.f32 %v7553_v33, %v3932_v21  ;;  %5501 = vmatmul.mubr.msk.f32.gmra.mxu0 %vm3102_vm1, %v4096_v39  ;;  %v7832_v33 = vld [vmem:[%s860_s4] ss:$0 sm:$0xff]  ;;  %v5643_v41 = vld [vmem:[#allocation2 + $0x50] sm:$0xff] }
 0xb9e   : > { %5503 = vmatprep.mubr.msk.f32.mxu0 %vm5804_vm7, %v8063_v58 }
 0xb9f   : > { %v4097_v7 = vadd.f32 %v7726_v25, %v4074_v8  ;;  %v4052_v46 = vmul.f32 %v4034_v37, %v3950_v27 }
 0xba1   : > { %v4075_v59 = vmul.f32 %v7719_v24, %v4052_v46  ;;  %5504 = vmatmul.mubr.msk.f32.gmra.mxu0 %vm3102_vm1, %v4097_v7  ;;  %v5633_v24 = vld [vmem:[#allocation2] sm:$0xff]  ;;  %v5644_v7 = vld [vmem:[#allocation2 + $0x58] sm:$0xff] }
 0xba2   : > { %5506 = vmatprep.mubr.msk.f32.mxu0 %vm5804_vm7, %v8063_v58 }
 0xba3   : > { %v4098_v30 = vadd.f32 %v7726_v25, %v4075_v59 }
 0xba5   : > { %5507 = vmatmul.mubr.msk.f32.gmra.mxu0 %vm3102_vm1, %v4098_v30 }
 0xc23   : > { %v4227_v54 = vpop.f32.mrf.mxu0 }
 0xc24   : > { %v4228_v31 = vadd.f32 %v7832_v33, %v4227_v54 }
 0xc25   : > { %v5460_v52 = vpop.f32.mrf.mxu0 }
 0xc26   : > { %v4311_v5 = vadd.f32 %v5633_v24, %v4228_v31  ;;  %v5645_v31 = vld [vmem:[#allocation2 + $0x60] sm:$0xff] }
 0xc28   : > { %4328 = vst.msk [vmem:[#allocation2] sm:$0xff] %vm1959_vm8, %v4311_v5 }
 0xc29   : > { %v4232_v35 = vpop.f32.mrf.mxu0 }
 0xc2a   : > { %v4233_v58 = vadd.f32 %v7832_v33, %v4232_v35 }
 0xc2b   : > { %v5463_v25 = vpop.f32.mrf.mxu0 }
 0xc2c   : > { %v4312_v60 = vadd.f32 %v5634_v62, %v4233_v58  ;;  %v5646_v58 = vld [vmem:[#allocation2 + $0x68] sm:$0xff] }
 0xc2d   : > { %v4237_v11 = vpop.f32.mrf.mxu0 }
 0xc2e   : > { %4329 = vst.msk [vmem:[#allocation2 + $0x8] sm:$0xff] %vm1959_vm8, %v4312_v60  ;;  %v4238_v44 = vadd.f32 %v7832_v33, %v4237_v11 }
 0xc2f   : > { %v5466_v51 = vpop.f32.mrf.mxu0 }
 0xc30   : > { %v4313_v38 = vadd.f32 %v5635_v22, %v4238_v44  ;;  %v5647_v44 = vld [vmem:[#allocation2 + $0x70] sm:$0xff] }
 0xc31   : > { %v4242_v50 = vpop.f32.mrf.mxu0 }
 0xc32   : > { %4330 = vst.msk [vmem:[#allocation2 + $0x10] sm:$0xff] %vm1959_vm8, %v4313_v38  ;;  %v4243_v53 = vadd.f32 %v7832_v33, %v4242_v50 }
 0xc33   : > { %v5469_v36 = vpop.f32.mrf.mxu0 }
 0xc34   : > { %v4314_v57 = vadd.f32 %v5636_v0, %v4243_v53  ;;  %v5648_v53 = vld [vmem:[#allocation2 + $0x78] sm:$0xff] }
 0xc35   : > { %v4247_v1 = vpop.f32.mrf.mxu0 }
 0xc36   : > { %4331 = vst.msk [vmem:[#allocation2 + $0x18] sm:$0xff] %vm1959_vm8, %v4314_v57  ;;  %v4248_v2 = vadd.f32 %v7832_v33, %v4247_v1 }
 0xc37   : > { %v5472_v26 = vpop.f32.mrf.mxu0 }
 0xc38   : > { %v4315_v4 = vadd.f32 %v5637_v3, %v4248_v2  ;;  %v5649_v2 = vld [vmem:[#allocation2 + $0x80] sm:$0xff] }
 0xc39   : > { %v4252_v43 = vpop.f32.mrf.mxu0 }
 0xc3a   : > { %4332 = vst.msk [vmem:[#allocation2 + $0x20] sm:$0xff] %vm1959_vm8, %v4315_v4  ;;  %v4253_v20 = vadd.f32 %v7832_v33, %v4252_v43 }
 0xc3b   : > { %v5475_v15 = vpop.f32.mrf.mxu0 }
 0xc3c   : > { %v4316_v55 = vadd.f32 %v5638_v40, %v4253_v20 }
 0xc3d   : > { %v4257_v12 = vpop.f32.mrf.mxu0 }
 0xc3e   : > { %4333 = vst.msk [vmem:[#allocation2 + $0x28] sm:$0xff] %vm1959_vm8, %v4316_v55  ;;  %v4258_v48 = vadd.f32 %v7832_v33, %v4257_v12 }
 0xc3f   : > { %v5478_v6 = vpop.f32.mrf.mxu0 }
 0xc40   : > { %v4317_v18 = vadd.f32 %v5639_v13, %v4258_v48 }
 0xc41   : > { %v4262_v61 = vpop.f32.mrf.mxu0 }
 0xc42   : > { %4334 = vst.msk [vmem:[#allocation2 + $0x30] sm:$0xff] %vm1959_vm8, %v4317_v18  ;;  %v4263_v47 = vadd.f32 %v7832_v33, %v4262_v61 }
 0xc43   : > { %v5481_v42 = vpop.f32.mrf.mxu0 }
 0xc44   : > { %v4318_v10 = vadd.f32 %v5640_v49, %v4263_v47 }
 0xc45   : > { %v4267_v63 = vpop.f32.mrf.mxu0 }
 0xc46   : > { %4335 = vst.msk [vmem:[#allocation2 + $0x38] sm:$0xff] %vm1959_vm8, %v4318_v10  ;;  %v4268_v32 = vadd.f32 %v7832_v33, %v4267_v63 }
 0xc47   : > { %v5484_v45 = vpop.f32.mrf.mxu0 }
 0xc48   : > { %v4319_v9 = vadd.f32 %v5641_v56, %v4268_v32 }
 0xc49   : > { %v4272_v23 = vpop.f32.mrf.mxu0 }
 0xc4a   : > { %4336 = vst.msk [vmem:[#allocation2 + $0x40] sm:$0xff] %vm1959_vm8, %v4319_v9  ;;  %v4273_v28 = vadd.f32 %v7832_v33, %v4272_v23 }
 0xc4b   : > { %v5487_v19 = vpop.f32.mrf.mxu0 }
 0xc4c   : > { %v4320_v29 = vadd.f32 %v5642_v14, %v4273_v28 }
 0xc4d   : > { %v4277_v16 = vpop.f32.mrf.mxu0 }
 0xc4e   : > { %4337 = vst.msk [vmem:[#allocation2 + $0x48] sm:$0xff] %vm1959_vm8, %v4320_v29  ;;  %v4278_v34 = vadd.f32 %v7832_v33, %v4277_v16 }
 0xc4f   : > { %v5490_v39 = vpop.f32.mrf.mxu0 }
 0xc50   : > { %v4321_v21 = vadd.f32 %v5643_v41, %v4278_v34 }
 0xc51   : > { %v4282_v8 = vpop.f32.mrf.mxu0 }
 0xc52   : > { %4338 = vst.msk [vmem:[#allocation2 + $0x50] sm:$0xff] %vm1959_vm8, %v4321_v21  ;;  %v4283_v27 = vadd.f32 %v7832_v33, %v4282_v8 }
 0xc53   : > { %v5493_v37 = vpop.f32.mrf.mxu0 }
 0xc54   : > { %v4322_v46 = vadd.f32 %v5644_v7, %v4283_v27 }
 0xc55   : > { %v4287_v59 = vpop.f32.mrf.mxu0 }
 0xc56   : > { %4339 = vst.msk [vmem:[#allocation2 + $0x58] sm:$0xff] %vm1959_vm8, %v4322_v46  ;;  %v4288_v30 = vadd.f32 %v7832_v33, %v4287_v59 }
 0xc57   : > { %v5496_v54 = vpop.f32.mrf.mxu0 }
 0xc58   : > { %v4323_v52 = vadd.f32 %v5645_v31, %v4288_v30 }
 0xc59   : > { %v4292_v24 = vpop.f32.mrf.mxu0 }
 0xc5a   : > { %4340 = vst.msk [vmem:[#allocation2 + $0x60] sm:$0xff] %vm1959_vm8, %v4323_v52  ;;  %v4293_v5 = vadd.f32 %v7832_v33, %v4292_v24 }
 0xc5b   : > { %v5499_v35 = vpop.f32.mrf.mxu0 }
 0xc5c   : > { %v4324_v25 = vadd.f32 %v5646_v58, %v4293_v5 }
 0xc5d   : > { %v4297_v62 = vpop.f32.mrf.mxu0 }
 0xc5e   : > { %4341 = vst.msk [vmem:[#allocation2 + $0x68] sm:$0xff] %vm1959_vm8, %v4324_v25  ;;  %v4298_v60 = vadd.f32 %v7832_v33, %v4297_v62 }
 0xc5f   : > { %v5502_v11 = vpop.f32.mrf.mxu0 }
 0xc60   : > { %v4325_v51 = vadd.f32 %v5647_v44, %v4298_v60 }
 0xc61   : > { %v4302_v22 = vpop.f32.mrf.mxu0 }
 0xc62   : > { %4342 = vst.msk [vmem:[#allocation2 + $0x70] sm:$0xff] %vm1959_vm8, %v4325_v51  ;;  %v4303_v38 = vadd.f32 %v7832_v33, %v4302_v22 }
 0xc63   : > { %v5505_v50 = vpop.f32.mrf.mxu0 }
 0xc64   : > { %v4326_v36 = vadd.f32 %v5648_v53, %v4303_v38 }
 0xc65   : > { %v4307_v0 = vpop.f32.mrf.mxu0 }
 0xc66   : > { %4343 = vst.msk [vmem:[#allocation2 + $0x78] sm:$0xff] %vm1959_vm8, %v4326_v36  ;;  %v4308_v57 = vadd.f32 %v7832_v33, %v4307_v0  ;;  %4348 = sbr.rel (%p4850_p13) target bundleno = 3411 (0xd53), region = 124 }
 0xc67   : > { %v5508_v1 = vpop.f32.mrf.mxu0 }
 0xc68   : > { %v4327_v26 = vadd.f32 %v5649_v2, %v4308_v57 }
 0xc6a   : > { %4344 = vst.msk [vmem:[#allocation2 + $0x80] sm:$0xff] %vm1959_vm8, %v4327_v26 }
 0xc6b   : > { %v8077_v4 = vld [vmem:[#allocation41_spill] sm:$0xff]  ;;  %v5806_v43 = vmov 0.0   ;;  %v4363_v20 = vld [vmem:[#allocation2 + $0x70] sm:$0xff]  ;;  %v4361_v33 = vld [vmem:[#allocation2 + $0x60] sm:$0xff]  ;;  %vm4437_vm7 = vcmask 125952  }
 0xc6c   : > { %4851 = vmatprep.mubr.msk.f32.mxu0 %vm2218_vm9, %v8077_v4  ;;  %4366 = vmatprep.subr.mxu0 %v5806_v43  ;;  %v4362_v15 = vld [vmem:[#allocation2 + $0x68] sm:$0xff]  ;;  %v4360_v40 = vld [vmem:[#allocation2 + $0x58] sm:$0xff]  ;;  %v4359_v55 = vld [vmem:[#allocation2 + $0x50] sm:$0xff] }
 0xc6d   : > { %v4364_v3 = vld [vmem:[#allocation2 + $0x78] sm:$0xff]  ;;  %v4358_v12 = vld [vmem:[#allocation2 + $0x48] sm:$0xff]  ;;  %v4357_v48 = vld [vmem:[#allocation2 + $0x40] sm:$0xff] }
 0xc6e   : > { %4367 = vmatpush1.msra.mxu0 %v4364_v3  ;;  %v4356_v6 = vld [vmem:[#allocation2 + $0x38] sm:$0xff]  ;;  %v4355_v13 = vld [vmem:[#allocation2 + $0x30] sm:$0xff]  ;;  %v4354_v18 = vld [vmem:[#allocation2 + $0x28] sm:$0xff] }
 0xc6f   : > { %4368 = vmatprep.subr.mxu0 %v5806_v43  ;;  %v4353_v61 = vld [vmem:[#allocation2 + $0x20] sm:$0xff]  ;;  %v4352_v47 = vld [vmem:[#allocation2 + $0x18] sm:$0xff]  ;;  %v4351_v42 = vld [vmem:[#allocation2 + $0x10] sm:$0xff] }
 0xc70   : > { %4369 = vmatpush1.msra.mxu0 %v4363_v20  ;;  %v4350_v49 = vld [vmem:[#allocation2 + $0x8] sm:$0xff]  ;;  %v4349_v10 = vld [vmem:[#allocation2] sm:$0xff] }
 0xc71   : > { %4370 = vmatprep.subr.mxu0 %v5806_v43  ;;  %v4365_v63 = vld [vmem:[#allocation2 + $0x80] sm:$0xff] }
 0xc72   : > { %4371 = vmatpush1.msra.mxu0 %v4362_v15 }
 0xc73   : > { %4372 = vmatprep.subr.mxu0 %v5806_v43 }
 0xc74   : > { %4373 = vmatpush1.msra.mxu0 %v4361_v33 }
 0xc75   : > { %4374 = vmatprep.subr.mxu0 %v5806_v43 }
 0xc76   : > { %4375 = vmatpush1.msra.mxu0 %v4360_v40 }
 0xc77   : > { %4376 = vmatprep.subr.mxu0 %v5806_v43 }
 0xc78   : > { %4377 = vmatpush1.msra.mxu0 %v4359_v55 }
 0xc79   : > { %4378 = vmatprep.subr.mxu0 %v5806_v43 }
 0xc7a   : > { %4379 = vmatpush1.msra.mxu0 %v4358_v12 }
 0xc7b   : > { %4380 = vmatprep.subr.mxu0 %v5806_v43 }
 0xc7c   : > { %4381 = vmatpush1.msra.mxu0 %v4357_v48 }
 0xc7d   : > { %4382 = vmatprep.subr.mxu0 %v5806_v43 }
 0xc7e   : > { %4383 = vmatpush1.msra.mxu0 %v4356_v6 }
 0xc7f   : > { %4384 = vmatprep.subr.mxu0 %v5806_v43 }
 0xc80   : > { %4385 = vmatpush1.msra.mxu0 %v4355_v13 }
 0xc81   : > { %4386 = vmatprep.subr.mxu0 %v5806_v43 }
 0xc82   : > { %4387 = vmatpush1.msra.mxu0 %v4354_v18 }
 0xc83   : > { %4388 = vmatprep.subr.mxu0 %v5806_v43 }
 0xc84   : > { %4389 = vmatpush1.msra.mxu0 %v4353_v61 }
 0xc85   : > { %4390 = vmatprep.subr.mxu0 %v5806_v43 }
 0xc86   : > { %4391 = vmatpush1.msra.mxu0 %v4352_v47 }
 0xc87   : > { %4392 = vmatprep.subr.mxu0 %v5806_v43 }
 0xc88   : > { %4393 = vmatpush1.msra.mxu0 %v4351_v42 }
 0xc89   : > { %4394 = vmatprep.subr.mxu0 %v5806_v43 }
 0xc8a   : > { %4395 = vmatpush1.msra.mxu0 %v4350_v49 }
 0xc8b   : > { %4396 = vmatprep.subr.mxu0 %v5806_v43 }
 0xc8c   : > { %4397 = vmatpush1.msra.mxu0 %v4349_v10 }
 0xc8d   : > { %4428 = vmatprep.subr.mxu0 %v5806_v43 }
 0xc8e   : > { %4429 = vmatpush2.msra.mxu0 %v4365_v63 }
 0xc8f   : > { %4431 = vmatmul.mubr.f32.vlgmr.msra.gmra.mxu0 %v6138_v17 }
 0xd4f   : > { %v4432_v32 = vpop.f32.mrf.mxu0 }
 0xd50   : > { %v4436_v45 = vmul.f32 0.03125, %v4432_v32 }
 0xd51   : > { %v4434_v56 = vpop.f32.mrf.mxu0 }
 0xd52   : > { %4438 = vst.msk [vmem:[%s820_s10] sm:$0xf] %vm4437_vm7, %v4436_v45 }
 0xd53 PF: > { %s8078_s27 = sld [smem:[#allocation15_spill]]  ;;  %s4853_s4 = sshll.u32 %s5783_s3, 6 }
 0xd54   : > { %s8079_s29 = sld [smem:[#allocation21_spill]]  ;;  %s4453_s24 = sshll.u32 %s820_s10, 4  ;;  %s4454_s24 = int_to_ptr.vmem [resolvable:$true] %s4453_s24 }
 0xd55   : > { %s8080_s26 = sld [smem:[#allocation52_spill]]  ;;  %s5695_s28 = scalar_lea.vmem %s4454_s24, 64 }
 0xd56   : > { %p5696_p0 = scmp.ne.s32.totalorder %s4454_s24, %s5695_s28  ;;  %s5807_s15 = smov [#allocation10]  }
 0xd57   : > { %s5699_s23 = sshll.u32 %s5807_s15, 4  ;;  %s5700_s23 = int_to_ptr.vmem [resolvable:$false] %s5699_s23 }
 0xd58   : > { %s5701_s8 = scalar_lea.vmem %s5700_s23, 128  ;;  %p5702_p8 = scmp.lt.s32.totalorder %s4454_s24, %s5700_s23 }
 0xd59   : > { %s8082_s5 = sand.u32 1, %s8078_s27   ;;  %p5703_p11 = scmp.lt.s32.totalorder %s5701_s8, %s5695_s28 }
 0xd5a   : > { %s4440_s30 = scalar_lea.sflag [#allocation5], %s8082_s5  ;;  %p8083_p2 = scmp.ne.s32.totalorder %s8079_s29, 0 }
 0xd5b   : > { %s8081_s22 = smov %s8080_s26  ;;  %s4451_s25 = scalar_lea.hbm %s8080_s26, %s4853_s4 }
 0xd5c   : > { %p5697_p6 = pnand %p5696_p0, %p8083_p2  ;;  %p5704_p12 = por %p5703_p11, %p5702_p8 }
 0xd5e   : > { %p5698_p7 = pneg %p5697_p6 }
 0xd60   : > { %p5705_p1 = pnand %p5704_p12, %p5698_p7 }
 0xd62   : > { %5708 = shalt.err (!%p5705_p1)
}
 0xd63   : > { %s5709_s3 = scalar_lea.hbm %s4451_s25, 64  ;;  %s5713_s1 = scalar_lea.hbm %s8081_s22, 128 }
 0xd64   : > { %p5710_p4 = scmp.ne.s32.totalorder %s4451_s25, %s5709_s3  ;;  %p5714_p9 = scmp.lt.s32.totalorder %s4451_s25, %s8081_s22 }
 0xd65   : > { %p5715_p10 = scmp.lt.s32.totalorder %s5713_s1, %s5709_s3 }
 0xd66   : > { %p5711_p5 = pnand %p5710_p4, %p8083_p2 }
 0xd67   : > { %p5716_p13 = por %p5715_p10, %p5714_p9 }
 0xd68   : > { %p5712_p3 = pneg %p5711_p5 }
 0xd6a   : > { %p5717_p0 = pnand %p5716_p13, %p5712_p3 }
 0xd6c   : > { %5720 = shalt.err (!%p5717_p0)
}
 0xd6d   : > { %5526 = dma.vmem_to_hbm [thread:$0]  (%p8083_p2), %s4454_s24, 64, %s4451_s25, %s4440_s30  }
 0xd6e PF: > { %s8084_s4 = sld [smem:[#allocation19_spill]] }
 0xd6f   : > { %s8085_s0 = sld [smem:[#allocation14_spill]] }
 0xd70   : > { %s8086_s11 = sld [smem:[#allocation23_spill]] }
 0xd74   : > { %p5548_p6 = scmp.ge.s32.totalorder %s8084_s4, 2 }
 0xd75   : > { %s4465_s26 = sand.u32 1, %s8085_s0  }
 0xd76   : > { %p8087_p7 = scmp.ne.s32.totalorder %s8086_s11, 0  ;;  %s4466_s5 = scalar_lea.sflag [#allocation5], %s4465_s26 }
 0xd78   : > { %p5539_p8 = pnand %p5548_p6, %p8087_p7 }
 0xd7a   : > { %p5540_p11 = pneg %p5539_p8 }
 0xd7c   : > { %5762 = dma.done.wait (%p5540_p11), %s4466_s5, 64  }
 0xd7d   : > { %5764 = vsyncadd (%p5540_p11), %s4466_s5, 4294967232  ;;  %s36_s0 = sadd.s32 1, %s8084_s4   ;;  %s8088_s2 = sld [smem:[#allocation15_spill]] }
 0xd7e   : > { %p33_p12 = scmp.ge.s32.totalorder %s36_s0, 6   ;;  %s8089_s25 = sld [smem:[#allocation16_spill]] }
 0xd7f   : > { %s8090_s26 = sld [smem:[#allocation24_spill]] }
 0xd80   : > { %s8091_s27 = sld [smem:[#allocation17_spill]]  ;;  %35 = sbr.rel (!%p33_p12) target bundleno = 19 (0x13), region = 193 }
 0xd81   : > { %s8092_s3 = sld [smem:[#allocation18_spill]] }
 0xd82   : > { %s8093_s28 = sld [smem:[#allocation20_spill]] }
 0xd83   : > { %s8094_s29 = sld [smem:[#allocation22_spill]] }
 0xd85   :  { %4471 = vsyncpa [#allocation5], 1 }
 0xd86   :  { %4473 = vsyncpa [#allocation5 + $0x1], 1 }
 0xd87   :  { %4474 = vsyncpa [#allocation6], 1 }
 0xd88   :  { %4476 = vsyncpa [#allocation6 + $0x1], 1 }
 0xd89   :  { %4477 = vsyncpa [#allocation8], 1 }

</bundles_post_ra>
